<compile_context>
chip_gen: v7x
topology: tpu7x:2x2x1
jax: 0.10.0
libtpu: 0.0.40
codegen_flags: <defaults>
</compile_context>

<pallas_src>
import numpy as np
import jax
import jax.numpy as jnp
from jax import lax
from jax.experimental import pallas as pl
from jax.experimental.pallas import tpu as pltpu

_EPS = 1e-5          # BatchNorm eps (PyTorch default)
_HP = 128            # LSTM hidden size padded to one full 128-lane tile
_VEC_W = 4 * _HP     # width of the packed per-channel-vector rows


# ----------------------------------------------------------------------------
# Parameter preparation (PyTorch layouts -> kernel layouts)
# ----------------------------------------------------------------------------
def _prep_conv_w(w):
    """(Cout, Cin, K) torch conv weight -> (K*Cin, Cout) im2col weight."""
    cout, cin, k = w.shape
    return jnp.transpose(w, (2, 1, 0)).reshape(k * cin, cout).astype(jnp.float32)


def _bn_fold(gamma, beta, mean, var):
    scale = gamma / jnp.sqrt(var + _EPS)
    shift = beta - mean * scale
    return scale.astype(jnp.float32), shift.astype(jnp.float32)


def _pad_gate_axis(m, h, hp):
    """Zero-pad the last (4*h) axis per-gate to 4*hp (PyTorch gate order i,f,g,o)."""
    m4 = m.reshape(m.shape[:-1] + (4, h))
    m4 = jnp.pad(m4, [(0, 0)] * (m4.ndim - 1) + [(0, hp - h)])
    return m4.reshape(m.shape[:-1] + (4 * hp,))


def _prep_lstm(w_ih, w_hh, b_ih, b_hh, hp=_HP):
    h = w_hh.shape[1]
    wih = _pad_gate_axis(jnp.transpose(w_ih), h, hp)                      # (I, 4hp)
    whh = jnp.pad(_pad_gate_axis(jnp.transpose(w_hh), h, hp),
                  ((0, hp - h), (0, 0)))                                  # (hp, 4hp)
    bias = _pad_gate_axis(b_ih + b_hh, h, hp)                             # (4hp,)
    return wih.astype(jnp.float32), whh.astype(jnp.float32), bias.astype(jnp.float32)


def _prep_head(w1, b1, w2, b2, hp=_HP):
    h = w1.shape[1]
    w1p = jnp.pad(jnp.transpose(w1), ((0, hp - h), (0, 0))).astype(jnp.float32)
    return (w1p, b1.astype(jnp.float32),
            jnp.transpose(w2).astype(jnp.float32), b2.astype(jnp.float32))


def _pool_select_np(B, Lin, K, time_major):
    """0/1 selection matrix for MaxPool1d(2) on the batch-concatenated strip.

    The strip has B segments of Lin rows; conv output (b, l) lives at strip row
    b*Lin + l.  After the pairwise max m[j] = max(y[j], y[j+1]), pooled (b, p)
    is m[b*Lin + 2p].  Cross-batch garbage rows are never selected.
    Returns ((B*P, B*Lin - K) matrix, P)."""
    Lout = Lin - K + 1
    P = Lout // 2
    sel = np.zeros((B * P, B * Lin - K), np.float32)
    for q in range(B * P):
        if time_major:              # output row q = t*B + b  (time-major, for LSTM)
            t, b = divmod(q, B)
            sel[q, b * Lin + 2 * t] = 1.0
        else:                       # output row q = b*P + p  (batch-major strip)
            b, p = divmod(q, P)
            sel[q, b * Lin + 2 * p] = 1.0
    return sel, P


def _pack_rows_np(mats, width, align=8):
    """Stack 2-D numpy mats into one (rows, width) array at `align`-row offsets."""
    parts, offs, r = [], [], 0
    for m in mats:
        offs.append(r)
        parts.append(np.pad(m, ((0, 0), (0, width - m.shape[1]))))
        r += m.shape[0]
        pad_r = (-r) % align
        if pad_r:
            parts.append(np.zeros((pad_r, width), np.float32))
            r += pad_r
    return np.concatenate(parts, axis=0).astype(np.float32), offs


# ----------------------------------------------------------------------------
# Full forward (single fused pallas_call)
# ----------------------------------------------------------------------------
def cnn_lstm_forward(x, params):
    # Mirror the torch permute branch, go channels-last, then flatten batch into
    # the sublane axis: a batch-major "strip" of shape (B*L, 1).
    if x.shape[1] != 1:
        x = jnp.transpose(x, (0, 2, 1))
    x_blc = jnp.transpose(x, (0, 2, 1)).astype(jnp.float32)         # (B, L, 1)
    B, L, cin0 = x_blc.shape
    x_strip = x_blc.reshape(B * L, cin0)

    # --- conv blocks: weights + folded BN -------------------------------------
    blocks = []
    for name in ("block1", "block2", "block3"):
        w, b, gamma, beta, mean, var = params[name]
        scale, shift = _bn_fold(gamma, beta, mean, var)
        blocks.append((_prep_conv_w(w), b.astype(jnp.float32), scale, shift,
                       int(w.shape[2]), int(w.shape[0])))            # (wmat,b,sc,sh,K,Cout)

    wih, whh, lb = _prep_lstm(*params["lstm"])
    wf1, bf1, wf2, bf2 = _prep_head(*params["head"])
    n_cls = int(wf2.shape[1])
    Hp = _HP

    # --- static geometry + host-precomputed pooling selection matrices --------
    seg, sels = [], []
    lin = L
    for idx, (wm, _cb, _sc, _sh, K, cout) in enumerate(blocks):
        cin = int(wm.shape[0]) // K
        sel, P = _pool_select_np(B, lin, K, time_major=(idx == len(blocks) - 1))
        seg.append((lin, K, cin, cout))
        sels.append(sel)
        lin = P
    T = lin                                                           # LSTM seq length

    sel_w = 128 * pl.cdiv(max(s.shape[1] for s in sels), 128)
    sel_pack_np, sel_offs = _pack_rows_np(sels, sel_w)
    sel_pack = jnp.asarray(sel_pack_np)

    # --- pack all tiny per-channel vectors into one (12, 512) array -----------
    def vec_row(v):
        v = v.reshape(-1)
        return jnp.pad(v, (0, _VEC_W - v.shape[0]))

    vec_list = []
    for (_wm, cb, sc, sh, _K, _c) in blocks:
        vec_list += [vec_row(cb), vec_row(sc), vec_row(sh)]
    vec_list += [vec_row(lb), vec_row(bf1), vec_row(bf2)]
    vecs = jnp.stack(vec_list, axis=0)                                # (12, 4*Hp)
    V_LB, V_BF1, V_BF2 = 3 * len(blocks), 3 * len(blocks) + 1, 3 * len(blocks) + 2

    w1m, w2m, w3m = blocks[0][0], blocks[1][0], blocks[2][0]

    # --- the fused kernel ------------------------------------------------------
    def kernel(x_ref, w1_ref, w2_ref, w3_ref, wih_ref, whh_ref,
               wf1_ref, wf2_ref, vec_ref, sel_ref, out_ref):
        f32 = jnp.float32

        def conv_bn_pool(a, blk, w_ref):
            """relu(conv1d) -> BN(eval) -> MaxPool1d(2), batch-vectorized on the strip."""
            Lin, K, Cin, Cout = seg[blk]
            Rw = B * Lin - K + 1                      # conv rows on the full strip
            # im2col: one lane-concat of K shifted slices + ONE MXU matmul.
            patches = jnp.concatenate([a[k:k + Rw, :] for k in range(K)], axis=-1)
            y = jnp.dot(patches, w_ref[...], preferred_element_type=f32)
            vr = 3 * blk
            cb = vec_ref[vr:vr + 1, 0:Cout]
            sc = vec_ref[vr + 1:vr + 2, 0:Cout]
            sh = vec_ref[vr + 2:vr + 3, 0:Cout]
            y = jnp.maximum(y + cb, 0.0) * sc + sh    # conv bias + ReLU + BN(eval)
            # MaxPool1d(2): pairwise max of adjacent rows + one 0/1 selection matmul
            # (also discards cross-batch rows; last block emits time-major order).
            m = jnp.maximum(y[0:Rw - 1, :], y[1:Rw, :])
            P = (Lin - K + 1) // 2
            off = sel_offs[blk]
            sel = sel_ref[off:off + B * P, 0:Rw - 1]
            return jnp.dot(sel, m, preferred_element_type=f32)

        a = x_ref[...]                                 # (B*L, 1) batch-major strip
        a = conv_bn_pool(a, 0, w1_ref)                 # (B*P1, 32)
        a = conv_bn_pool(a, 1, w2_ref)                 # (B*P2, 64)
        a = conv_bn_pool(a, 2, w3_ref)                 # (T*B, 32)  time-major

        # LSTM: input projection hoisted out of the recurrence (one matmul); h/c are
        # values (vregs); hidden padded 64 -> 128 so every gate slice is a full
        # 128-lane tile and padded lanes stay exactly zero.  Gate order: i, f, g, o.
        xproj = (jnp.dot(a, wih_ref[...], preferred_element_type=f32)
                 + vec_ref[V_LB:V_LB + 1, :])          # (T*B, 4*Hp)
        whh_v = whh_ref[...]
        h = jnp.zeros((B, Hp), f32)
        c = jnp.zeros((B, Hp), f32)
        for t in range(T):                             # T small & static -> unrolled
            g = (xproj[t * B:(t + 1) * B, :]
                 + jnp.dot(h, whh_v, preferred_element_type=f32))
            i_g = jax.nn.sigmoid(g[:, 0 * Hp:1 * Hp])
            f_g = jax.nn.sigmoid(g[:, 1 * Hp:2 * Hp])
            g_g = jnp.tanh(g[:, 2 * Hp:3 * Hp])
            o_g = jax.nn.sigmoid(g[:, 3 * Hp:4 * Hp])
            c = f_g * c + i_g * g_g
            h = o_g * jnp.tanh(c)

        # head: fc1 -> ReLU -> dropout(identity in eval) -> fc2 -> softmax
        # TODO(synk): Dropout(p=0.2) training-mode masking not implemented (eval semantics).
        z = jnp.maximum(jnp.dot(h, wf1_ref[...], preferred_element_type=f32)
                        + vec_ref[V_BF1:V_BF1 + 1, 0:wf1_ref.shape[1]], 0.0)
        logits = (jnp.dot(z, wf2_ref[...], preferred_element_type=f32)
                  + vec_ref[V_BF2:V_BF2 + 1, 0:n_cls])
        mx = jnp.max(logits, axis=1, keepdims=True)
        e = jnp.exp(logits - mx)
        out_ref[...] = e / jnp.sum(e, axis=1, keepdims=True)

    vmem = pl.BlockSpec(memory_space=pltpu.MemorySpace.VMEM)
    return pl.pallas_call(
        kernel,
        out_shape=jax.ShapeDtypeStruct((B, n_cls), jnp.float32),
        in_specs=[vmem] * 10,
        out_specs=vmem,
    )(x_strip, w1m, w2m, w3m, wih, whh, wf1, wf2, vecs, sel_pack)


# ----------------------------------------------------------------------------
# Pure-JAX reference (mirrors the PyTorch module exactly) for self-checking
# ----------------------------------------------------------------------------
def _reference_forward(x, params, eps=_EPS):
    hi = lax.Precision.HIGHEST
    if x.shape[1] != 1:
        x = jnp.transpose(x, (0, 2, 1))
    a = jnp.transpose(x, (0, 2, 1)).astype(jnp.float32)          # (B, L, Cin)

    def block(a, w, b, gamma, beta, mean, var):
        bsz, l, cin = a.shape
        cout, _, ksz = w.shape
        lout = l - ksz + 1
        pat = jnp.stack([a[:, k:k + lout, :] for k in range(ksz)], axis=2)
        pat = pat.reshape(bsz, lout, ksz * cin)
        wm = jnp.transpose(w, (2, 1, 0)).reshape(ksz * cin, cout)
        y = jnp.maximum(jnp.einsum("blk,kc->blc", pat, wm, precision=hi) + b, 0.0)
        scale = gamma / jnp.sqrt(var + eps)
        y = y * scale + (beta - mean * scale)
        p = lout // 2
        return jnp.maximum(y[:, 0:2 * p:2, :], y[:, 1:2 * p:2, :])

    for name in ("block1", "block2", "block3"):
        a = block(a, *params[name])

    w_ih, w_hh, b_ih, b_hh = params["lstm"]
    hd = w_hh.shape[1]
    bsz, tlen, _ = a.shape
    h = jnp.zeros((bsz, hd), jnp.float32)
    c = jnp.zeros((bsz, hd), jnp.float32)
    for t in range(tlen):
        g = (jnp.dot(a[:, t, :], w_ih.T, precision=hi)
             + jnp.dot(h, w_hh.T, precision=hi) + b_ih + b_hh)
        i_g = jax.nn.sigmoid(g[:, 0:hd])
        f_g = jax.nn.sigmoid(g[:, hd:2 * hd])
        g_g = jnp.tanh(g[:, 2 * hd:3 * hd])
        o_g = jax.nn.sigmoid(g[:, 3 * hd:4 * hd])
        c = f_g * c + i_g * g_g
        h = o_g * jnp.tanh(c)

    w1, b1, w2, b2 = params["head"]
    z = jnp.maximum(jnp.dot(h, w1.T, precision=hi) + b1, 0.0)
    logits = jnp.dot(z, w2.T, precision=hi) + b2
    return jax.nn.softmax(logits, axis=1)


# ----------------------------------------------------------------------------
# Deterministic PyTorch-shaped parameters
# ----------------------------------------------------------------------------
def init_params(key):
    ks = list(jax.random.split(key, 26))
    kit = iter(ks)

    def nrm(shape, s=0.1):
        return s * jax.random.normal(next(kit), shape, dtype=jnp.float32)

    def conv_bn(cout, cin, ksz):
        w = nrm((cout, cin, ksz))
        b = nrm((cout,))
        gamma = 1.0 + nrm((cout,))
        beta = nrm((cout,))
        mean = nrm((cout,))
        var = jnp.abs(1.0 + nrm((cout,))) + 0.5
        return (w, b, gamma, beta, mean, var)

    return {
        "block1": conv_bn(32, 1, 4),
        "block2": conv_bn(64, 32, 4),
        "block3": conv_bn(32, 64, 4),
        "lstm": (nrm((256, 32)), nrm((256, 64)), nrm((256,)), nrm((256,))),
        "head": (nrm((128, 64)), nrm((128,)), nrm((5, 128)), nrm((5,))),
    }


if __name__ == "__main__":
    key = jax.random.PRNGKey(0)
    kx, kp = jax.random.split(key)

    B, L = 2, 64
    x = jax.random.normal(kx, (B, 1, L), dtype=jnp.float32)
    params = init_params(kp)

    fwd = jax.jit(lambda xx: cnn_lstm_forward(xx, params))
    out = jax.block_until_ready(fwd(x))

    ref = _reference_forward(x, params)

    assert out.shape == (B, 5), out.shape
    assert bool(jnp.all(jnp.isfinite(out)))
    assert bool(jnp.allclose(jnp.sum(out, axis=1), 1.0, atol=1e-3))
    assert bool(jnp.allclose(out, ref, atol=1e-3, rtol=1e-3)), float(jnp.max(jnp.abs(out - ref)))
    print("KERNEL_OK")
</pallas_src>

<mosaic_0001>
module attributes {stable_mosaic.version = 11 : i64} {
  func.func @kernel(%arg0: memref<128x1xf32, #tpu.memory_space<vmem>>, %arg1: memref<4x32xf32, #tpu.memory_space<vmem>>, %arg2: memref<128x64xf32, #tpu.memory_space<vmem>>, %arg3: memref<256x32xf32, #tpu.memory_space<vmem>>, %arg4: memref<32x512xf32, #tpu.memory_space<vmem>>, %arg5: memref<128x512xf32, #tpu.memory_space<vmem>>, %arg6: memref<128x128xf32, #tpu.memory_space<vmem>>, %arg7: memref<128x5xf32, #tpu.memory_space<vmem>>, %arg8: memref<12x512xf32, #tpu.memory_space<vmem>>, %arg9: memref<112x128xf32, #tpu.memory_space<vmem>>, %arg10: memref<2x5xf32, #tpu.memory_space<vmem>>) attributes {dimension_semantics = [], scalar_prefetch = 0 : i64, scratch_operands = 0 : i64, tpu.core_type = #tpu.core_type<tc>} {
    %c0 = arith.constant 0 : index
    %c0_0 = arith.constant 0 : index
    %0 = vector.load %arg0[%c0, %c0_0] : memref<128x1xf32, #tpu.memory_space<vmem>>, vector<128x1xf32>
    %1 = vector.extract_strided_slice %0 {offsets = [0, 0], sizes = [125, 1], strides = [1, 1]} : vector<128x1xf32> to vector<125x1xf32>
    %2 = vector.extract_strided_slice %0 {offsets = [1, 0], sizes = [125, 1], strides = [1, 1]} : vector<128x1xf32> to vector<125x1xf32>
    %3 = vector.extract_strided_slice %0 {offsets = [2, 0], sizes = [125, 1], strides = [1, 1]} : vector<128x1xf32> to vector<125x1xf32>
    %4 = vector.extract_strided_slice %0 {offsets = [3, 0], sizes = [125, 1], strides = [1, 1]} : vector<128x1xf32> to vector<125x1xf32>
    %5 = tpu.concatenate %1, %2, %3, %4 in 1 : vector<125x1xf32>, vector<125x1xf32>, vector<125x1xf32>, vector<125x1xf32> -> vector<125x4xf32>
    %c0_1 = arith.constant 0 : index
    %c0_2 = arith.constant 0 : index
    %6 = vector.load %arg1[%c0_1, %c0_2] : memref<4x32xf32, #tpu.memory_space<vmem>>, vector<4x32xf32>
    %cst = arith.constant dense<0.000000e+00> : vector<125x32xf32>
    %7 = tpu.matmul %5, %6, %cst {dimension_numbers = #tpu.dot_dimension_numbers<[1], [0], [0], [1], [0, 0, 1, 1], [], []>} : vector<125x4xf32>, vector<4x32xf32>, vector<125x32xf32> -> vector<125x32xf32>
    %c0_3 = arith.constant 0 : index
    %c0_4 = arith.constant 0 : index
    %8 = vector.load %arg8[%c0_3, %c0_4] : memref<12x512xf32, #tpu.memory_space<vmem>>, vector<1x32xf32>
    %c1 = arith.constant 1 : index
    %c0_5 = arith.constant 0 : index
    %9 = vector.load %arg8[%c1, %c0_5] : memref<12x512xf32, #tpu.memory_space<vmem>>, vector<1x32xf32>
    %c2 = arith.constant 2 : index
    %c0_6 = arith.constant 0 : index
    %10 = vector.load %arg8[%c2, %c0_6] : memref<12x512xf32, #tpu.memory_space<vmem>>, vector<1x32xf32>
    %11 = vector.broadcast %8 : vector<1x32xf32> to vector<125x32xf32>
    %12 = arith.addf %7, %11 : vector<125x32xf32>
    %cst_7 = arith.constant 0.000000e+00 : f32
    %13 = vector.broadcast %cst_7 : f32 to vector<125x32xf32>
    %14 = arith.maximumf %12, %13 : vector<125x32xf32>
    %15 = vector.broadcast %9 : vector<1x32xf32> to vector<125x32xf32>
    %16 = arith.mulf %14, %15 : vector<125x32xf32>
    %17 = vector.broadcast %10 : vector<1x32xf32> to vector<125x32xf32>
    %18 = arith.addf %16, %17 : vector<125x32xf32>
    %19 = vector.extract_strided_slice %18 {offsets = [0, 0], sizes = [124, 32], strides = [1, 1]} : vector<125x32xf32> to vector<124x32xf32>
    %20 = vector.extract_strided_slice %18 {offsets = [1, 0], sizes = [124, 32], strides = [1, 1]} : vector<125x32xf32> to vector<124x32xf32>
    %21 = arith.maximumf %19, %20 : vector<124x32xf32>
    %c0_8 = arith.constant 0 : index
    %c0_9 = arith.constant 0 : index
    %22 = vector.load %arg9[%c0_8, %c0_9] : memref<112x128xf32, #tpu.memory_space<vmem>>, vector<60x124xf32>
    %cst_10 = arith.constant dense<0.000000e+00> : vector<60x32xf32>
    %23 = tpu.matmul %22, %21, %cst_10 {dimension_numbers = #tpu.dot_dimension_numbers<[1], [0], [0], [1], [0, 0, 1, 1], [], []>} : vector<60x124xf32>, vector<124x32xf32>, vector<60x32xf32> -> vector<60x32xf32>
    %24 = vector.extract_strided_slice %23 {offsets = [0, 0], sizes = [57, 32], strides = [1, 1]} : vector<60x32xf32> to vector<57x32xf32>
    %25 = vector.extract_strided_slice %23 {offsets = [1, 0], sizes = [57, 32], strides = [1, 1]} : vector<60x32xf32> to vector<57x32xf32>
    %26 = vector.extract_strided_slice %23 {offsets = [2, 0], sizes = [57, 32], strides = [1, 1]} : vector<60x32xf32> to vector<57x32xf32>
    %27 = vector.extract_strided_slice %23 {offsets = [3, 0], sizes = [57, 32], strides = [1, 1]} : vector<60x32xf32> to vector<57x32xf32>
    %28 = tpu.concatenate %24, %25, %26, %27 in 1 : vector<57x32xf32>, vector<57x32xf32>, vector<57x32xf32>, vector<57x32xf32> -> vector<57x128xf32>
    %c0_11 = arith.constant 0 : index
    %c0_12 = arith.constant 0 : index
    %29 = vector.load %arg2[%c0_11, %c0_12] : memref<128x64xf32, #tpu.memory_space<vmem>>, vector<128x64xf32>
    %cst_13 = arith.constant dense<0.000000e+00> : vector<57x64xf32>
    %30 = tpu.matmul %28, %29, %cst_13 {dimension_numbers = #tpu.dot_dimension_numbers<[1], [0], [0], [1], [0, 0, 1, 1], [], []>} : vector<57x128xf32>, vector<128x64xf32>, vector<57x64xf32> -> vector<57x64xf32>
    %c3 = arith.constant 3 : index
    %c0_14 = arith.constant 0 : index
    %31 = vector.load %arg8[%c3, %c0_14] : memref<12x512xf32, #tpu.memory_space<vmem>>, vector<1x64xf32>
    %c4 = arith.constant 4 : index
    %c0_15 = arith.constant 0 : index
    %32 = vector.load %arg8[%c4, %c0_15] : memref<12x512xf32, #tpu.memory_space<vmem>>, vector<1x64xf32>
    %c5 = arith.constant 5 : index
    %c0_16 = arith.constant 0 : index
    %33 = vector.load %arg8[%c5, %c0_16] : memref<12x512xf32, #tpu.memory_space<vmem>>, vector<1x64xf32>
    %34 = vector.broadcast %31 : vector<1x64xf32> to vector<57x64xf32>
    %35 = arith.addf %30, %34 : vector<57x64xf32>
    %cst_17 = arith.constant 0.000000e+00 : f32
    %36 = vector.broadcast %cst_17 : f32 to vector<57x64xf32>
    %37 = arith.maximumf %35, %36 : vector<57x64xf32>
    %38 = vector.broadcast %32 : vector<1x64xf32> to vector<57x64xf32>
    %39 = arith.mulf %37, %38 : vector<57x64xf32>
    %40 = vector.broadcast %33 : vector<1x64xf32> to vector<57x64xf32>
    %41 = arith.addf %39, %40 : vector<57x64xf32>
    %42 = vector.extract_strided_slice %41 {offsets = [0, 0], sizes = [56, 64], strides = [1, 1]} : vector<57x64xf32> to vector<56x64xf32>
    %43 = vector.extract_strided_slice %41 {offsets = [1, 0], sizes = [56, 64], strides = [1, 1]} : vector<57x64xf32> to vector<56x64xf32>
    %44 = arith.maximumf %42, %43 : vector<56x64xf32>
    %c64 = arith.constant 64 : index
    %c0_18 = arith.constant 0 : index
    %45 = vector.load %arg9[%c64, %c0_18] : memref<112x128xf32, #tpu.memory_space<vmem>>, vector<26x56xf32>
    %cst_19 = arith.constant dense<0.000000e+00> : vector<26x64xf32>
    %46 = tpu.matmul %45, %44, %cst_19 {dimension_numbers = #tpu.dot_dimension_numbers<[1], [0], [0], [1], [0, 0, 1, 1], [], []>} : vector<26x56xf32>, vector<56x64xf32>, vector<26x64xf32> -> vector<26x64xf32>
    %47 = vector.extract_strided_slice %46 {offsets = [0, 0], sizes = [23, 64], strides = [1, 1]} : vector<26x64xf32> to vector<23x64xf32>
    %48 = vector.extract_strided_slice %46 {offsets = [1, 0], sizes = [23, 64], strides = [1, 1]} : vector<26x64xf32> to vector<23x64xf32>
    %49 = vector.extract_strided_slice %46 {offsets = [2, 0], sizes = [23, 64], strides = [1, 1]} : vector<26x64xf32> to vector<23x64xf32>
    %50 = vector.extract_strided_slice %46 {offsets = [3, 0], sizes = [23, 64], strides = [1, 1]} : vector<26x64xf32> to vector<23x64xf32>
    %51 = tpu.concatenate %47, %48, %49, %50 in 1 : vector<23x64xf32>, vector<23x64xf32>, vector<23x64xf32>, vector<23x64xf32> -> vector<23x256xf32>
    %c0_20 = arith.constant 0 : index
    %c0_21 = arith.constant 0 : index
    %52 = vector.load %arg3[%c0_20, %c0_21] : memref<256x32xf32, #tpu.memory_space<vmem>>, vector<256x32xf32>
    %cst_22 = arith.constant dense<0.000000e+00> : vector<23x32xf32>
    %53 = tpu.matmul %51, %52, %cst_22 {dimension_numbers = #tpu.dot_dimension_numbers<[1], [0], [0], [1], [0, 0, 1, 1], [], []>} : vector<23x256xf32>, vector<256x32xf32>, vector<23x32xf32> -> vector<23x32xf32>
    %c6 = arith.constant 6 : index
    %c0_23 = arith.constant 0 : index
    %54 = vector.load %arg8[%c6, %c0_23] : memref<12x512xf32, #tpu.memory_space<vmem>>, vector<1x32xf32>
    %c7 = arith.constant 7 : index
    %c0_24 = arith.constant 0 : index
    %55 = vector.load %arg8[%c7, %c0_24] : memref<12x512xf32, #tpu.memory_space<vmem>>, vector<1x32xf32>
    %c8 = arith.constant 8 : index
    %c0_25 = arith.constant 0 : index
    %56 = vector.load %arg8[%c8, %c0_25] : memref<12x512xf32, #tpu.memory_space<vmem>>, vector<1x32xf32>
    %57 = vector.broadcast %54 : vector<1x32xf32> to vector<23x32xf32>
    %58 = arith.addf %53, %57 : vector<23x32xf32>
    %cst_26 = arith.constant 0.000000e+00 : f32
    %59 = vector.broadcast %cst_26 : f32 to vector<23x32xf32>
    %60 = arith.maximumf %58, %59 : vector<23x32xf32>
    %61 = vector.broadcast %55 : vector<1x32xf32> to vector<23x32xf32>
    %62 = arith.mulf %60, %61 : vector<23x32xf32>
    %63 = vector.broadcast %56 : vector<1x32xf32> to vector<23x32xf32>
    %64 = arith.addf %62, %63 : vector<23x32xf32>
    %65 = vector.extract_strided_slice %64 {offsets = [0, 0], sizes = [22, 32], strides = [1, 1]} : vector<23x32xf32> to vector<22x32xf32>
    %66 = vector.extract_strided_slice %64 {offsets = [1, 0], sizes = [22, 32], strides = [1, 1]} : vector<23x32xf32> to vector<22x32xf32>
    %67 = arith.maximumf %65, %66 : vector<22x32xf32>
    %c96 = arith.constant 96 : index
    %c0_27 = arith.constant 0 : index
    %68 = vector.load %arg9[%c96, %c0_27] : memref<112x128xf32, #tpu.memory_space<vmem>>, vector<10x22xf32>
    %cst_28 = arith.constant dense<0.000000e+00> : vector<10x32xf32>
    %69 = tpu.matmul %68, %67, %cst_28 {dimension_numbers = #tpu.dot_dimension_numbers<[1], [0], [0], [1], [0, 0, 1, 1], [], []>} : vector<10x22xf32>, vector<22x32xf32>, vector<10x32xf32> -> vector<10x32xf32>
    %c0_29 = arith.constant 0 : index
    %c0_30 = arith.constant 0 : index
    %70 = vector.load %arg4[%c0_29, %c0_30] : memref<32x512xf32, #tpu.memory_space<vmem>>, vector<32x512xf32>
    %cst_31 = arith.constant dense<0.000000e+00> : vector<10x512xf32>
    %71 = tpu.matmul %69, %70, %cst_31 {dimension_numbers = #tpu.dot_dimension_numbers<[1], [0], [0], [1], [0, 0, 1, 1], [], []>} : vector<10x32xf32>, vector<32x512xf32>, vector<10x512xf32> -> vector<10x512xf32>
    %c9 = arith.constant 9 : index
    %c0_32 = arith.constant 0 : index
    %72 = vector.load %arg8[%c9, %c0_32] : memref<12x512xf32, #tpu.memory_space<vmem>>, vector<1x512xf32>
    %73 = vector.broadcast %72 : vector<1x512xf32> to vector<10x512xf32>
    %74 = arith.addf %71, %73 : vector<10x512xf32>
    %c0_33 = arith.constant 0 : index
    %c0_34 = arith.constant 0 : index
    %75 = vector.load %arg5[%c0_33, %c0_34] : memref<128x512xf32, #tpu.memory_space<vmem>>, vector<128x512xf32>
    %cst_35 = arith.constant 0.000000e+00 : f32
    %76 = vector.broadcast %cst_35 : f32 to vector<2x128xf32>
    %cst_36 = arith.constant 0.000000e+00 : f32
    %77 = vector.broadcast %cst_36 : f32 to vector<2x128xf32>
    %78 = vector.extract_strided_slice %74 {offsets = [0, 0], sizes = [2, 512], strides = [1, 1]} : vector<10x512xf32> to vector<2x512xf32>
    %cst_37 = arith.constant dense<0.000000e+00> : vector<2x512xf32>
    %79 = tpu.matmul %76, %75, %cst_37 {dimension_numbers = #tpu.dot_dimension_numbers<[1], [0], [0], [1], [0, 0, 1, 1], [], []>} : vector<2x128xf32>, vector<128x512xf32>, vector<2x512xf32> -> vector<2x512xf32>
    %80 = arith.addf %78, %79 : vector<2x512xf32>
    %81 = vector.extract_strided_slice %80 {offsets = [0, 0], sizes = [2, 128], strides = [1, 1]} : vector<2x512xf32> to vector<2x128xf32>
    %82 = arith.negf %81 : vector<2x128xf32>
    %83 = math.exp %82 : vector<2x128xf32>
    %cst_38 = arith.constant 1.000000e+00 : f32
    %84 = vector.broadcast %cst_38 : f32 to vector<2x128xf32>
    %85 = arith.addf %84, %83 : vector<2x128xf32>
    %86 = arith.divf %84, %85 : vector<2x128xf32>
    %87 = vector.extract_strided_slice %80 {offsets = [0, 128], sizes = [2, 128], strides = [1, 1]} : vector<2x512xf32> to vector<2x128xf32>
    %88 = arith.negf %87 : vector<2x128xf32>
    %89 = math.exp %88 : vector<2x128xf32>
    %cst_39 = arith.constant 1.000000e+00 : f32
    %90 = vector.broadcast %cst_39 : f32 to vector<2x128xf32>
    %91 = arith.addf %90, %89 : vector<2x128xf32>
    %92 = arith.divf %90, %91 : vector<2x128xf32>
    %93 = vector.extract_strided_slice %80 {offsets = [0, 256], sizes = [2, 128], strides = [1, 1]} : vector<2x512xf32> to vector<2x128xf32>
    %94 = math.tanh %93 : vector<2x128xf32>
    %95 = vector.extract_strided_slice %80 {offsets = [0, 384], sizes = [2, 128], strides = [1, 1]} : vector<2x512xf32> to vector<2x128xf32>
    %96 = arith.negf %95 : vector<2x128xf32>
    %97 = math.exp %96 : vector<2x128xf32>
    %cst_40 = arith.constant 1.000000e+00 : f32
    %98 = vector.broadcast %cst_40 : f32 to vector<2x128xf32>
    %99 = arith.addf %98, %97 : vector<2x128xf32>
    %100 = arith.divf %98, %99 : vector<2x128xf32>
    %101 = arith.mulf %92, %77 : vector<2x128xf32>
    %102 = arith.mulf %86, %94 : vector<2x128xf32>
    %103 = arith.addf %101, %102 : vector<2x128xf32>
    %104 = math.tanh %103 : vector<2x128xf32>
    %105 = arith.mulf %100, %104 : vector<2x128xf32>
    %106 = vector.extract_strided_slice %74 {offsets = [2, 0], sizes = [2, 512], strides = [1, 1]} : vector<10x512xf32> to vector<2x512xf32>
    %cst_41 = arith.constant dense<0.000000e+00> : vector<2x512xf32>
    %107 = tpu.matmul %105, %75, %cst_41 {dimension_numbers = #tpu.dot_dimension_numbers<[1], [0], [0], [1], [0, 0, 1, 1], [], []>} : vector<2x128xf32>, vector<128x512xf32>, vector<2x512xf32> -> vector<2x512xf32>
    %108 = arith.addf %106, %107 : vector<2x512xf32>
    %109 = vector.extract_strided_slice %108 {offsets = [0, 0], sizes = [2, 128], strides = [1, 1]} : vector<2x512xf32> to vector<2x128xf32>
    %110 = arith.negf %109 : vector<2x128xf32>
    %111 = math.exp %110 : vector<2x128xf32>
    %cst_42 = arith.constant 1.000000e+00 : f32
    %112 = vector.broadcast %cst_42 : f32 to vector<2x128xf32>
    %113 = arith.addf %112, %111 : vector<2x128xf32>
    %114 = arith.divf %112, %113 : vector<2x128xf32>
    %115 = vector.extract_strided_slice %108 {offsets = [0, 128], sizes = [2, 128], strides = [1, 1]} : vector<2x512xf32> to vector<2x128xf32>
    %116 = arith.negf %115 : vector<2x128xf32>
    %117 = math.exp %116 : vector<2x128xf32>
    %cst_43 = arith.constant 1.000000e+00 : f32
    %118 = vector.broadcast %cst_43 : f32 to vector<2x128xf32>
    %119 = arith.addf %118, %117 : vector<2x128xf32>
    %120 = arith.divf %118, %119 : vector<2x128xf32>
    %121 = vector.extract_strided_slice %108 {offsets = [0, 256], sizes = [2, 128], strides = [1, 1]} : vector<2x512xf32> to vector<2x128xf32>
    %122 = math.tanh %121 : vector<2x128xf32>
    %123 = vector.extract_strided_slice %108 {offsets = [0, 384], sizes = [2, 128], strides = [1, 1]} : vector<2x512xf32> to vector<2x128xf32>
    %124 = arith.negf %123 : vector<2x128xf32>
    %125 = math.exp %124 : vector<2x128xf32>
    %cst_44 = arith.constant 1.000000e+00 : f32
    %126 = vector.broadcast %cst_44 : f32 to vector<2x128xf32>
    %127 = arith.addf %126, %125 : vector<2x128xf32>
    %128 = arith.divf %126, %127 : vector<2x128xf32>
    %129 = arith.mulf %120, %103 : vector<2x128xf32>
    %130 = arith.mulf %114, %122 : vector<2x128xf32>
    %131 = arith.addf %129, %130 : vector<2x128xf32>
    %132 = math.tanh %131 : vector<2x128xf32>
    %133 = arith.mulf %128, %132 : vector<2x128xf32>
    %134 = vector.extract_strided_slice %74 {offsets = [4, 0], sizes = [2, 512], strides = [1, 1]} : vector<10x512xf32> to vector<2x512xf32>
    %cst_45 = arith.constant dense<0.000000e+00> : vector<2x512xf32>
    %135 = tpu.matmul %133, %75, %cst_45 {dimension_numbers = #tpu.dot_dimension_numbers<[1], [0], [0], [1], [0, 0, 1, 1], [], []>} : vector<2x128xf32>, vector<128x512xf32>, vector<2x512xf32> -> vector<2x512xf32>
    %136 = arith.addf %134, %135 : vector<2x512xf32>
    %137 = vector.extract_strided_slice %136 {offsets = [0, 0], sizes = [2, 128], strides = [1, 1]} : vector<2x512xf32> to vector<2x128xf32>
    %138 = arith.negf %137 : vector<2x128xf32>
    %139 = math.exp %138 : vector<2x128xf32>
    %cst_46 = arith.constant 1.000000e+00 : f32
    %140 = vector.broadcast %cst_46 : f32 to vector<2x128xf32>
    %141 = arith.addf %140, %139 : vector<2x128xf32>
    %142 = arith.divf %140, %141 : vector<2x128xf32>
    %143 = vector.extract_strided_slice %136 {offsets = [0, 128], sizes = [2, 128], strides = [1, 1]} : vector<2x512xf32> to vector<2x128xf32>
    %144 = arith.negf %143 : vector<2x128xf32>
    %145 = math.exp %144 : vector<2x128xf32>
    %cst_47 = arith.constant 1.000000e+00 : f32
    %146 = vector.broadcast %cst_47 : f32 to vector<2x128xf32>
    %147 = arith.addf %146, %145 : vector<2x128xf32>
    %148 = arith.divf %146, %147 : vector<2x128xf32>
    %149 = vector.extract_strided_slice %136 {offsets = [0, 256], sizes = [2, 128], strides = [1, 1]} : vector<2x512xf32> to vector<2x128xf32>
    %150 = math.tanh %149 : vector<2x128xf32>
    %151 = vector.extract_strided_slice %136 {offsets = [0, 384], sizes = [2, 128], strides = [1, 1]} : vector<2x512xf32> to vector<2x128xf32>
    %152 = arith.negf %151 : vector<2x128xf32>
    %153 = math.exp %152 : vector<2x128xf32>
    %cst_48 = arith.constant 1.000000e+00 : f32
    %154 = vector.broadcast %cst_48 : f32 to vector<2x128xf32>
    %155 = arith.addf %154, %153 : vector<2x128xf32>
    %156 = arith.divf %154, %155 : vector<2x128xf32>
    %157 = arith.mulf %148, %131 : vector<2x128xf32>
    %158 = arith.mulf %142, %150 : vector<2x128xf32>
    %159 = arith.addf %157, %158 : vector<2x128xf32>
    %160 = math.tanh %159 : vector<2x128xf32>
    %161 = arith.mulf %156, %160 : vector<2x128xf32>
    %162 = vector.extract_strided_slice %74 {offsets = [6, 0], sizes = [2, 512], strides = [1, 1]} : vector<10x512xf32> to vector<2x512xf32>
    %cst_49 = arith.constant dense<0.000000e+00> : vector<2x512xf32>
    %163 = tpu.matmul %161, %75, %cst_49 {dimension_numbers = #tpu.dot_dimension_numbers<[1], [0], [0], [1], [0, 0, 1, 1], [], []>} : vector<2x128xf32>, vector<128x512xf32>, vector<2x512xf32> -> vector<2x512xf32>
    %164 = arith.addf %162, %163 : vector<2x512xf32>
    %165 = vector.extract_strided_slice %164 {offsets = [0, 0], sizes = [2, 128], strides = [1, 1]} : vector<2x512xf32> to vector<2x128xf32>
    %166 = arith.negf %165 : vector<2x128xf32>
    %167 = math.exp %166 : vector<2x128xf32>
    %cst_50 = arith.constant 1.000000e+00 : f32
    %168 = vector.broadcast %cst_50 : f32 to vector<2x128xf32>
    %169 = arith.addf %168, %167 : vector<2x128xf32>
    %170 = arith.divf %168, %169 : vector<2x128xf32>
    %171 = vector.extract_strided_slice %164 {offsets = [0, 128], sizes = [2, 128], strides = [1, 1]} : vector<2x512xf32> to vector<2x128xf32>
    %172 = arith.negf %171 : vector<2x128xf32>
    %173 = math.exp %172 : vector<2x128xf32>
    %cst_51 = arith.constant 1.000000e+00 : f32
    %174 = vector.broadcast %cst_51 : f32 to vector<2x128xf32>
    %175 = arith.addf %174, %173 : vector<2x128xf32>
    %176 = arith.divf %174, %175 : vector<2x128xf32>
    %177 = vector.extract_strided_slice %164 {offsets = [0, 256], sizes = [2, 128], strides = [1, 1]} : vector<2x512xf32> to vector<2x128xf32>
    %178 = math.tanh %177 : vector<2x128xf32>
    %179 = vector.extract_strided_slice %164 {offsets = [0, 384], sizes = [2, 128], strides = [1, 1]} : vector<2x512xf32> to vector<2x128xf32>
    %180 = arith.negf %179 : vector<2x128xf32>
    %181 = math.exp %180 : vector<2x128xf32>
    %cst_52 = arith.constant 1.000000e+00 : f32
    %182 = vector.broadcast %cst_52 : f32 to vector<2x128xf32>
    %183 = arith.addf %182, %181 : vector<2x128xf32>
    %184 = arith.divf %182, %183 : vector<2x128xf32>
    %185 = arith.mulf %176, %159 : vector<2x128xf32>
    %186 = arith.mulf %170, %178 : vector<2x128xf32>
    %187 = arith.addf %185, %186 : vector<2x128xf32>
    %188 = math.tanh %187 : vector<2x128xf32>
    %189 = arith.mulf %184, %188 : vector<2x128xf32>
    %190 = vector.extract_strided_slice %74 {offsets = [8, 0], sizes = [2, 512], strides = [1, 1]} : vector<10x512xf32> to vector<2x512xf32>
    %cst_53 = arith.constant dense<0.000000e+00> : vector<2x512xf32>
    %191 = tpu.matmul %189, %75, %cst_53 {dimension_numbers = #tpu.dot_dimension_numbers<[1], [0], [0], [1], [0, 0, 1, 1], [], []>} : vector<2x128xf32>, vector<128x512xf32>, vector<2x512xf32> -> vector<2x512xf32>
    %192 = arith.addf %190, %191 : vector<2x512xf32>
    %193 = vector.extract_strided_slice %192 {offsets = [0, 0], sizes = [2, 128], strides = [1, 1]} : vector<2x512xf32> to vector<2x128xf32>
    %194 = arith.negf %193 : vector<2x128xf32>
    %195 = math.exp %194 : vector<2x128xf32>
    %cst_54 = arith.constant 1.000000e+00 : f32
    %196 = vector.broadcast %cst_54 : f32 to vector<2x128xf32>
    %197 = arith.addf %196, %195 : vector<2x128xf32>
    %198 = arith.divf %196, %197 : vector<2x128xf32>
    %199 = vector.extract_strided_slice %192 {offsets = [0, 128], sizes = [2, 128], strides = [1, 1]} : vector<2x512xf32> to vector<2x128xf32>
    %200 = arith.negf %199 : vector<2x128xf32>
    %201 = math.exp %200 : vector<2x128xf32>
    %cst_55 = arith.constant 1.000000e+00 : f32
    %202 = vector.broadcast %cst_55 : f32 to vector<2x128xf32>
    %203 = arith.addf %202, %201 : vector<2x128xf32>
    %204 = arith.divf %202, %203 : vector<2x128xf32>
    %205 = vector.extract_strided_slice %192 {offsets = [0, 256], sizes = [2, 128], strides = [1, 1]} : vector<2x512xf32> to vector<2x128xf32>
    %206 = math.tanh %205 : vector<2x128xf32>
    %207 = vector.extract_strided_slice %192 {offsets = [0, 384], sizes = [2, 128], strides = [1, 1]} : vector<2x512xf32> to vector<2x128xf32>
    %208 = arith.negf %207 : vector<2x128xf32>
    %209 = math.exp %208 : vector<2x128xf32>
    %cst_56 = arith.constant 1.000000e+00 : f32
    %210 = vector.broadcast %cst_56 : f32 to vector<2x128xf32>
    %211 = arith.addf %210, %209 : vector<2x128xf32>
    %212 = arith.divf %210, %211 : vector<2x128xf32>
    %213 = arith.mulf %204, %187 : vector<2x128xf32>
    %214 = arith.mulf %198, %206 : vector<2x128xf32>
    %215 = arith.addf %213, %214 : vector<2x128xf32>
    %216 = math.tanh %215 : vector<2x128xf32>
    %217 = arith.mulf %212, %216 : vector<2x128xf32>
    %c0_57 = arith.constant 0 : index
    %c0_58 = arith.constant 0 : index
    %218 = vector.load %arg6[%c0_57, %c0_58] : memref<128x128xf32, #tpu.memory_space<vmem>>, vector<128x128xf32>
    %cst_59 = arith.constant dense<0.000000e+00> : vector<2x128xf32>
    %219 = tpu.matmul %217, %218, %cst_59 {dimension_numbers = #tpu.dot_dimension_numbers<[1], [0], [0], [1], [0, 0, 1, 1], [], []>} : vector<2x128xf32>, vector<128x128xf32>, vector<2x128xf32> -> vector<2x128xf32>
    %c10 = arith.constant 10 : index
    %c0_60 = arith.constant 0 : index
    %220 = vector.load %arg8[%c10, %c0_60] : memref<12x512xf32, #tpu.memory_space<vmem>>, vector<1x128xf32>
    %221 = vector.broadcast %220 : vector<1x128xf32> to vector<2x128xf32>
    %222 = arith.addf %219, %221 : vector<2x128xf32>
    %cst_61 = arith.constant 0.000000e+00 : f32
    %223 = vector.broadcast %cst_61 : f32 to vector<2x128xf32>
    %224 = arith.maximumf %222, %223 : vector<2x128xf32>
    %c0_62 = arith.constant 0 : index
    %c0_63 = arith.constant 0 : index
    %225 = vector.load %arg7[%c0_62, %c0_63] : memref<128x5xf32, #tpu.memory_space<vmem>>, vector<128x5xf32>
    %cst_64 = arith.constant dense<0.000000e+00> : vector<2x5xf32>
    %226 = tpu.matmul %224, %225, %cst_64 {dimension_numbers = #tpu.dot_dimension_numbers<[1], [0], [0], [1], [0, 0, 1, 1], [], []>} : vector<2x128xf32>, vector<128x5xf32>, vector<2x5xf32> -> vector<2x5xf32>
    %c11 = arith.constant 11 : index
    %c0_65 = arith.constant 0 : index
    %227 = vector.load %arg8[%c11, %c0_65] : memref<12x512xf32, #tpu.memory_space<vmem>>, vector<1x5xf32>
    %228 = vector.broadcast %227 : vector<1x5xf32> to vector<2x5xf32>
    %229 = arith.addf %226, %228 : vector<2x5xf32>
    %cst_66 = arith.constant dense<0xFF800000> : vector<2xf32>
    %230 = vector.multi_reduction <maximumf>, %229, %cst_66 [1] : vector<2x5xf32> to vector<2xf32>
    %231 = vector.shape_cast %230 : vector<2xf32> to vector<2x1xf32>
    %232 = vector.broadcast %231 : vector<2x1xf32> to vector<2x5xf32>
    %233 = arith.subf %229, %232 : vector<2x5xf32>
    %234 = math.exp %233 : vector<2x5xf32>
    %cst_67 = arith.constant dense<0.000000e+00> : vector<2xf32>
    %235 = vector.multi_reduction <add>, %234, %cst_67 [1] : vector<2x5xf32> to vector<2xf32>
    %236 = vector.shape_cast %235 : vector<2xf32> to vector<2x1xf32>
    %237 = vector.broadcast %236 : vector<2x1xf32> to vector<2x5xf32>
    %238 = arith.divf %234, %237 : vector<2x5xf32>
    %c0_68 = arith.constant 0 : index
    %c0_69 = arith.constant 0 : index
    %239 = vector.load %arg10[%c0_68, %c0_69] : memref<2x5xf32, #tpu.memory_space<vmem>>, vector<2x5xf32>
    tpu.vector_store %arg10[%c0_68, %c0_69], %238 {strides = array<i32>} : memref<2x5xf32, #tpu.memory_space<vmem>>, vector<2x5xf32>,
    return
  }
}

</mosaic_0001>

<bundles_post_ra>
// kernel: _lambda_.1
= control target key start
LH: loop header
LB: loop body
LE: loop exit
PB: predicated region body
PF: predicated region fallthrough
CT: control target
= control target key end

     0   :  { %15 = vsyncpa [#allocation3], 0  ;;  %s5386_s0 = inlined_call_operand.vmem [shape: f32[128,1], index: 0, kind: input, shape index: {}]   ;;  %s5387_s1 = inlined_call_operand.vmem [shape: f32[4,32], index: 1, kind: input, shape index: {}]   ;;  %s5388_s2 = inlined_call_operand.hbm [shape: f32[128,64], index: 2, kind: input, shape index: {}]   ;;  %s5389_s3 = inlined_call_operand.hbm [shape: f32[256,32], index: 3, kind: input, shape index: {}]   ;;  %s5390_s4 = inlined_call_operand.hbm [shape: f32[32,512], index: 4, kind: input, shape index: {}]   ;;  %s5391_s5 = inlined_call_operand.hbm [shape: f32[128,512], index: 5, kind: input, shape index: {}]   ;;  %s5392_s6 = inlined_call_operand.vmem [shape: f32[128,128], index: 6, kind: input, shape index: {}]   ;;  %s5393_s7 = inlined_call_operand.hbm [shape: f32[128,5], index: 7, kind: input, shape index: {}]   ;;  %s5394_s8 = inlined_call_operand.hbm [shape: f32[12,512], index: 8, kind: input, shape index: {}]   ;;  %s5395_s9 = inlined_call_operand.hbm [shape: f32[112,128], index: 9, kind: input, shape index: {}]   ;;  %s5396_s10 = inlined_call_operand.hbm [shape: f32[2,5], index: 10, kind: output, shape index: {}]  }
   0x1   :  { %16 = vsyncpa [#allocation6], 0 }
   0x2   :  { %17 = vsyncpa [#allocation9], 0 }
   0x3   :  { %18 = vsyncpa [#allocation12], 0 }
   0x4   :  { %19 = vsyncpa [#allocation4], 0  ;;  %s4307_s13 = smov [#allocation5]   ;;  %s4121_s17 = scalar_lea.hbm %s5389_s3, 4096 }
   0x5   :  { %s41_s14 = sshll.u32 %s4307_s13, 4  ;;  %p4122_p0 = scmp.ne.s32.totalorder %s5389_s3, %s4121_s17  ;;  %s42_s14 = int_to_ptr.vmem [resolvable:$true] %s41_s14 }
   0x6   :  { %p4125_p1 = scmp.lt.u32.totalorder %s4121_s17, %s5389_s3 }
   0x8   :  { %p4127_p2 = pnand %p4125_p1, %p4122_p0 }
   0xa   :  { %4130 = shalt.err (!%p4127_p2)
}
   0xb   :  { %s4131_s22 = scalar_lea.vmem %s42_s14, 4096  ;;  %p4136_p4 = scmp.lt.s32.totalorder %s42_s14, %s42_s14 }
   0xc   :  { %p4132_p3 = scmp.ne.s32.totalorder %s42_s14, %s4131_s22  ;;  %p4137_p5 = scmp.lt.s32.totalorder %s4131_s22, %s4131_s22 }
   0xe   :  { %p4138_p6 = por %p4137_p5, %p4136_p4 }
  0x10   :  { %p4139_p7 = pnand %p4138_p6, %p4132_p3 }
  0x12   :  { %4142 = shalt.err (!%p4139_p7)
}
  0x13   :  { %s4308_s23 = smov 128   ;;  %s4309_s24 = smov 8  }
  0x14   :  { %47 = dma.hbm_to_vmem [thread:$0]  %s5389_s3, 4096, %s42_s14, [#allocation6], %s4308_s23, %s4308_s23, %s4309_s24  }
  0x15   :  { %s4310_s27 = smov [#allocation8]   ;;  %s4311_s29 = smov [#allocation11]  }
  0x16   :  { %s65_s28 = sshll.u32 %s4310_s27, 4  ;;  %s91_s30 = sshll.u32 %s4311_s29, 4  ;;  %s66_s28 = int_to_ptr.vmem [resolvable:$true] %s65_s28  ;;  %s92_s30 = int_to_ptr.vmem [resolvable:$true] %s91_s30 }
  0x17   :  { %s4143_s13 = scalar_lea.hbm %s5391_s5, 8192 }
  0x18   :  { %p4144_p8 = scmp.ne.s32.totalorder %s5391_s5, %s4143_s13  ;;  %p4147_p9 = scmp.lt.u32.totalorder %s4143_s13, %s5391_s5 }
  0x1a   :  { %p4149_p10 = pnand %p4147_p9, %p4144_p8 }
  0x1c   :  { %4152 = shalt.err (!%p4149_p10)
}
  0x1d   :  { %s4153_s3 = scalar_lea.vmem %s66_s28, 8192  ;;  %p4158_p12 = scmp.lt.s32.totalorder %s66_s28, %s66_s28 }
  0x1e   :  { %p4154_p11 = scmp.ne.s32.totalorder %s66_s28, %s4153_s3  ;;  %p4159_p13 = scmp.lt.s32.totalorder %s4153_s3, %s4153_s3 }
  0x20   :  { %p4160_p0 = por %p4159_p13, %p4158_p12 }
  0x22   :  { %p4161_p1 = pnand %p4160_p0, %p4154_p11 }
  0x24   :  { %4164 = shalt.err (!%p4161_p1)
}
  0x25   :  { %s4312_s14 = smov 512   ;;  %s4313_s19 = smov 32  }
  0x26   :  { %71 = dma.hbm_to_vmem [thread:$0]  %s5391_s5, 8192, %s66_s28, [#allocation9], %s4312_s14, %s4312_s14, %s4313_s19  }
  0x27   :  { %s4165_s26 = scalar_lea.hbm %s5394_s8, 1024 }
  0x28   :  { %p4166_p2 = scmp.ne.s32.totalorder %s5394_s8, %s4165_s26  ;;  %p4169_p3 = scmp.lt.u32.totalorder %s4165_s26, %s5394_s8 }
  0x2a   :  { %p4171_p4 = pnand %p4169_p3, %p4166_p2 }
  0x2c   :  { %4174 = shalt.err (!%p4171_p4)
}
  0x2d   :  { %s4175_s13 = scalar_lea.vmem %s92_s30, 1024  ;;  %p4180_p6 = scmp.lt.s32.totalorder %s92_s30, %s92_s30 }
  0x2e   :  { %p4176_p5 = scmp.ne.s32.totalorder %s92_s30, %s4175_s13  ;;  %p4181_p7 = scmp.lt.s32.totalorder %s4175_s13, %s4175_s13 }
  0x30   :  { %p4182_p8 = por %p4181_p7, %p4180_p6 }
  0x32   :  { %p4183_p9 = pnand %p4182_p8, %p4176_p5 }
  0x34   :  { %4186 = shalt.err (!%p4183_p9)
}
  0x35   :  { %97 = dma.hbm_to_vmem [thread:$0]  %s5394_s8, 1024, %s92_s30, [#allocation12], %s4312_s14, %s4312_s14, %s4313_s19  }
  0x36   :  { %s4314_s15 = smov [#allocation2]   ;;  %s4315_s17 = smov [#allocation7]  }
  0x37   :  { %s29_s16 = sshll.u32 %s4314_s15, 4  ;;  %s53_s18 = sshll.u32 %s4315_s17, 4  ;;  %s30_s16 = int_to_ptr.vmem [resolvable:$true] %s29_s16  ;;  %s54_s18 = int_to_ptr.vmem [resolvable:$true] %s53_s18 }
  0x38   :  { %s4187_s21 = scalar_lea.hbm %s5388_s2, 2048 }
  0x39   :  { %p4188_p10 = scmp.ne.s32.totalorder %s5388_s2, %s4187_s21  ;;  %p4191_p11 = scmp.lt.u32.totalorder %s4187_s21, %s5388_s2 }
  0x3b   :  { %p4193_p12 = pnand %p4191_p11, %p4188_p10 }
  0x3d   :  { %4196 = shalt.err (!%p4193_p12)
}
  0x3e   :  { %s4197_s8 = scalar_lea.vmem %s30_s16, 2048  ;;  %p4202_p0 = scmp.lt.s32.totalorder %s30_s16, %s30_s16 }
  0x3f   :  { %p4198_p13 = scmp.ne.s32.totalorder %s30_s16, %s4197_s8  ;;  %p4203_p1 = scmp.lt.s32.totalorder %s4197_s8, %s4197_s8 }
  0x41   :  { %p4204_p2 = por %p4203_p1, %p4202_p0 }
  0x43   :  { %p4205_p3 = pnand %p4204_p2, %p4198_p13 }
  0x45   :  { %4208 = shalt.err (!%p4205_p3)
}
  0x46   :  { %35 = dma.hbm_to_vmem [thread:$0]  %s5388_s2, 2048, %s30_s16, [#allocation3], %s4308_s23, %s4308_s23, %s4309_s24  }
  0x47   :  { %s4209_s13 = scalar_lea.hbm %s5390_s4, 2048 }
  0x48   :  { %p4210_p4 = scmp.ne.s32.totalorder %s5390_s4, %s4209_s13  ;;  %p4213_p5 = scmp.lt.u32.totalorder %s4209_s13, %s5390_s4 }
  0x4a   :  { %p4215_p6 = pnand %p4213_p5, %p4210_p4 }
  0x4c   :  { %4218 = shalt.err (!%p4215_p6)
}
  0x4d   :  { %s4219_s3 = scalar_lea.vmem %s54_s18, 2048  ;;  %p4224_p8 = scmp.lt.s32.totalorder %s54_s18, %s54_s18 }
  0x4e   :  { %p4220_p7 = scmp.ne.s32.totalorder %s54_s18, %s4219_s3  ;;  %p4225_p9 = scmp.lt.s32.totalorder %s4219_s3, %s4219_s3 }
  0x50   :  { %p4226_p10 = por %p4225_p9, %p4224_p8 }
  0x52   :  { %p4227_p11 = pnand %p4226_p10, %p4220_p7 }
  0x54   :  { %4230 = shalt.err (!%p4227_p11)
}
  0x55   :  { %59 = dma.hbm_to_vmem [thread:$0]  %s5390_s4, 2048, %s54_s18, [#allocation6], %s4312_s14, %s4312_s14, %s4313_s19  }
  0x56   :  { %s4316_s20 = smov [#allocation10]   ;;  %s4317_s22 = smov [#allocation13]  }
  0x57   :  { %s79_s21 = sshll.u32 %s4316_s20, 4  ;;  %s103_s25 = sshll.u32 %s4317_s22, 4  ;;  %s80_s21 = int_to_ptr.vmem [resolvable:$true] %s79_s21  ;;  %s104_s25 = int_to_ptr.vmem [resolvable:$true] %s103_s25 }
  0x58   :  { %s4231_s8 = scalar_lea.hbm %s5393_s7, 2048 }
  0x59   :  { %p4232_p12 = scmp.ne.s32.totalorder %s5393_s7, %s4231_s8  ;;  %p4235_p13 = scmp.lt.u32.totalorder %s4231_s8, %s5393_s7 }
  0x5b   :  { %p4237_p0 = pnand %p4235_p13, %p4232_p12 }
  0x5d   :  { %4240 = shalt.err (!%p4237_p0)
}
  0x5e   :  { %s4241_s4 = scalar_lea.vmem %s80_s21, 2048  ;;  %p4246_p2 = scmp.lt.s32.totalorder %s80_s21, %s80_s21 }
  0x5f   :  { %p4242_p1 = scmp.ne.s32.totalorder %s80_s21, %s4241_s4  ;;  %p4247_p3 = scmp.lt.s32.totalorder %s4241_s4, %s4241_s4 }
  0x61   :  { %p4248_p4 = por %p4247_p3, %p4246_p2 }
  0x63   :  { %p4249_p5 = pnand %p4248_p4, %p4242_p1 }
  0x65   :  { %4252 = shalt.err (!%p4249_p5)
}
  0x66   :  { %85 = dma.hbm_to_vmem [thread:$0]  %s5393_s7, 2048, %s80_s21, [#allocation9], %s4308_s23, %s4308_s23, %s4309_s24  }
  0x67   :  { %s4253_s28 = scalar_lea.hbm %s5395_s9, 1792 }
  0x68   :  { %p4254_p6 = scmp.ne.s32.totalorder %s5395_s9, %s4253_s28  ;;  %p4257_p7 = scmp.lt.u32.totalorder %s4253_s28, %s5395_s9 }
  0x6a   :  { %p4259_p8 = pnand %p4257_p7, %p4254_p6 }
  0x6c   :  { %4262 = shalt.err (!%p4259_p8)
}
  0x6d   :  { %s4263_s16 = scalar_lea.vmem %s104_s25, 1792  ;;  %p4268_p10 = scmp.lt.s32.totalorder %s104_s25, %s104_s25 }
  0x6e   :  { %p4264_p9 = scmp.ne.s32.totalorder %s104_s25, %s4263_s16  ;;  %p4269_p11 = scmp.lt.s32.totalorder %s4263_s16, %s4263_s16 }
  0x70   :  { %p4270_p12 = por %p4269_p11, %p4268_p10 }
  0x72   :  { %p4271_p13 = pnand %p4270_p12, %p4264_p9 }
  0x74   :  { %4274 = shalt.err (!%p4271_p13)
}
  0x75   :  { %109 = dma.hbm_to_vmem [thread:$0]  %s5395_s9, 1792, %s104_s25, [#allocation12], %s4308_s23, %s4308_s23, %s4309_s24  }
  0x76   :  { %4297 = dma.done.wait [#allocation3], 2048  }
  0x77   :  { %4298 = vsyncadd [#allocation3], 4294965248 }
  0x78   :  { %4299 = dma.done.wait [#allocation6], 6144  }
  0x79   :  { %4300 = vsyncadd [#allocation6], 4294961152 }
  0x7a   :  { %4301 = dma.done.wait [#allocation9], 10240  }
  0x7b   :  { %4302 = vsyncadd [#allocation9], 4294957056 }
  0x7c   :  { %4303 = dma.done.wait [#allocation12], 2816  }
  0x7d   :  { %4304 = vsyncadd [#allocation12], 4294964480  ;;  %v4491_v0 = vld [vmem:[%s5386_s0] sm:$0xff]  ;;  %v4496_v1 = vld [vmem:[%s5386_s0 + $0x8] sm:$0xff]  ;;  %vm243_vm0 = vcmask 1045504   ;;  %vm163_vm1 = vcmask 1046528  }
  0x7e   :  { %v4501_v2 = vld [vmem:[%s5386_s0 + $0x10] sm:$0xff]  ;;  %v244_v3 = vrot.slane %v4491_v0, 2  ;;  %v245_v4 = vrot.slane %v4496_v1, 2  ;;  %v164_v5 = vrot.slane %v4491_v0, 1  ;;  %v165_v6 = vrot.slane %v4496_v1, 1  ;;  %s4318_s24 = smov 2  }
  0x7f   :  { %v247_v7 = vrot.slane %v4501_v2, 2  ;;  %v167_v8 = vrot.slane %v4501_v2, 1  ;;  %s4319_s25 = smov 1   ;;  %v325_v11 = vrot.slane %v4496_v1, 3  ;;  %vm507_vm2 = vcmask 1043456   ;;  %v4521_v16 = vld [vmem:[%s5386_s0 + $0x18] sm:$0xff] }
  0x80   :  { %v246_v9 = vsel %vm243_vm0, %v244_v3, %v245_v4  ;;  %v166_v10 = vsel %vm163_vm1, %v164_v5, %v165_v6  ;;  %v327_v14 = vrot.slane %v4501_v2, 3  ;;  %v324_v15 = vrot.slane %v4491_v0, 3  ;;  %v4526_v17 = vld [vmem:[%s5386_s0 + $0x20] sm:$0xff]  ;;  %s4320_s14 = smov 3   ;;  %v4554_v31 = vld [vmem:[%s5386_s0 + $0x28] sm:$0xff]  ;;  %v4559_v32 = vld [vmem:[%s5386_s0 + $0x30] sm:$0xff] }
  0x81   :  { %275 = vrot.lane.b32.xlu1 %v246_v9, %s4318_s24  ;;  %195 = vrot.lane.b32.xlu0 %v166_v10, %s4319_s25  ;;  %v248_v12 = vsel %vm243_vm0, %v245_v4, %v247_v7  ;;  %v168_v13 = vsel %vm163_vm1, %v165_v6, %v167_v8  ;;  %vm323_vm3 = vcmask 1044480   ;;  %v454_v18 = vld [vmem:[%s5387_s1] sm:$0xf]  ;;  %v169_v21 = vrot.slane %v4521_v16, 1  ;;  %v4582_v45 = vld [vmem:[%s5386_s0 + $0x38] sm:$0xff] }
  0x82   :  { %3222 = vmatprep.subr.msk.mxu0 %vm507_vm2, %v454_v18  ;;  %v328_v19 = vsel %vm323_vm3, %v325_v11, %v327_v14  ;;  %v326_v20 = vsel %vm323_vm3, %v324_v15, %v325_v11  ;;  %v171_v22 = vrot.slane %v4526_v17, 1  ;;  %v249_v25 = vrot.slane %v4521_v16, 2  ;;  %v4587_v46 = vld [vmem:[%s5386_s0 + $0x40] sm:$0xff]  ;;  %v4610_v59 = vld [vmem:[%s5386_s0 + $0x48] sm:$0xff]  ;;  %v4615_v60 = vld [vmem:[%s5386_s0 + $0x50] sm:$0xff] }
  0x83   :  { %3223 = vmatpush3.msk.msra.mxu0 %vm507_vm2, %v454_v18  ;;  %v170_v24 = vsel %vm163_vm1, %v167_v8, %v169_v21  ;;  %v251_v26 = vrot.slane %v4526_v17, 2  ;;  %v329_v29 = vrot.slane %v4521_v16, 3  ;;  %v331_v30 = vrot.slane %v4526_v17, 3 }
  0x84   :  { %v172_v23 = vsel %vm163_vm1, %v169_v21, %v171_v22  ;;  %v250_v28 = vsel %vm243_vm0, %v247_v7, %v249_v25  ;;  %v173_v35 = vrot.slane %v4554_v31, 1  ;;  %v175_v36 = vrot.slane %v4559_v32, 1 }
  0x85   :  { %277 = vrot.lane.b32.xlu1 %v248_v12, %s4318_s24  ;;  %197 = vrot.lane.b32.xlu0 %v168_v13, %s4319_s25  ;;  %v252_v27 = vsel %vm243_vm0, %v249_v25, %v251_v26  ;;  %v332_v33 = vsel %vm323_vm3, %v329_v29, %v331_v30  ;;  %v330_v34 = vsel %vm323_vm3, %v327_v14, %v329_v29  ;;  %v253_v39 = vrot.slane %v4554_v31, 2  ;;  %v4638_v12 = vld [vmem:[%s5386_s0 + $0x58] sm:$0xff]  ;;  %v4643_v13 = vld [vmem:[%s5386_s0 + $0x60] sm:$0xff] }
  0x86   :  { %v176_v37 = vsel %vm163_vm1, %v173_v35, %v175_v36  ;;  %v174_v38 = vsel %vm163_vm1, %v171_v22, %v173_v35  ;;  %v255_v40 = vrot.slane %v4559_v32, 2  ;;  %v333_v43 = vrot.slane %v4554_v31, 3  ;;  %v4671_v29 = vld [vmem:[%s5386_s0 + $0x70] sm:$0xff] }
  0x87   :  { %v254_v42 = vsel %vm243_vm0, %v251_v26, %v253_v39  ;;  %v335_v44 = vrot.slane %v4559_v32, 3  ;;  %v177_v49 = vrot.slane %v4582_v45, 1  ;;  %v179_v50 = vrot.slane %v4587_v46, 1 }
  0x88   :  { %v256_v41 = vsel %vm243_vm0, %v253_v39, %v255_v40  ;;  %v334_v48 = vsel %vm323_vm3, %v331_v30, %v333_v43  ;;  %v257_v53 = vrot.slane %v4582_v45, 2  ;;  %v259_v54 = vrot.slane %v4587_v46, 2 }
  0x89   :  { %357 = vrot.lane.b32.xlu1 %v328_v19, %s4320_s14  ;;  %355 = vrot.lane.b32.xlu0 %v326_v20, %s4320_s14  ;;  %v336_v47 = vsel %vm323_vm3, %v333_v43, %v335_v44  ;;  %v180_v51 = vsel %vm163_vm1, %v177_v49, %v179_v50  ;;  %v178_v52 = vsel %vm163_vm1, %v175_v36, %v177_v49  ;;  %v337_v57 = vrot.slane %v4582_v45, 3 }
  0x8a   :  { %v260_v55 = vsel %vm243_vm0, %v257_v53, %v259_v54  ;;  %v258_v56 = vsel %vm243_vm0, %v255_v40, %v257_v53  ;;  %v339_v58 = vrot.slane %v4587_v46, 3  ;;  %v181_v63 = vrot.slane %v4610_v59, 1 }
  0x8b   :  { %v338_v62 = vsel %vm323_vm3, %v335_v44, %v337_v57  ;;  %v183_v3 = vrot.slane %v4615_v60, 1  ;;  %v261_v6 = vrot.slane %v4610_v59, 2  ;;  %v263_v7 = vrot.slane %v4615_v60, 2  ;;  %v4694_v44 = vld [vmem:[%s5386_s0 + $0x78] sm:$0xff] }
  0x8c   :  { %v340_v61 = vsel %vm323_vm3, %v337_v57, %v339_v58  ;;  %v182_v5 = vsel %vm163_vm1, %v179_v50, %v181_v63  ;;  %v341_v10 = vrot.slane %v4610_v59, 3  ;;  %v343_v11 = vrot.slane %v4615_v60, 3 }
  0x8d   :  { %201 = vrot.lane.b32.xlu1 %v172_v23, %s4319_s25  ;;  %199 = vrot.lane.b32.xlu0 %v170_v24, %s4319_s25  ;;  %v184_v4 = vsel %vm163_vm1, %v181_v63, %v183_v3  ;;  %v264_v8 = vsel %vm243_vm0, %v261_v6, %v263_v7  ;;  %v262_v9 = vsel %vm243_vm0, %v259_v54, %v261_v6  ;;  %v185_v18 = vrot.slane %v4638_v12, 1 }
  0x8e   :  { %v344_v14 = vsel %vm323_vm3, %v341_v10, %v343_v11  ;;  %v342_v15 = vsel %vm323_vm3, %v339_v58, %v341_v10  ;;  %v187_v19 = vrot.slane %v4643_v13, 1  ;;  %v265_v22 = vrot.slane %v4638_v12, 2 }
  0x8f   :  { %v186_v21 = vsel %vm163_vm1, %v183_v3, %v185_v18  ;;  %v267_v23 = vrot.slane %v4643_v13, 2  ;;  %v345_v26 = vrot.slane %v4638_v12, 3  ;;  %v191_v35 = vrot.slane %v4671_v29, 1 }
  0x90   :  { %v188_v20 = vsel %vm163_vm1, %v185_v18, %v187_v19  ;;  %v266_v25 = vsel %vm243_vm0, %v263_v7, %v265_v22  ;;  %v271_v39 = vrot.slane %v4671_v29, 2  ;;  %v351_v43 = vrot.slane %v4671_v29, 3 }
  0x91   :  { %281 = vrot.lane.b32.xlu1 %v252_v27, %s4318_s24  ;;  %279 = vrot.lane.b32.xlu0 %v250_v28, %s4318_s24  ;;  %v268_v24 = vsel %vm243_vm0, %v265_v22, %v267_v23  ;;  %v347_v27 = vrot.slane %v4643_v13, 3  ;;  %v4666_v28 = vld [vmem:[%s5386_s0 + $0x68] sm:$0xff]  ;;  %v193_v49 = vrot.slane %v4694_v44, 1  ;;  %v353_v53 = vrot.slane %v4694_v44, 3  ;;  %s4322_s0 = smov 64  }
  0x92   :  { %vm403_vm4 = vcmask 7168   ;;  %vm420_vm5 = vcmask 15360   ;;  %vm437_vm6 = vcmask 23552   ;;  %vm458_vm7 = vcmask 31744  }
  0x93   :  { %v348_v30 = vsel %vm323_vm3, %v345_v26, %v347_v27  ;;  %v194_v50 = vsel %vm163_vm1, %v191_v35, %v193_v49  ;;  %v354_v54 = vsel %vm323_vm3, %v351_v43, %v353_v53  ;;  %vm791_vm8 = vcmask 1014784  }
  0x94   :  { %vm4321_vm9 = vmmov 1   ;;  %vm1049_vm11 = vcmask 261120   ;;  %vm1058_vm12 = vcmask 523264   ;;  %vm1067_vm13 = vcmask 785408  }
  0x95   :  { %361 = vrot.lane.b32.xlu1 %v332_v33, %s4320_s14  ;;  %359 = vrot.lane.b32.xlu0 %v330_v34, %s4320_s14  ;;  %v346_v33 = vsel %vm323_vm3, %v343_v11, %v345_v26  ;;  %v189_v34 = vrot.slane %v4666_v28, 1  ;;  %vm3464_vm10 = vmpackc.low %vm507_vm2, %vm4321_vm9  ;;  %vm1265_vm14 = vcmask 457728   ;;  %vm1553_vm15 = vcmask 179200  }
  0x97   :  { %v192_v36 = vsel %vm163_vm1, %v189_v34, %v191_v35 }
  0x99   :  { %205 = vrot.lane.b32.xlu1 %v176_v37, %s4319_s25  ;;  %203 = vrot.lane.b32.xlu0 %v174_v38, %s4319_s25  ;;  %v190_v37 = vsel %vm163_vm1, %v187_v19, %v189_v34  ;;  %v269_v38 = vrot.slane %v4666_v28, 2 }
  0x9b   :  { %v272_v40 = vsel %vm243_vm0, %v269_v38, %v271_v39 }
  0x9d   :  { %285 = vrot.lane.b32.xlu1 %v256_v41, %s4318_s24  ;;  %283 = vrot.lane.b32.xlu0 %v254_v42, %s4318_s24  ;;  %v270_v41 = vsel %vm243_vm0, %v267_v23, %v269_v38  ;;  %v349_v42 = vrot.slane %v4666_v28, 3 }
  0xa1   :  { %365 = vrot.lane.b32.xlu1 %v336_v47, %s4320_s14  ;;  %363 = vrot.lane.b32.xlu0 %v334_v48, %s4320_s14  ;;  %v352_v47 = vsel %vm323_vm3, %v349_v42, %v351_v43  ;;  %v350_v48 = vsel %vm323_vm3, %v347_v27, %v349_v42 }
  0xa5   :  { %209 = vrot.lane.b32.xlu1 %v180_v51, %s4319_s25  ;;  %207 = vrot.lane.b32.xlu0 %v178_v52, %s4319_s25  ;;  %v273_v51 = vrot.slane %v4694_v44, 2 }
  0xa7   :  { %v274_v52 = vsel %vm243_vm0, %v271_v39, %v273_v51 }
  0xa9   :  { %289 = vrot.lane.b32.xlu1 %v260_v55, %s4318_s24  ;;  %287 = vrot.lane.b32.xlu0 %v258_v56, %s4318_s24 }
  0xad   :  { %369 = vrot.lane.b32.xlu1 %v340_v61, %s4320_s14  ;;  %367 = vrot.lane.b32.xlu0 %v338_v62, %s4320_s14 }
  0xb1   :  { %213 = vrot.lane.b32.xlu1 %v184_v4, %s4319_s25  ;;  %211 = vrot.lane.b32.xlu0 %v182_v5, %s4319_s25 }
  0xb5   :  { %293 = vrot.lane.b32.xlu1 %v264_v8, %s4318_s24  ;;  %291 = vrot.lane.b32.xlu0 %v262_v9, %s4318_s24 }
  0xb9   :  { %373 = vrot.lane.b32.xlu1 %v344_v14, %s4320_s14  ;;  %371 = vrot.lane.b32.xlu0 %v342_v15, %s4320_s14 }
  0xbd   :  { %217 = vrot.lane.b32.xlu1 %v188_v20, %s4319_s25  ;;  %215 = vrot.lane.b32.xlu0 %v186_v21, %s4319_s25 }
  0xc1   :  { %297 = vrot.lane.b32.xlu1 %v268_v24, %s4318_s24  ;;  %295 = vrot.lane.b32.xlu0 %v266_v25, %s4318_s24 }
  0xc5   :  { %377 = vrot.lane.b32.xlu1 %v348_v30, %s4320_s14  ;;  %375 = vrot.lane.b32.xlu0 %v346_v33, %s4320_s14 }
  0xc9   :  { %221 = vrot.lane.b32.xlu1 %v192_v36, %s4319_s25  ;;  %219 = vrot.lane.b32.xlu0 %v190_v37, %s4319_s25 }
  0xcd   :  { %301 = vrot.lane.b32.xlu1 %v272_v40, %s4318_s24  ;;  %299 = vrot.lane.b32.xlu0 %v270_v41, %s4318_s24 }
  0xd1   :  { %381 = vrot.lane.b32.xlu1 %v352_v47, %s4320_s14  ;;  %379 = vrot.lane.b32.xlu0 %v350_v48, %s4320_s14 }
  0xd5   :  { %225 = vrot.lane.b32.xlu1 %v193_v49, %s4319_s25  ;;  %223 = vrot.lane.b32.xlu0 %v194_v50, %s4319_s25 }
  0xd9   :  { %305 = vrot.lane.b32.xlu1 %v273_v51, %s4318_s24  ;;  %303 = vrot.lane.b32.xlu0 %v274_v52, %s4318_s24  ;;  %s4323_s24 = smov 96  }
  0xdd   :  { %385 = vrot.lane.b32.xlu1 %v353_v53, %s4320_s14  ;;  %383 = vrot.lane.b32.xlu0 %v354_v54, %s4320_s14 }
  0xf3   :  { %v276_v55 = vpop.permute.xlu1 %275  ;;  %v196_v56 = vpop.permute.xlu0 %195 }
  0xf4   :  { %v404_v61 = vsel %vm403_vm4, %v4491_v0, %v196_v56 }
  0xf5   :  { %v421_v5 = vsel %vm420_vm5, %v404_v61, %v276_v55 }
  0xf7   :  { %v278_v57 = vpop.permute.xlu1 %277  ;;  %v198_v58 = vpop.permute.xlu0 %197 }
  0xf8   :  { %v405_v62 = vsel %vm403_vm4, %v4496_v1, %v198_v58 }
  0xf9   :  { %v422_v3 = vsel %vm420_vm5, %v405_v62, %v278_v57 }
  0xfb   :  { %v358_v63 = vpop.permute.xlu1 %357  ;;  %v356_v4 = vpop.permute.xlu0 %355 }
  0xfc   :  { %v439_v6 = vsel %vm437_vm6, %v422_v3, %v358_v63  ;;  %v438_v7 = vsel %vm437_vm6, %v421_v5, %v356_v4 }
  0xfd   :  { %3224 = vmatprep.mubr.msk.f32.mxu0 %vm458_vm7, %v438_v7 }
  0xfe   :  { %3225 = vmatmul.mubr.msk.f32.vlgmr.msra.gmra.mrb[0].mxu0 %vm458_vm7, %v439_v6 }
  0xff   :  { %v202_v0 = vpop.permute.xlu1 %201  ;;  %v200_v8 = vpop.permute.xlu0 %199 }
 0x100   :  { %v407_v10 = vsel %vm403_vm4, %v4521_v16, %v202_v0  ;;  %v406_v11 = vsel %vm403_vm4, %v4501_v2, %v200_v8 }
 0x103   :  { %v282_v1 = vpop.permute.xlu1 %281  ;;  %v280_v9 = vpop.permute.xlu0 %279 }
 0x104   :  { %v424_v14 = vsel %vm420_vm5, %v407_v10, %v282_v1  ;;  %v423_v15 = vsel %vm420_vm5, %v406_v11, %v280_v9 }
 0x107   :  { %v362_v18 = vpop.permute.xlu1 %361  ;;  %v360_v19 = vpop.permute.xlu0 %359 }
 0x108   :  { %v441_v20 = vsel %vm437_vm6, %v424_v14, %v362_v18  ;;  %v440_v21 = vsel %vm437_vm6, %v423_v15, %v360_v19 }
 0x109   :  { %3227 = vmatprep.mubr.msk.f32.mxu0 %vm458_vm7, %v440_v21 }
 0x10a   :  { %3228 = vmatmul.mubr.msk.f32.gmra.mrb[2].mxu0 %vm458_vm7, %v441_v20 }
 0x10b   :  { %v206_v22 = vpop.permute.xlu1 %205  ;;  %v204_v23 = vpop.permute.xlu0 %203 }
 0x10c   :  { %v409_v2 = vsel %vm403_vm4, %v4554_v31, %v206_v22  ;;  %v408_v25 = vsel %vm403_vm4, %v4526_v17, %v204_v23 }
 0x10f   :  { %v286_v16 = vpop.permute.xlu1 %285  ;;  %v284_v24 = vpop.permute.xlu0 %283 }
 0x110   :  { %v426_v26 = vsel %vm420_vm5, %v409_v2, %v286_v16  ;;  %v425_v27 = vsel %vm420_vm5, %v408_v25, %v284_v24 }
 0x113   :  { %v366_v30 = vpop.permute.xlu1 %365  ;;  %v364_v33 = vpop.permute.xlu0 %363 }
 0x114   :  { %v443_v34 = vsel %vm437_vm6, %v426_v26, %v366_v30  ;;  %v442_v35 = vsel %vm437_vm6, %v425_v27, %v364_v33 }
 0x115   :  { %3230 = vmatprep.mubr.msk.f32.mxu0 %vm458_vm7, %v442_v35 }
 0x116   :  { %3231 = vmatmul.mubr.msk.f32.gmra.mrb[4].mxu0 %vm458_vm7, %v443_v34  ;;  %v783_v34 = vld [vmem:[#allocation13] sm:$0xff] }
 0x117   :  { %v210_v36 = vpop.permute.xlu1 %209  ;;  %v208_v37 = vpop.permute.xlu0 %207  ;;  %3280 = vmatprep.mubr.msk.f32.mxu1 %vm791_vm8, %v783_v34 }
 0x118   :  { %v411_v17 = vsel %vm403_vm4, %v4582_v45, %v210_v36  ;;  %v410_v39 = vsel %vm403_vm4, %v4559_v32, %v208_v37  ;;  %v4798_v37 = vld [vmem:[#allocation11 + $0x1] ss:$0 sm:$0xff] }
 0x11b   :  { %v290_v31 = vpop.permute.xlu1 %289  ;;  %v288_v38 = vpop.permute.xlu0 %287 }
 0x11c   :  { %v428_v40 = vsel %vm420_vm5, %v411_v17, %v290_v31  ;;  %v427_v41 = vsel %vm420_vm5, %v410_v39, %v288_v38  ;;  %v4801_v17 = vld [vmem:[#allocation11 + $0x2] ss:$0 sm:$0xff] }
 0x11f   :  { %v370_v42 = vpop.permute.xlu1 %369  ;;  %v368_v43 = vpop.permute.xlu0 %367 }
 0x120   :  { %v445_v47 = vsel %vm437_vm6, %v428_v40, %v370_v42  ;;  %v444_v48 = vsel %vm437_vm6, %v427_v41, %v368_v43 }
 0x121   :  { %3233 = vmatprep.mubr.msk.f32.mxu0 %vm458_vm7, %v444_v48 }
 0x122   :  { %3234 = vmatmul.mubr.msk.f32.gmra.mrb[6].mxu0 %vm458_vm7, %v445_v47 }
 0x123   :  { %v214_v49 = vpop.permute.xlu1 %213  ;;  %v212_v50 = vpop.permute.xlu0 %211 }
 0x124   :  { %v413_v32 = vsel %vm403_vm4, %v4610_v59, %v214_v49  ;;  %v412_v52 = vsel %vm403_vm4, %v4587_v46, %v212_v50 }
 0x127   :  { %v294_v45 = vpop.permute.xlu1 %293  ;;  %v292_v51 = vpop.permute.xlu0 %291 }
 0x128   :  { %v430_v53 = vsel %vm420_vm5, %v413_v32, %v294_v45  ;;  %v429_v54 = vsel %vm420_vm5, %v412_v52, %v292_v51 }
 0x12b   :  { %v374_v55 = vpop.permute.xlu1 %373  ;;  %v372_v56 = vpop.permute.xlu0 %371 }
 0x12c   :  { %v447_v57 = vsel %vm437_vm6, %v430_v53, %v374_v55  ;;  %v446_v58 = vsel %vm437_vm6, %v429_v54, %v372_v56 }
 0x12d   :  { %3236 = vmatprep.mubr.msk.f32.mxu0 %vm458_vm7, %v446_v58 }
 0x12e   :  { %3237 = vmatmul.mubr.msk.f32.gmra.mrb[8].mxu0 %vm458_vm7, %v447_v57 }
 0x12f   :  { %v218_v61 = vpop.permute.xlu1 %217  ;;  %v216_v62 = vpop.permute.xlu0 %215 }
 0x130   :  { %v415_v46 = vsel %vm403_vm4, %v4638_v12, %v218_v61  ;;  %v414_v3 = vsel %vm403_vm4, %v4615_v60, %v216_v62 }
 0x133   :  { %v298_v59 = vpop.permute.xlu1 %297  ;;  %v296_v63 = vpop.permute.xlu0 %295 }
 0x134   :  { %v432_v4 = vsel %vm420_vm5, %v415_v46, %v298_v59  ;;  %v431_v5 = vsel %vm420_vm5, %v414_v3, %v296_v63 }
 0x137   :  { %v378_v6 = vpop.permute.xlu1 %377  ;;  %v376_v7 = vpop.permute.xlu0 %375 }
 0x138   :  { %v449_v0 = vsel %vm437_vm6, %v432_v4, %v378_v6  ;;  %v448_v8 = vsel %vm437_vm6, %v431_v5, %v376_v7 }
 0x139   :  { %3239 = vmatprep.mubr.msk.f32.mxu0 %vm458_vm7, %v448_v8 }
 0x13a   :  { %3240 = vmatmul.mubr.msk.f32.gmra.mrb[10].mxu0 %vm458_vm7, %v449_v0 }
 0x13b   :  { %v222_v1 = vpop.permute.xlu1 %221  ;;  %v220_v9 = vpop.permute.xlu0 %219 }
 0x13c   :  { %v417_v60 = vsel %vm403_vm4, %v4666_v28, %v222_v1  ;;  %v416_v11 = vsel %vm403_vm4, %v4643_v13, %v220_v9 }
 0x13f   :  { %v302_v12 = vpop.permute.xlu1 %301  ;;  %v300_v10 = vpop.permute.xlu0 %299 }
 0x140   :  { %v434_v14 = vsel %vm420_vm5, %v417_v60, %v302_v12  ;;  %v433_v15 = vsel %vm420_vm5, %v416_v11, %v300_v10 }
 0x143   :  { %v382_v18 = vpop.permute.xlu1 %381  ;;  %v380_v19 = vpop.permute.xlu0 %379 }
 0x144   :  { %v451_v20 = vsel %vm437_vm6, %v434_v14, %v382_v18  ;;  %v450_v21 = vsel %vm437_vm6, %v433_v15, %v380_v19 }
 0x145   :  { %3242 = vmatprep.mubr.msk.f32.mxu0 %vm458_vm7, %v450_v21 }
 0x146   :  { %3243 = vmatmul.mubr.msk.f32.gmra.mrb[12].mxu0 %vm458_vm7, %v451_v20 }
 0x147   :  { %v226_v22 = vpop.permute.xlu1 %225  ;;  %v224_v23 = vpop.permute.xlu0 %223 }
 0x148   :  { %v419_v13 = vsel %vm403_vm4, %v4694_v44, %v226_v22  ;;  %v418_v24 = vsel %vm403_vm4, %v4671_v29, %v224_v23  ;;  %v4795_v44 = vld [vmem:[#allocation11] ss:$0 sm:$0xff] }
 0x14b   :  { %v306_v28 = vpop.permute.xlu1 %305  ;;  %v304_v16 = vpop.permute.xlu0 %303 }
 0x14c   :  { %v436_v2 = vsel %vm420_vm5, %v419_v13, %v306_v28  ;;  %v435_v25 = vsel %vm420_vm5, %v418_v24, %v304_v16 }
 0x14f   :  { %v386_v26 = vpop.permute.xlu1 %385  ;;  %v384_v27 = vpop.permute.xlu0 %383 }
 0x150   :  { %v453_v30 = vsel %vm437_vm6, %v436_v2, %v386_v26  ;;  %v452_v33 = vsel %vm437_vm6, %v435_v25, %v384_v27 }
 0x151   :  { %3245 = vmatprep.mubr.msk.f32.mxu0 %vm458_vm7, %v452_v33 }
 0x152   :  { %3246 = vmatmul.mubr.msk.f32.gmra.mrb[14].mxu0 %vm458_vm7, %v453_v30 }
 0x1d1   :  { %v3226_v29 = vpop.f32.mrb[0].mxu0 }
 0x1d2   :  { %v583_v35 = vadd.f32 %v3226_v29, %v4795_v44  ;;  %v577_v36 = vpop.f32.mrb[1].mxu0 }
 0x1d3   :  { %v578_v31 = vadd.f32 %v577_v36, %v4795_v44 }
 0x1d4   :  { %v657_v38 = vmax.f32 %v583_v35, 0.0 }
 0x1d5   :  { %v656_v39 = vmax.f32 %v578_v31, 0.0 }
 0x1d6   :  { %v673_v40 = vmul.f32 %v657_v38, %v4798_v37 }
 0x1d7   :  { %v672_v41 = vmul.f32 %v656_v39, %v4798_v37 }
 0x1d8   :  { %v689_v42 = vadd.f32 %v673_v40, %v4801_v17 }
 0x1d9   :  { %v688_v43 = vadd.f32 %v672_v41, %v4801_v17 }
 0x1da   :  { %v721_v47 = vrot.slane %v689_v42, 1 }
 0x1db   :  { %v720_v48 = vrot.slane %v688_v43, 1 }
 0x1dd   :  { %v3229_v49 = vpop.f32.mrb[2].mxu0  ;;  %v722_v50 = vsel %vm163_vm1, %v720_v48, %v721_v47 }
 0x1de   :  { %v593_v45 = vadd.f32 %v3229_v49, %v4795_v44  ;;  %v587_v51 = vpop.f32.mrb[3].mxu0  ;;  %v767_v32 = vmax.f32 %v688_v43, %v722_v50 }
 0x1df   :  { %v588_v52 = vadd.f32 %v587_v51, %v4795_v44 }
 0x1e0   :  { %v659_v53 = vmax.f32 %v593_v45, 0.0 }
 0x1e1   :  { %v658_v54 = vmax.f32 %v588_v52, 0.0 }
 0x1e2   :  { %v675_v55 = vmul.f32 %v659_v53, %v4798_v37 }
 0x1e3   :  { %v674_v56 = vmul.f32 %v658_v54, %v4798_v37 }
 0x1e4   :  { %v691_v57 = vadd.f32 %v675_v55, %v4801_v17 }
 0x1e5   :  { %v690_v58 = vadd.f32 %v674_v56, %v4801_v17 }
 0x1e6   :  { %v725_v61 = vrot.slane %v691_v57, 1 }
 0x1e7   :  { %v723_v62 = vrot.slane %v690_v58, 1 }
 0x1e9   :  { %v3232_v59 = vpop.f32.mrb[4].mxu0  ;;  %v724_v63 = vsel %vm163_vm1, %v721_v47, %v723_v62  ;;  %v726_v46 = vsel %vm163_vm1, %v723_v62, %v725_v61 }
 0x1ea   :  { %v603_v3 = vadd.f32 %v3232_v59, %v4795_v44  ;;  %v597_v4 = vpop.f32.mrb[5].mxu0  ;;  %v768_v5 = vmax.f32 %v689_v42, %v724_v63  ;;  %v769_v6 = vmax.f32 %v690_v58, %v726_v46 }
 0x1eb   :  { %v598_v7 = vadd.f32 %v597_v4, %v4795_v44 }
 0x1ec   :  { %v661_v0 = vmax.f32 %v603_v3, 0.0  ;;  %v3435_v8 = vpack.c.bf16 %v768_v5, %v767_v32 }
 0x1ed   :  { %v660_v1 = vmax.f32 %v598_v7, 0.0 }
 0x1ee   :  { %v677_v9 = vmul.f32 %v661_v0, %v4798_v37  ;;  %3436 = vmatprep.subr.bf16.mxu1 %v3435_v8 }
 0x1ef   :  { %v676_v12 = vmul.f32 %v660_v1, %v4798_v37  ;;  %3438 = vmatpush3.bf16.msra.mxu1 %v3435_v8 }
 0x1f0   :  { %v693_v10 = vadd.f32 %v677_v9, %v4801_v17 }
 0x1f1   :  { %v692_v60 = vadd.f32 %v676_v12, %v4801_v17 }
 0x1f2   :  { %v729_v11 = vrot.slane %v693_v10, 1 }
 0x1f3   :  { %v727_v14 = vrot.slane %v692_v60, 1 }
 0x1f5   :  { %v3235_v15 = vpop.f32.mrb[6].mxu0  ;;  %v728_v18 = vsel %vm163_vm1, %v725_v61, %v727_v14  ;;  %v730_v19 = vsel %vm163_vm1, %v727_v14, %v729_v11 }
 0x1f6   :  { %v613_v20 = vadd.f32 %v3235_v15, %v4795_v44  ;;  %v607_v21 = vpop.f32.mrb[7].mxu0  ;;  %v770_v22 = vmax.f32 %v691_v57, %v728_v18  ;;  %v771_v23 = vmax.f32 %v692_v60, %v730_v19 }
 0x1f7   :  { %v608_v28 = vadd.f32 %v607_v21, %v4795_v44 }
 0x1f8   :  { %v663_v16 = vmax.f32 %v613_v20, 0.0  ;;  %v3439_v13 = vpack.c.bf16 %v770_v22, %v769_v6 }
 0x1f9   :  { %v662_v24 = vmax.f32 %v608_v28, 0.0 }
 0x1fa   :  { %v679_v2 = vmul.f32 %v663_v16, %v4798_v37  ;;  %3440 = vmatprep.subr.bf16.mxu1 %v3439_v13 }
 0x1fb   :  { %v678_v25 = vmul.f32 %v662_v24, %v4798_v37  ;;  %3442 = vmatpush3.bf16.msra.mxu1 %v3439_v13 }
 0x1fc   :  { %v695_v26 = vadd.f32 %v679_v2, %v4801_v17 }
 0x1fd   :  { %v694_v27 = vadd.f32 %v678_v25, %v4801_v17 }
 0x1fe   :  { %v733_v30 = vrot.slane %v695_v26, 1 }
 0x1ff   :  { %v731_v33 = vrot.slane %v694_v27, 1 }
 0x201   :  { %v3238_v34 = vpop.f32.mrb[8].mxu0  ;;  %v732_v29 = vsel %vm163_vm1, %v729_v11, %v731_v33  ;;  %v734_v35 = vsel %vm163_vm1, %v731_v33, %v733_v30 }
 0x202   :  { %v623_v36 = vadd.f32 %v3238_v34, %v4795_v44  ;;  %v617_v31 = vpop.f32.mrb[9].mxu0  ;;  %v772_v38 = vmax.f32 %v693_v10, %v732_v29  ;;  %v773_v39 = vmax.f32 %v694_v27, %v734_v35 }
 0x203   :  { %v618_v40 = vadd.f32 %v617_v31, %v4795_v44 }
 0x204   :  { %v665_v41 = vmax.f32 %v623_v36, 0.0  ;;  %v3443_v42 = vpack.c.bf16 %v772_v38, %v771_v23 }
 0x205   :  { %v664_v43 = vmax.f32 %v618_v40, 0.0 }
 0x206   :  { %v681_v47 = vmul.f32 %v665_v41, %v4798_v37  ;;  %3444 = vmatprep.subr.bf16.mxu1 %v3443_v42 }
 0x207   :  { %v680_v48 = vmul.f32 %v664_v43, %v4798_v37  ;;  %3446 = vmatpush3.bf16.msra.mxu1 %v3443_v42 }
 0x208   :  { %v697_v49 = vadd.f32 %v681_v47, %v4801_v17 }
 0x209   :  { %v696_v50 = vadd.f32 %v680_v48, %v4801_v17 }
 0x20a   :  { %v737_v45 = vrot.slane %v697_v49, 1 }
 0x20b   :  { %v735_v51 = vrot.slane %v696_v50, 1 }
 0x20d   :  { %v3241_v32 = vpop.f32.mrb[10].mxu0  ;;  %v736_v52 = vsel %vm163_vm1, %v733_v30, %v735_v51  ;;  %v738_v53 = vsel %vm163_vm1, %v735_v51, %v737_v45  ;;  %v789_v51 = vld [vmem:[#allocation13 + $0x30] sm:$0xff] }
 0x20e   :  { %v633_v54 = vadd.f32 %v3241_v32, %v4795_v44  ;;  %v627_v55 = vpop.f32.mrb[11].mxu0  ;;  %v774_v56 = vmax.f32 %v695_v26, %v736_v52  ;;  %v775_v57 = vmax.f32 %v696_v50, %v738_v53  ;;  %v787_v50 = vld [vmem:[#allocation13 + $0x20] sm:$0xff]  ;;  %v790_v32 = vld [vmem:[#allocation13 + $0x38] sm:$0xf]  ;;  %v1077_v53 = vld [vmem:[#allocation2 + $0x8] sm:$0xff] }
 0x20f   :  { %v628_v58 = vadd.f32 %v627_v55, %v4795_v44  ;;  %v1076_v52 = vld [vmem:[#allocation2] sm:$0xff] }
 0x210   :  { %v667_v61 = vmax.f32 %v633_v54, 0.0  ;;  %v3447_v62 = vpack.c.bf16 %v774_v56, %v773_v39  ;;  %v1078_v54 = vld [vmem:[#allocation2 + $0x10] sm:$0xff]  ;;  %v3469_v55 = vpack.c.bf16 %v1077_v53, %v1076_v52  ;;  %v1079_v56 = vld [vmem:[#allocation2 + $0x18] sm:$0xff] }
 0x211   :  { %v666_v59 = vmax.f32 %v628_v58, 0.0  ;;  %v1080_v58 = vld [vmem:[#allocation2 + $0x20] sm:$0xff] }
 0x212   :  { %v683_v63 = vmul.f32 %v667_v61, %v4798_v37  ;;  %3448 = vmatprep.subr.bf16.mxu1 %v3447_v62  ;;  %v1081_v61 = vld [vmem:[#allocation2 + $0x28] sm:$0xff]  ;;  %3470 = vmatprep.subr.bf16.mxu0 %v3469_v55 }
 0x213   :  { %v682_v46 = vmul.f32 %v666_v59, %v4798_v37  ;;  %3450 = vmatpush3.bf16.msra.mxu1 %v3447_v62  ;;  %3472 = vmatpush3.bf16.msra.mxu0 %v3469_v55  ;;  %v3477_v62 = vpack.c.bf16 %v1081_v61, %v1080_v58  ;;  %v1082_v59 = vld [vmem:[#allocation2 + $0x30] sm:$0xff] }
 0x214   :  { %v699_v3 = vadd.f32 %v683_v63, %v4801_v17  ;;  %v1083_v63 = vld [vmem:[#allocation2 + $0x38] sm:$0xff] }
 0x215   :  { %v698_v4 = vadd.f32 %v682_v46, %v4801_v17  ;;  %v3481_v46 = vpack.c.bf16 %v1083_v63, %v1082_v59 }
 0x216   :  { %v741_v5 = vrot.slane %v699_v3, 1 }
 0x217   :  { %v739_v6 = vrot.slane %v698_v4, 1 }
 0x219   :  { %v3244_v7 = vpop.f32.mrb[12].mxu0  ;;  %v740_v0 = vsel %vm163_vm1, %v737_v45, %v739_v6  ;;  %v742_v8 = vsel %vm163_vm1, %v739_v6, %v741_v5  ;;  %v788_v45 = vld [vmem:[#allocation13 + $0x28] sm:$0xff]  ;;  %v1086_v6 = vld [vmem:[#allocation2 + $0x50] sm:$0xff] }
 0x21a   :  { %v643_v1 = vadd.f32 %v3244_v7, %v4795_v44  ;;  %v637_v9 = vpop.f32.mrb[13].mxu0  ;;  %v776_v12 = vmax.f32 %v697_v49, %v740_v0  ;;  %v777_v10 = vmax.f32 %v698_v4, %v742_v8  ;;  %v786_v49 = vld [vmem:[#allocation13 + $0x18] sm:$0xff]  ;;  %v1085_v4 = vld [vmem:[#allocation2 + $0x48] sm:$0xff]  ;;  %v1088_v8 = vld [vmem:[#allocation2 + $0x60] sm:$0xff] }
 0x21b   :  { %v638_v60 = vadd.f32 %v637_v9, %v4795_v44  ;;  %v1087_v7 = vld [vmem:[#allocation2 + $0x58] sm:$0xff] }
 0x21c   :  { %v669_v11 = vmax.f32 %v643_v1, 0.0  ;;  %v3451_v14 = vpack.c.bf16 %v776_v12, %v775_v57  ;;  %v3473_v57 = vpack.c.bf16 %v1079_v56, %v1078_v54  ;;  %v3489_v0 = vpack.c.bf16 %v1087_v7, %v1086_v6  ;;  %v1089_v1 = vld [vmem:[#allocation2 + $0x68] sm:$0xff] }
 0x21d   :  { %v668_v15 = vmax.f32 %v638_v60, 0.0  ;;  %v3493_v9 = vpack.c.bf16 %v1089_v1, %v1088_v8 }
 0x21e   :  { %v685_v18 = vmul.f32 %v669_v11, %v4798_v37  ;;  %3452 = vmatprep.subr.bf16.mxu1 %v3451_v14  ;;  %3474 = vmatprep.subr.bf16.mxu0 %v3473_v57 }
 0x21f   :  { %v684_v19 = vmul.f32 %v668_v15, %v4798_v37  ;;  %3454 = vmatpush3.bf16.msra.mxu1 %v3451_v14  ;;  %3476 = vmatpush3.bf16.msra.mxu0 %v3473_v57 }
 0x220   :  { %v701_v20 = vadd.f32 %v685_v18, %v4801_v17  ;;  %3478 = vmatprep.subr.bf16.mxu0 %v3477_v62 }
 0x221   :  { %v700_v21 = vadd.f32 %v684_v19, %v4801_v17 }
 0x222   :  { %v745_v22 = vrot.slane %v701_v20, 1 }
 0x223   :  { %v743_v23 = vrot.slane %v700_v21, 1  ;;  %3480 = vmatpush3.bf16.msra.mxu0 %v3477_v62 }
 0x224   :  { %3482 = vmatprep.subr.bf16.mxu0 %v3481_v46 }
 0x225   :  { %v3247_v28 = vpop.f32.mrb[14].mxu0  ;;  %v744_v16 = vsel %vm163_vm1, %v741_v5, %v743_v23  ;;  %v746_v13 = vsel %vm163_vm1, %v743_v23, %v745_v22 }
 0x226   :  { %v653_v24 = vadd.f32 %v3247_v28, %v4795_v44  ;;  %v647_v2 = vpop.f32.mrb[15].mxu0  ;;  %v778_v25 = vmax.f32 %v699_v3, %v744_v16  ;;  %v779_v26 = vmax.f32 %v700_v21, %v746_v13  ;;  %v1084_v3 = vld [vmem:[#allocation2 + $0x40] sm:$0xff]  ;;  %v1091_v21 = vld [vmem:[#allocation2 + $0x78] sm:$0xff] }
 0x227   :  { %v648_v27 = vadd.f32 %v647_v2, %v4795_v44  ;;  %v3485_v5 = vpack.c.bf16 %v1085_v4, %v1084_v3  ;;  %3484 = vmatpush3.bf16.msra.mxu0 %v3481_v46 }
 0x228   :  { %v671_v30 = vmax.f32 %v653_v24, 0.0  ;;  %v3455_v33 = vpack.c.bf16 %v778_v25, %v777_v10 }
 0x229   :  { %v670_v34 = vmax.f32 %v648_v27, 0.0  ;;  %3486 = vmatprep.subr.bf16.mxu0 %v3485_v5 }
 0x22a   :  { %v687_v29 = vmul.f32 %v671_v30, %v4798_v37  ;;  %3456 = vmatprep.subr.bf16.mxu1 %v3455_v33 }
 0x22b   :  { %v686_v35 = vmul.f32 %v670_v34, %v4798_v37  ;;  %3458 = vmatpush3.bf16.msra.mxu1 %v3455_v33  ;;  %v784_v37 = vld [vmem:[#allocation13 + $0x8] sm:$0xff]  ;;  %3488 = vmatpush3.bf16.msra.mxu0 %v3485_v5 }
 0x22c   :  { %v703_v36 = vadd.f32 %v687_v29, %v4801_v17  ;;  %3490 = vmatprep.subr.bf16.mxu0 %v3489_v0 }
 0x22d   :  { %v702_v31 = vadd.f32 %v686_v35, %v4801_v17  ;;  %v785_v17 = vld [vmem:[#allocation13 + $0x10] sm:$0xff] }
 0x22e   :  { %v749_v38 = vrot.slane %v703_v36, 1 }
 0x22f   :  { %v747_v39 = vrot.slane %v702_v31, 1  ;;  %3492 = vmatpush3.bf16.msra.mxu0 %v3489_v0 }
 0x230   :  { %v782_v44 = vmax.f32 %v703_v36, %v749_v38  ;;  %3494 = vmatprep.subr.bf16.mxu0 %v3493_v9 }
 0x231   :  { %v750_v40 = vsel %vm163_vm1, %v747_v39, %v749_v38  ;;  %v748_v41 = vsel %vm163_vm1, %v745_v22, %v747_v39 }
 0x232   :  { %v781_v42 = vmax.f32 %v702_v31, %v750_v40  ;;  %v780_v43 = vmax.f32 %v701_v20, %v748_v41  ;;  %v1090_v20 = vld [vmem:[#allocation2 + $0x70] sm:$0xff] }
 0x233   :  { %3496 = vmatpush3.bf16.msra.mxu0 %v3493_v9  ;;  %v3497_v22 = vpack.c.bf16 %v1091_v21, %v1090_v20 }
 0x234   :  { %v3459_v47 = vpack.c.bf16 %v780_v43, %v779_v26  ;;  %v3463_v48 = vpack.c.bf16 %v782_v44, %v781_v42 }
 0x235   :  { %3498 = vmatprep.subr.bf16.mxu0 %v3497_v22 }
 0x236   :  { %3460 = vmatprep.subr.bf16.mxu1 %v3459_v47 }
 0x237   :  { %3462 = vmatpush3.bf16.msra.mxu1 %v3459_v47  ;;  %3500 = vmatpush3.bf16.msra.mxu0 %v3497_v22 }
 0x238   :  { %3465 = vmatprep.subr.msk.bf16.mxu1 %vm3464_vm10, %v3463_v48 }
 0x23b   :  { %3468 = vmatpush3.bf16.msk.msra.mxu1 %vm3464_vm10, %v3463_v48 }
 0x23e   :  { %3281 = vmatmul.mubr.msk.f32.vlgmr.msra.gmra.mrb[0].mxu1 %vm791_vm8, %v784_v37 }
 0x23f   :  { %3283 = vmatprep.mubr.msk.f32.mxu1 %vm791_vm8, %v785_v17 }
 0x242   :  { %3284 = vmatmul.mubr.msk.f32.gmra.mrb[2].mxu1 %vm791_vm8, %v786_v49 }
 0x243   :  { %3286 = vmatprep.mubr.msk.f32.mxu1 %vm791_vm8, %v787_v50 }
 0x246   :  { %3287 = vmatmul.mubr.msk.f32.gmra.mrb[4].mxu1 %vm791_vm8, %v788_v45 }
 0x247   :  { %3289 = vmatprep.mubr.msk.f32.mxu1 %vm791_vm8, %v789_v51 }
 0x24a   :  { %3290 = vmatmul.mubr.msk.f32.gmra.mrb[6].mxu1 %vm791_vm8, %v790_v32 }
 0x311   :  { %v4872_v12 = vpop.f32.mrb[0].mxu1 }
 0x312   :  { %v933_v10 = vrot.slane %v4872_v12, 1  ;;  %v972_v60 = vrot.slane %v4872_v12, 2  ;;  %v1011_v11 = vrot.slane %v4872_v12, 3  ;;  %v4877_v14 = vpop.f32.mrb[1].mxu1 }
 0x313   :  { %v932_v15 = vrot.slane %v4877_v14, 1  ;;  %v971_v18 = vrot.slane %v4877_v14, 2  ;;  %v1010_v19 = vrot.slane %v4877_v14, 3 }
 0x315   :  { %v4882_v23 = vpop.f32.mrb[2].mxu1  ;;  %v973_v28 = vsel %vm243_vm0, %v971_v18, %v972_v60  ;;  %v934_v16 = vsel %vm163_vm1, %v932_v15, %v933_v10  ;;  %v1012_v13 = vsel %vm323_vm3, %v1010_v19, %v1011_v11 }
 0x316   :  { %v937_v24 = vrot.slane %v4882_v23, 1  ;;  %v4888_v2 = vpop.f32.mrb[3].mxu1  ;;  %v976_v30 = vrot.slane %v4882_v23, 2  ;;  %v1015_v33 = vrot.slane %v4882_v23, 3 }
 0x317   :  { %v935_v25 = vrot.slane %v4888_v2, 1  ;;  %v974_v26 = vrot.slane %v4888_v2, 2  ;;  %v1013_v27 = vrot.slane %v4888_v2, 3 }
 0x319   :  { %v4895_v34 = vpop.f32.mrb[4].mxu1  ;;  %v975_v29 = vsel %vm243_vm0, %v972_v60, %v974_v26  ;;  %v936_v35 = vsel %vm163_vm1, %v933_v10, %v935_v25  ;;  %v1014_v36 = vsel %vm323_vm3, %v1011_v11, %v1013_v27  ;;  %v938_v31 = vsel %vm163_vm1, %v935_v25, %v937_v24 }
 0x31a   :  { %v941_v38 = vrot.slane %v4895_v34, 1  ;;  %v980_v39 = vrot.slane %v4895_v34, 2  ;;  %v4903_v40 = vpop.f32.mrb[5].mxu1  ;;  %v3967_v41 = vpack.i.bf16 %v975_v29, %v973_v28  ;;  %v3962_v47 = vpack.i.bf16 %v936_v35, %v934_v16 }
 0x31b   :  { %v939_v44 = vrot.slane %v4903_v40, 1  ;;  %v978_v42 = vrot.slane %v4903_v40, 2  ;;  %v1017_v43 = vrot.slane %v4903_v40, 3  ;;  %v1019_v48 = vrot.slane %v4895_v34, 3 }
 0x31c   :  { %3968 = vrot.lane.b32.xlu1 %v3967_v41, %s4322_s0  ;;  %v3972_v37 = vpack.i.bf16 %v1014_v36, %v1012_v13  ;;  %v977_v17 = vsel %vm243_vm0, %v974_v26, %v976_v30  ;;  %v1016_v49 = vsel %vm323_vm3, %v1013_v27, %v1015_v33  ;;  %3963 = vrot.lane.b32.xlu0 %v3962_v47, %s4313_s19 }
 0x31d   :  { %v4913_v50 = vpop.f32.mrb[6].mxu1  ;;  %v940_v45 = vsel %vm163_vm1, %v937_v24, %v939_v44  ;;  %v979_v51 = vsel %vm243_vm0, %v976_v30, %v978_v42  ;;  %v1018_v32 = vsel %vm323_vm3, %v1015_v33, %v1017_v43  ;;  %v981_v52 = vsel %vm243_vm0, %v978_v42, %v980_v39 }
 0x31e   :  { %v984_v53 = vrot.slane %v4913_v50, 2  ;;  %v1023_v54 = vrot.slane %v4913_v50, 3  ;;  %v4921_v55 = vpop.f32.mrb[7].mxu1  ;;  %v3977_v56 = vpack.i.bf16 %v940_v45, %v938_v31  ;;  %v3982_v57 = vpack.i.bf16 %v979_v51, %v977_v17 }
 0x31f   :  { %v943_v58 = vrot.slane %v4921_v55, 1  ;;  %v982_v61 = vrot.slane %v4921_v55, 2  ;;  %v1021_v62 = vrot.slane %v4921_v55, 3  ;;  %v3987_v59 = vpack.i.bf16 %v1018_v32, %v1016_v49 }
 0x320   :  { %3978 = vrot.lane.b32.xlu1 %v3977_v56, %s4313_s19  ;;  %v942_v63 = vsel %vm163_vm1, %v939_v44, %v941_v38  ;;  %v945_v46 = vrot.slane %v4913_v50, 1  ;;  %v1020_v3 = vsel %vm323_vm3, %v1017_v43, %v1019_v48  ;;  %3973 = vrot.lane.b32.xlu0 %v3972_v37, %s4323_s24 }
 0x321   :  { %v983_v4 = vsel %vm243_vm0, %v980_v39, %v982_v61  ;;  %v944_v5 = vsel %vm163_vm1, %v941_v38, %v943_v58  ;;  %v1022_v6 = vsel %vm323_vm3, %v1019_v48, %v1021_v62  ;;  %v1024_v7 = vsel %vm323_vm3, %v1021_v62, %v1023_v54 }
 0x322   :  { %v3997_v0 = vpack.i.bf16 %v983_v4, %v981_v52  ;;  %v3992_v8 = vpack.i.bf16 %v944_v5, %v942_v63  ;;  %v946_v1 = vsel %vm163_vm1, %v943_v58, %v945_v46  ;;  %v4002_v9 = vpack.i.bf16 %v1022_v6, %v1020_v3 }
 0x323   :  { %v4007_v10 = vpack.i.bf16 %v945_v46, %v946_v1  ;;  %v4017_v60 = vpack.i.bf16 %v1023_v54, %v1024_v7  ;;  %v985_v11 = vsel %vm243_vm0, %v982_v61, %v984_v53 }
 0x324   :  { %3988 = vrot.lane.b32.xlu1 %v3987_v59, %s4323_s24  ;;  %v4012_v15 = vpack.i.bf16 %v984_v53, %v985_v11  ;;  %3983 = vrot.lane.b32.xlu0 %v3982_v57, %s4322_s0  ;;  %v1261_v11 = vld [vmem:[#allocation13 + $0x40] sm:$0xff] }
 0x325   :  { %3350 = vmatprep.mubr.msk.f32.mxu1 %vm1265_vm14, %v1261_v11 }
 0x328   :  { %3998 = vrot.lane.b32.xlu1 %v3997_v0, %s4322_s0  ;;  %3993 = vrot.lane.b32.xlu0 %v3992_v8, %s4313_s19 }
 0x32c   :  { %4008 = vrot.lane.b32.xlu1 %v4007_v10, %s4313_s19  ;;  %4003 = vrot.lane.b32.xlu0 %v4002_v9, %s4323_s24 }
 0x330   :  { %4018 = vrot.lane.b32.xlu1 %v4017_v60, %s4323_s24  ;;  %4013 = vrot.lane.b32.xlu0 %v4012_v15, %s4322_s0  ;;  %v1092_v15 = vld [vmem:[#allocation11 + $0x3] ss:$0 sm:$0xff] }
 0x38e   :  { %v3969_v18 = vpop.permute.xlu1 %3968  ;;  %v3964_v19 = vpop.permute.xlu0 %3963 }
 0x38f   :  { %v3966_v20 = vunpack.i.h.bf16 %v3964_v19  ;;  %v3965_v21 = vunpack.i.l.bf16 %v3964_v19  ;;  %v3971_v22 = vunpack.i.h.bf16 %v3969_v18  ;;  %v3970_v28 = vunpack.i.l.bf16 %v3969_v18 }
 0x391   :  { %v1051_v16 = vsel %vm1049_vm11, %v4872_v12, %v3966_v20  ;;  %v1050_v24 = vsel %vm1049_vm11, %v4877_v14, %v3965_v21  ;;  %v1093_v20 = vld [vmem:[#allocation11 + $0x4] ss:$0 sm:$0xff] }
 0x392   :  { %v3979_v13 = vpop.permute.xlu1 %3978  ;;  %v3974_v25 = vpop.permute.xlu0 %3973  ;;  %v1059_v29 = vsel %vm1058_vm12, %v1050_v24, %v3970_v28  ;;  %v1060_v35 = vsel %vm1058_vm12, %v1051_v16, %v3971_v22  ;;  %v1094_v22 = vld [vmem:[#allocation11 + $0x5] ss:$0 sm:$0xff] }
 0x393   :  { %v3976_v26 = vunpack.i.h.bf16 %v3974_v25  ;;  %v3975_v27 = vunpack.i.l.bf16 %v3974_v25  ;;  %v3981_v30 = vunpack.i.h.bf16 %v3979_v13  ;;  %v3980_v33 = vunpack.i.l.bf16 %v3979_v13 }
 0x395   :  { %v1068_v36 = vsel %vm1067_vm13, %v1059_v29, %v3975_v27  ;;  %v1069_v12 = vsel %vm1067_vm13, %v1060_v35, %v3976_v26  ;;  %v1052_v42 = vsel %vm1049_vm11, %v4888_v2, %v3980_v33  ;;  %v1053_v43 = vsel %vm1049_vm11, %v4882_v23, %v3981_v30 }
 0x396   :  { %v3989_v31 = vpop.permute.xlu1 %3988  ;;  %3324 = vmatprep.mubr.f32.mxu0 %v1068_v36  ;;  %v3984_v38 = vpop.permute.xlu0 %3983 }
 0x397   :  { %v3991_v39 = vunpack.i.h.bf16 %v3989_v31  ;;  %v3990_v14 = vunpack.i.l.bf16 %v3989_v31  ;;  %v3986_v41 = vunpack.i.h.bf16 %v3984_v38  ;;  %v3985_v44 = vunpack.i.l.bf16 %v3984_v38  ;;  %3325 = vmatmul.mubr.f32.vlgmr.msra.gmra.mrb[16].mxu0 %v1069_v12 }
 0x399   :  { %v1061_v48 = vsel %vm1058_vm12, %v1052_v42, %v3985_v44  ;;  %v1062_v37 = vsel %vm1058_vm12, %v1053_v43, %v3986_v41 }
 0x39a   :  { %v3999_v47 = vpop.permute.xlu1 %3998  ;;  %v3994_v17 = vpop.permute.xlu0 %3993  ;;  %v1070_v49 = vsel %vm1067_vm13, %v1061_v48, %v3990_v14  ;;  %v1071_v45 = vsel %vm1067_vm13, %v1062_v37, %v3991_v39 }
 0x39b   :  { %v3996_v51 = vunpack.i.h.bf16 %v3994_v17  ;;  %v3995_v32 = vunpack.i.l.bf16 %v3994_v17  ;;  %3327 = vmatprep.mubr.f32.mxu0 %v1070_v49  ;;  %v4001_v52 = vunpack.i.h.bf16 %v3999_v47  ;;  %v4000_v53 = vunpack.i.l.bf16 %v3999_v47 }
 0x39c   :  { %3328 = vmatmul.mubr.f32.gmra.mrb[18].mxu0 %v1071_v45 }
 0x39d   :  { %v1054_v23 = vsel %vm1049_vm11, %v4903_v40, %v3995_v32  ;;  %v1055_v54 = vsel %vm1049_vm11, %v4895_v34, %v3996_v51 }
 0x39e   :  { %v4009_v2 = vpop.permute.xlu1 %4008  ;;  %v4004_v56 = vpop.permute.xlu0 %4003  ;;  %v1063_v59 = vsel %vm1058_vm12, %v1054_v23, %v4000_v53  ;;  %v1064_v63 = vsel %vm1058_vm12, %v1055_v54, %v4001_v52 }
 0x39f   :  { %v4006_v57 = vunpack.i.h.bf16 %v4004_v56  ;;  %v4005_v58 = vunpack.i.l.bf16 %v4004_v56  ;;  %v4011_v61 = vunpack.i.h.bf16 %v4009_v2  ;;  %v4010_v62 = vunpack.i.l.bf16 %v4009_v2 }
 0x3a1   :  { %v1072_v3 = vsel %vm1067_vm13, %v1063_v59, %v4005_v58  ;;  %v1073_v4 = vsel %vm1067_vm13, %v1064_v63, %v4006_v57  ;;  %v1056_v0 = vsel %vm1049_vm11, %v4921_v55, %v4010_v62  ;;  %v1057_v8 = vsel %vm1049_vm11, %v4913_v50, %v4011_v61 }
 0x3a2   :  { %v4019_v46 = vpop.permute.xlu1 %4018  ;;  %v4014_v40 = vpop.permute.xlu0 %4013  ;;  %3330 = vmatprep.mubr.f32.mxu0 %v1072_v3 }
 0x3a3   :  { %v4021_v5 = vunpack.i.h.bf16 %v4019_v46  ;;  %v4020_v6 = vunpack.i.l.bf16 %v4019_v46  ;;  %v4016_v7 = vunpack.i.h.bf16 %v4014_v40  ;;  %v4015_v34 = vunpack.i.l.bf16 %v4014_v40  ;;  %3331 = vmatmul.mubr.f32.gmra.mrb[20].mxu0 %v1073_v4 }
 0x3a5   :  { %v1065_v1 = vsel %vm1058_vm12, %v1056_v0, %v4015_v34  ;;  %v1066_v9 = vsel %vm1058_vm12, %v1057_v8, %v4016_v7 }
 0x3a6   :  { %v1074_v10 = vsel %vm1067_vm13, %v1065_v1, %v4020_v6  ;;  %v1075_v60 = vsel %vm1067_vm13, %v1066_v9, %v4021_v5 }
 0x3a7   :  { %3333 = vmatprep.mubr.f32.mxu0 %v1074_v10 }
 0x3a8   :  { %3334 = vmatmul.mubr.f32.gmra.mrb[22].mxu0 %v1075_v60 }
 0x46a   :  { %v3326_v18 = vpop.f32.mrb[16].mxu0 }
 0x46b   :  { %v1167_v55 = vadd.f32 %v3326_v18, %v1092_v15  ;;  %v1161_v19 = vpop.f32.mrb[17].mxu0 }
 0x46c   :  { %v1162_v50 = vadd.f32 %v1161_v19, %v1092_v15 }
 0x46d   :  { %v1201_v21 = vmax.f32 %v1167_v55, 0.0 }
 0x46e   :  { %v1200_v28 = vmax.f32 %v1162_v50, 0.0  ;;  %v1263_v50 = vld [vmem:[#allocation13 + $0x50] sm:$0xff] }
 0x46f   :  { %v1209_v16 = vmul.f32 %v1201_v21, %v1093_v20  ;;  %v3329_v13 = vpop.f32.mrb[18].mxu0  ;;  %v1264_v21 = vld [vmem:[#allocation13 + $0x58] sm:$0x3] }
 0x470   :  { %v1208_v24 = vmul.f32 %v1200_v28, %v1093_v20  ;;  %v1177_v25 = vadd.f32 %v3329_v13, %v1092_v15  ;;  %v1171_v26 = vpop.f32.mrb[19].mxu0  ;;  %v1430_v28 = vld [vmem:[#allocation5 + $0x88] sm:$0xff] }
 0x471   :  { %v1217_v27 = vadd.f32 %v1209_v16, %v1094_v22  ;;  %v1172_v30 = vadd.f32 %v1171_v26, %v1092_v15  ;;  %v1413_v16 = vld [vmem:[#allocation5] sm:$0xff]  ;;  %v1432_v26 = vld [vmem:[#allocation5 + $0x98] sm:$0xff] }
 0x472   :  { %v1216_v33 = vadd.f32 %v1208_v24, %v1094_v22  ;;  %v1203_v29 = vmax.f32 %v1177_v25, 0.0  ;;  %v1414_v24 = vld [vmem:[#allocation5 + $0x8] sm:$0xff]  ;;  %v1431_v25 = vld [vmem:[#allocation5 + $0x90] sm:$0xff] }
 0x473   :  { %v1233_v35 = vrot.slane %v1217_v27, 1  ;;  %v1202_v36 = vmax.f32 %v1172_v30, 0.0  ;;  %v3517_v30 = vpack.c.bf16 %v1432_v26, %v1431_v25 }
 0x474   :  { %v1232_v31 = vrot.slane %v1216_v33, 1  ;;  %v1211_v12 = vmul.f32 %v1203_v29, %v1093_v20  ;;  %v1416_v29 = vld [vmem:[#allocation5 + $0x18] sm:$0xff] }
 0x475   :  { %v1210_v38 = vmul.f32 %v1202_v36, %v1093_v20  ;;  %v1434_v36 = vld [vmem:[#allocation5 + $0xa8] sm:$0xff] }
 0x476   :  { %v1219_v39 = vadd.f32 %v1211_v12, %v1094_v22  ;;  %v3332_v14 = vpop.f32.mrb[20].mxu0  ;;  %v1234_v41 = vsel %vm163_vm1, %v1232_v31, %v1233_v35 }
 0x477   :  { %v1218_v44 = vadd.f32 %v1210_v38, %v1094_v22  ;;  %v1187_v42 = vadd.f32 %v3332_v14, %v1092_v15  ;;  %v1181_v43 = vpop.f32.mrb[21].mxu0  ;;  %v1254_v47 = vmax.f32 %v1216_v33, %v1234_v41  ;;  %v1415_v33 = vld [vmem:[#allocation5 + $0x10] sm:$0xff]  ;;  %v1417_v38 = vld [vmem:[#allocation5 + $0x20] sm:$0xff]  ;;  %v1436_v41 = vld [vmem:[#allocation5 + $0xb8] sm:$0xff] }
 0x478   :  { %v1237_v48 = vrot.slane %v1219_v39, 1  ;;  %v1182_v37 = vadd.f32 %v1181_v43, %v1092_v15  ;;  %v3519_v31 = vpack.c.bf16 %v1416_v29, %v1415_v33  ;;  %v1435_v14 = vld [vmem:[#allocation5 + $0xb0] sm:$0xff] }
 0x479   :  { %v1235_v17 = vrot.slane %v1218_v44, 1  ;;  %v1205_v49 = vmax.f32 %v1187_v42, 0.0  ;;  %v3525_v42 = vpack.c.bf16 %v1436_v41, %v1435_v14  ;;  %v1419_v43 = vld [vmem:[#allocation5 + $0x30] sm:$0xff] }
 0x47a   :  { %v1204_v45 = vmax.f32 %v1182_v37, 0.0  ;;  %v1438_v37 = vld [vmem:[#allocation5 + $0xc8] sm:$0xff] }
 0x47b   :  { %v1213_v51 = vmul.f32 %v1205_v49, %v1093_v20  ;;  %v3335_v32 = vpop.f32.mrb[22].mxu0  ;;  %v1236_v52 = vsel %vm163_vm1, %v1233_v35, %v1235_v17  ;;  %v1238_v53 = vsel %vm163_vm1, %v1235_v17, %v1237_v48  ;;  %v1433_v35 = vld [vmem:[#allocation5 + $0xa0] sm:$0xff] }
 0x47c   :  { %v1212_v2 = vmul.f32 %v1204_v45, %v1093_v20  ;;  %v1197_v23 = vadd.f32 %v3335_v32, %v1092_v15  ;;  %v1191_v54 = vpop.f32.mrb[23].mxu0  ;;  %v1255_v56 = vmax.f32 %v1217_v27, %v1236_v52  ;;  %v1256_v57 = vmax.f32 %v1218_v44, %v1238_v53  ;;  %v1421_v45 = vld [vmem:[#allocation5 + $0x40] sm:$0xff]  ;;  %v1439_v32 = vld [vmem:[#allocation5 + $0xd0] sm:$0xff]  ;;  %v1440_v52 = vld [vmem:[#allocation5 + $0xd8] sm:$0xff] }
 0x47d   :  { %v1221_v58 = vadd.f32 %v1213_v51, %v1094_v22  ;;  %v1192_v61 = vadd.f32 %v1191_v54, %v1092_v15  ;;  %v3515_v27 = vpack.c.bf16 %v1414_v24, %v1413_v16  ;;  %v3521_v12 = vpack.c.bf16 %v1434_v36, %v1433_v35  ;;  %v1422_v51 = vld [vmem:[#allocation5 + $0x48] sm:$0xff]  ;;  %v1424_v54 = vld [vmem:[#allocation5 + $0x58] sm:$0xff] }
 0x47e   :  { %v1220_v62 = vadd.f32 %v1212_v2, %v1094_v22  ;;  %v1207_v59 = vmax.f32 %v1197_v23, 0.0  ;;  %v3501_v63 = vpack.c.bf16 %v1255_v56, %v1254_v47  ;;  %v1420_v47 = vld [vmem:[#allocation5 + $0x38] sm:$0xff]  ;;  %v3531_v53 = vpack.c.bf16 %v1422_v51, %v1421_v45  ;;  %v1423_v23 = vld [vmem:[#allocation5 + $0x50] sm:$0xff]  ;;  %v1441_v56 = vld [vmem:[#allocation5 + $0xe0] sm:$0xff] }
 0x47f   :  { %v1241_v46 = vrot.slane %v1221_v58, 1  ;;  %v1206_v3 = vmax.f32 %v1192_v61, 0.0  ;;  %v3527_v17 = vpack.c.bf16 %v1420_v47, %v1419_v43  ;;  %v3533_v2 = vpack.c.bf16 %v1440_v52, %v1439_v32  ;;  %v1842_v45 = vld [vmem:[#allocation8 + $0x28] sm:$0xff]  ;;  %v1837_v51 = vld [vmem:[#allocation8] sm:$0xff] }
 0x480   :  { %v1239_v4 = vrot.slane %v1220_v62, 1  ;;  %v1215_v5 = vmul.f32 %v1207_v59, %v1093_v20  ;;  %3502 = vmatprep.subr.bf16.mxu1 %v3501_v63  ;;  %v1426_v59 = vld [vmem:[#allocation5 + $0x68] sm:$0xff]  ;;  %v1841_v52 = vld [vmem:[#allocation8 + $0x20] sm:$0xff] }
 0x481   :  { %v1214_v6 = vmul.f32 %v1206_v3, %v1093_v20  ;;  %3504 = vmatpush3.bf16.msra.mxu1 %v3501_v63  ;;  %v1262_v20 = vld [vmem:[#allocation13 + $0x48] sm:$0xff]  ;;  %v1444_v3 = vld [vmem:[#allocation5 + $0xf8] sm:$0xff] }
 0x482   :  { %v1223_v40 = vadd.f32 %v1215_v5, %v1094_v22  ;;  %v1240_v7 = vsel %vm163_vm1, %v1237_v48, %v1239_v4  ;;  %v1242_v34 = vsel %vm163_vm1, %v1239_v4, %v1241_v46  ;;  %v1437_v48 = vld [vmem:[#allocation5 + $0xc0] sm:$0xff]  ;;  %v1427_v5 = vld [vmem:[#allocation5 + $0x70] sm:$0xff] }
 0x483   :  { %v1222_v0 = vadd.f32 %v1214_v6, %v1094_v22  ;;  %v1257_v8 = vmax.f32 %v1219_v39, %v1240_v7  ;;  %v1258_v1 = vmax.f32 %v1220_v62, %v1242_v34  ;;  %v1429_v22 = vld [vmem:[#allocation5 + $0x80] sm:$0xff]  ;;  %v1418_v39 = vld [vmem:[#allocation5 + $0x28] sm:$0xff]  ;;  %v3529_v49 = vpack.c.bf16 %v1438_v37, %v1437_v48  ;;  %v1428_v6 = vld [vmem:[#allocation5 + $0x78] sm:$0xff] }
 0x484   :  { %v1245_v9 = vrot.slane %v1223_v40, 1  ;;  %v3513_v13 = vpack.c.bf16 %v1430_v28, %v1429_v22  ;;  %v3523_v44 = vpack.c.bf16 %v1418_v39, %v1417_v38  ;;  %v1425_v62 = vld [vmem:[#allocation5 + $0x60] sm:$0xff]  ;;  %v3543_v40 = vpack.c.bf16 %v1428_v6, %v1427_v5 }
 0x485   :  { %v1243_v10 = vrot.slane %v1222_v0, 1  ;;  %v3505_v60 = vpack.c.bf16 %v1257_v8, %v1256_v57  ;;  %v1442_v57 = vld [vmem:[#allocation5 + $0xe8] sm:$0xff]  ;;  %v3539_v63 = vpack.c.bf16 %v1426_v59, %v1425_v62 }
 0x486   :  { %3514 = vmatprep.subr.bf16.mxu0 %v3513_v13  ;;  %v3537_v61 = vpack.c.bf16 %v1442_v57, %v1441_v56  ;;  %v1845_v56 = vld [vmem:[#allocation8 + $0x40] sm:$0xff] }
 0x487   :  { %3506 = vmatprep.subr.bf16.mxu1 %v3505_v60  ;;  %v1244_v11 = vsel %vm163_vm1, %v1241_v46, %v1243_v10  ;;  %v1246_v15 = vsel %vm163_vm1, %v1243_v10, %v1245_v9  ;;  %3516 = vmatpush3.bf16.msra.mxu0 %v3515_v27  ;;  %v1443_v46 = vld [vmem:[#allocation5 + $0xf0] sm:$0xff]  ;;  %v1849_v57 = vld [vmem:[#allocation8 + $0x60] sm:$0xff] }
 0x488   :  { %3508 = vmatpush3.bf16.msra.mxu1 %v3505_v60  ;;  %v1259_v18 = vmax.f32 %v1221_v58, %v1244_v11  ;;  %v1260_v55 = vmax.f32 %v1222_v0, %v1246_v15  ;;  %3518 = vmatprep.subr.bf16.mxu0 %v3517_v30  ;;  %v3535_v58 = vpack.c.bf16 %v1424_v54, %v1423_v23 }
 0x489   :  { %v3541_v4 = vpack.c.bf16 %v1444_v3, %v1443_v46  ;;  %v5004_v23 = vpack.c.bf16 %v1841_v52, %v1837_v51  ;;  %v5010_v62 = vpack.c.bf16 %v1849_v57, %v1845_v56  ;;  %v1857_v46 = vld [vmem:[#allocation8 + $0xa0] sm:$0xff]  ;;  %v1862_v3 = vld [vmem:[#allocation8 + $0xc8] sm:$0xff] }
 0x48a   :  { %v3509_v19 = vpack.c.bf16 %v1259_v18, %v1258_v1 }
 0x48b   :  { %3520 = vmatpush3.bf16.msra.mxu0 %v3519_v31 }
 0x48c   :  { %3510 = vmatprep.subr.bf16.mxu1 %v3509_v19  ;;  %3522 = vmatprep.subr.bf16.mxu0 %v3521_v12 }
 0x48d   :  { %3512 = vmatpush3.bf16.msra.mxu1 %v3509_v19 }
 0x48e   :  { %3348 = vmatprep.subr.mxu1 %v1260_v55 }
 0x48f   :  { %3524 = vmatpush3.bf16.msra.mxu0 %v3523_v44 }
 0x490   :  { %3526 = vmatprep.subr.bf16.mxu0 %v3525_v42 }
 0x491   :  { %3349 = vmatpush3.msra.mxu1 %v1260_v55 }
 0x492   :  { %3351 = vmatmul.mubr.msk.f32.vlgmr.msra.gmra.mrb[8].mxu1 %vm1265_vm14, %v1262_v20 }
 0x493   :  { %3353 = vmatprep.mubr.msk.f32.mxu1 %vm1265_vm14, %v1263_v50  ;;  %3528 = vmatpush3.bf16.msra.mxu0 %v3527_v17  ;;  %v1551_v17 = vld [vmem:[#allocation13 + $0x60] sm:$0xff] }
 0x494   :  { %3530 = vmatprep.subr.bf16.mxu0 %v3529_v49  ;;  %v1838_v49 = vld [vmem:[#allocation8 + $0x8] sm:$0xff] }
 0x495   :  { %v5002_v32 = vpack.c.bf16 %v1842_v45, %v1838_v49 }
 0x496   :  { %3354 = vmatmul.mubr.msk.f32.gmra.mrb[10].mxu1 %vm1265_vm14, %v1264_v21 }
 0x497   :  { %3532 = vmatpush3.bf16.msra.mxu0 %v3531_v53  ;;  %3362 = vmatprep.mubr.msk.f32.mxu1 %vm1553_vm15, %v1551_v17  ;;  %v1846_v53 = vld [vmem:[#allocation8 + $0x48] sm:$0xff] }
 0x498   :  { %3534 = vmatprep.subr.bf16.mxu0 %v3533_v2  ;;  %v1850_v2 = vld [vmem:[#allocation8 + $0x68] sm:$0xff] }
 0x499   :  { %v5006_v54 = vpack.c.bf16 %v1850_v2, %v1846_v53 }
 0x49b   :  { %3536 = vmatpush3.bf16.msra.mxu0 %v3535_v58  ;;  %v1854_v58 = vld [vmem:[#allocation8 + $0x88] sm:$0xff] }
 0x49c   :  { %3538 = vmatprep.subr.bf16.mxu0 %v3537_v61  ;;  %v1858_v61 = vld [vmem:[#allocation8 + $0xa8] sm:$0xff] }
 0x49d   :  { %v5013_v59 = vpack.c.bf16 %v1858_v61, %v1854_v58 }
 0x49f   :  { %3540 = vmatpush3.bf16.msra.mxu0 %v3539_v63  ;;  %v1853_v63 = vld [vmem:[#allocation8 + $0x80] sm:$0xff] }
 0x4a0   :  { %3542 = vmatprep.subr.bf16.mxu0 %v3541_v4  ;;  %v1866_v4 = vld [vmem:[#allocation8 + $0xe8] sm:$0xff]  ;;  %v5016_v5 = vpack.c.bf16 %v1857_v46, %v1853_v63 }
 0x4a1   :  { %v5019_v6 = vpack.c.bf16 %v1866_v4, %v1862_v3  ;;  %v1639_v63 = vld [vmem:[#allocation7 + $0x8] sm:$0xff]  ;;  %v1638_v4 = vld [vmem:[#allocation7] sm:$0xff] }
 0x4a2   :  { %v1643_v46 = vld [vmem:[#allocation7 + $0x28] sm:$0xff] }
 0x4a3   :  { %3544 = vmatpush3.bf16.msra.mxu0 %v3543_v40  ;;  %v1861_v40 = vld [vmem:[#allocation8 + $0xc0] sm:$0xff] }
 0x4a4   :  { %3566 = vmatprep.subr.bf16.mxu0 %v5002_v32 }
 0x565   :  { %v3352_v7 = vpop.f32.mrb[8].mxu1 }
 0x566   :  { %v1367_v34 = vrot.slane %v3352_v7, 1  ;;  %v1382_v0 = vrot.slane %v3352_v7, 2  ;;  %v1392_v8 = vrot.slane %v3352_v7, 3  ;;  %v1344_v1 = vpop.f32.mrb[9].mxu1 }
 0x567   :  { %v1366_v9 = vrot.slane %v1344_v1, 1  ;;  %v1381_v10 = vrot.slane %v1344_v1, 2  ;;  %v1391_v60 = vrot.slane %v1344_v1, 3 }
 0x569   :  { %v3355_v11 = vpop.f32.mrb[10].mxu1  ;;  %v1368_v15 = vsel %vm163_vm1, %v1366_v9, %v1367_v34  ;;  %v1393_v18 = vsel %vm323_vm3, %v1391_v60, %v1392_v8  ;;  %v1383_v55 = vsel %vm243_vm0, %v1381_v10, %v1382_v0  ;;  %v1869_v9 = vld [vmem:[#allocation8 + $0x100] sm:$0xff]  ;;  %v1878_v60 = vld [vmem:[#allocation8 + $0x148] sm:$0xff] }
 0x56a   :  { %v1386_v19 = vrot.slane %v3355_v11, 2  ;;  %v1396_v20 = vrot.slane %v3355_v11, 3  ;;  %v1354_v50 = vpop.f32.mrb[11].mxu1  ;;  %v4022_v21 = vpack.i.bf16 %v1368_v15, %v1393_v18  ;;  %v1873_v10 = vld [vmem:[#allocation8 + $0x120] sm:$0xff]  ;;  %v1882_v11 = vld [vmem:[#allocation8 + $0x168] sm:$0xff] }
 0x56b   :  { %v1369_v22 = vrot.slane %v1354_v50, 1  ;;  %v1384_v28 = vrot.slane %v1354_v50, 2  ;;  %v1394_v16 = vrot.slane %v1354_v50, 3  ;;  %v5028_v15 = vpack.c.bf16 %v1873_v10, %v1869_v9  ;;  %v1552_v9 = vld [vmem:[#allocation13 + $0x68] sm:$0x3] }
 0x56c   :  { %4023 = vrot.lane.b32.xlu0 %v4022_v21, %s4322_s0  ;;  %v5031_v18 = vpack.c.bf16 %v1882_v11, %v1878_v60  ;;  %v1646_v11 = vld [vmem:[#allocation7 + $0x40] sm:$0xff] }
 0x56d   :  { %v1397_v13 = vsel %vm323_vm3, %v1394_v16, %v1396_v20  ;;  %v1370_v24 = vsel %vm163_vm1, %v1367_v34, %v1369_v22  ;;  %v1395_v25 = vsel %vm323_vm3, %v1392_v8, %v1394_v16  ;;  %v1385_v26 = vsel %vm243_vm0, %v1382_v0, %v1384_v28  ;;  %v1870_v34 = vld [vmem:[#allocation8 + $0x108] sm:$0xff]  ;;  %v1889_v16 = vld [vmem:[#allocation8 + $0x1a0] sm:$0xff] }
 0x56e   :  { %v4032_v27 = vpack.i.bf16 %v1369_v22, %v1397_v13  ;;  %v4027_v30 = vpack.i.bf16 %v1370_v24, %v1395_v25  ;;  %v1387_v33 = vsel %vm243_vm0, %v1384_v28, %v1386_v19  ;;  %v1874_v0 = vld [vmem:[#allocation8 + $0x128] sm:$0xff]  ;;  %v1881_v19 = vld [vmem:[#allocation8 + $0x160] sm:$0xff] }
 0x56f   :  { %v1886_v20 = vld [vmem:[#allocation8 + $0x188] sm:$0xff]  ;;  %v1885_v28 = vld [vmem:[#allocation8 + $0x180] sm:$0xff] }
 0x570   :  { %4033 = vrot.lane.b32.xlu0 %v4032_v27, %s4322_s0  ;;  %4028 = vrot.lane.b32.xlu1 %v4027_v30, %s4322_s0  ;;  %v5040_v13 = vpack.c.bf16 %v1889_v16, %v1885_v28  ;;  %v1445_v25 = vld [vmem:[#allocation11 + $0x6] ss:$0 sm:$0xff]  ;;  %v1641_v28 = vld [vmem:[#allocation7 + $0x18] sm:$0xff] }
 0x571   :  { %v1645_v16 = vld [vmem:[#allocation7 + $0x38] sm:$0xff] }
 0x5de   :  { %v4024_v29 = vpop.permute.xlu0 %4023 }
 0x5df   :  { %v4026_v35 = vunpack.i.h.bf16 %v4024_v29  ;;  %v4025_v36 = vunpack.i.l.bf16 %v4024_v29  ;;  %v1446_v29 = vld [vmem:[#allocation11 + $0x7] ss:$0 sm:$0xff] }
 0x5e1   :  { %v1410_v31 = vsel %vm1058_vm12, %v1383_v55, %v4025_v36  ;;  %v1407_v12 = vsel %vm1058_vm12, %v1344_v1, %v4026_v35  ;;  %v5025_v1 = vpack.c.bf16 %v1874_v0, %v1870_v34  ;;  %v1877_v55 = vld [vmem:[#allocation8 + $0x140] sm:$0xff]  ;;  %v1651_v34 = vld [vmem:[#allocation7 + $0x68] sm:$0xff]  ;;  %v3549_v0 = vpack.c.bf16 %v1643_v46, %v1639_v63  ;;  %v1855_v63 = vld [vmem:[#allocation8 + $0x90] sm:$0xff] }
 0x5e2   :  { %1512 = vmatprep.mubr.f32.mxu0 %v1410_v31  ;;  %v4034_v38 = vpop.permute.xlu0 %4033  ;;  %v4029_v39 = vpop.permute.xlu1 %4028  ;;  %v5034_v21 = vpack.c.bf16 %v1881_v19, %v1877_v55  ;;  %v1650_v55 = vld [vmem:[#allocation7 + $0x60] sm:$0xff]  ;;  %v1859_v46 = vld [vmem:[#allocation8 + $0xb0] sm:$0xff] }
 0x5e3   :  { %v4035_v14 = vunpack.i.l.bf16 %v4034_v38  ;;  %v4031_v41 = vunpack.i.h.bf16 %v4029_v39  ;;  %v4030_v44 = vunpack.i.l.bf16 %v4029_v39  ;;  %1513 = vmatmul.mubr.f32.vlgmr.msra.gmra.mrb[24].mxu0 %v1407_v12  ;;  %v4036_v47 = vunpack.i.h.bf16 %v4034_v38 }
 0x5e4   :  { %3568 = vmatpush1.bf16.msra.mxu0 %v5004_v23  ;;  %v3555_v19 = vpack.c.bf16 %v1650_v55, %v1646_v11  ;;  %v1871_v55 = vld [vmem:[#allocation8 + $0x110] sm:$0xff] }
 0x5e5   :  { %v1411_v42 = vsel %vm1058_vm12, %v1385_v26, %v4030_v44  ;;  %v1408_v43 = vsel %vm1058_vm12, %v3352_v7, %v4031_v41  ;;  %v1412_v48 = vsel %vm1058_vm12, %v1387_v33, %v4035_v14  ;;  %v1409_v37 = vsel %vm1058_vm12, %v1354_v50, %v4036_v47  ;;  %3570 = vmatprep.subr.bf16.mxu0 %v5006_v54  ;;  %v1865_v7 = vld [vmem:[#allocation8 + $0xe0] sm:$0xff]  ;;  %v1890_v50 = vld [vmem:[#allocation8 + $0x1a8] sm:$0xff] }
 0x5e6   :  { %1517 = vmatprep.mubr.f32.mxu0 %v1411_v42  ;;  %v5022_v8 = vpack.c.bf16 %v1865_v7, %v1861_v40  ;;  %v5037_v22 = vpack.c.bf16 %v1890_v50, %v1886_v20  ;;  %v1447_v14 = vld [vmem:[#allocation11 + $0x20] ss:$0 sm:$0xff]  ;;  %v1647_v7 = vld [vmem:[#allocation7 + $0x48] sm:$0xff] }
 0x5e7   :  { %1518 = vmatmul.mubr.f32.gmra.mrb[26].mxu0 %v1408_v43  ;;  %v1642_v40 = vld [vmem:[#allocation7 + $0x20] sm:$0xff]  ;;  %v3553_v60 = vpack.c.bf16 %v1651_v34, %v1647_v7  ;;  %v1894_v20 = vld [vmem:[#allocation8 + $0x1c8] sm:$0xff]  ;;  %v1863_v34 = vld [vmem:[#allocation8 + $0xd0] sm:$0xff] }
 0x5e8   :  { %1522 = vmatprep.mubr.f32.mxu0 %v1412_v48  ;;  %3572 = vmatpush1.bf16.msra.mxu0 %v5010_v62  ;;  %v3551_v10 = vpack.c.bf16 %v1642_v40, %v1638_v4  ;;  %v1898_v50 = vld [vmem:[#allocation8 + $0x1e8] sm:$0xff]  ;;  %v1868_v4 = vld [vmem:[#allocation8 + $0xf8] sm:$0xff]  ;;  %v5097_v40 = vpack.c.bf16 %v1859_v46, %v1855_v63 }
 0x5e9   :  { %3574 = vmatprep.subr.bf16.mxu0 %v5013_v59 }
 0x5eb   :  { %1523 = vmatmul.mubr.f32.gmra.mrb[28].mxu0 %v1409_v37 }
 0x5ec   :  { %3576 = vmatpush1.bf16.msra.mxu0 %v5016_v5 }
 0x5ed   :  { %3578 = vmatprep.subr.bf16.mxu0 %v5019_v6 }
 0x5f0   :  { %3580 = vmatpush1.bf16.msra.mxu0 %v5022_v8 }
 0x5f1   :  { %3582 = vmatprep.subr.bf16.mxu0 %v5025_v1 }
 0x5f4   :  { %3584 = vmatpush1.bf16.msra.mxu0 %v5028_v15 }
 0x5f5   :  { %3586 = vmatprep.subr.bf16.mxu0 %v5031_v18 }
 0x5f8   :  { %3588 = vmatpush1.bf16.msra.mxu0 %v5034_v21 }
 0x5f9   :  { %3590 = vmatprep.subr.bf16.mxu0 %v5037_v22 }
 0x5fc   :  { %3592 = vmatpush1.bf16.msra.mxu0 %v5040_v13 }
 0x6b6   :  { %v3174_v24 = vpop.f32.mrb[24].mxu0 }
 0x6b7   :  { %v3175_v26 = vpop.f32.mrb[25].mxu0 }
 0x6b8   :  { %v3176_v27 = vadd.f32 %v3175_v26, %v3174_v24  ;;  %v5049_v24 = vpack.c.bf16 %v1898_v50, %v1894_v20  ;;  %v3557_v26 = vpack.c.bf16 %v1645_v16, %v1641_v28  ;;  %v1880_v20 = vld [vmem:[#allocation8 + $0x158] sm:$0xff] }
 0x6b9   :  { %v1884_v50 = vld [vmem:[#allocation8 + $0x178] sm:$0xff] }
 0x6ba   :  { %v1515_v30 = vadd.f32 %v3176_v27, %v1445_v25  ;;  %v3177_v33 = vpop.f32.mrb[26].mxu0  ;;  %v1897_v27 = vld [vmem:[#allocation8 + $0x1e0] sm:$0xff]  ;;  %3594 = vmatprep.subr.bf16.mxu0 %v5049_v24  ;;  %v5113_v16 = vpack.c.bf16 %v1884_v50, %v1880_v20 }
 0x6bb   :  { %v3178_v35 = vpop.f32.mrb[27].mxu0 }
 0x6bc   :  { %v1528_v36 = vmax.f32 %v1515_v30, 0.0  ;;  %v3179_v31 = vadd.f32 %v3178_v35, %v3177_v33  ;;  %v4324_v30 = vmov 0.0   ;;  %v1644_v35 = vld [vmem:[#allocation7 + $0x30] sm:$0xff] }
 0x6bd   :  { %1965 = vmatprep.mubr.f32.mxu0 %v4324_v30 }
 0x6be   :  { %v1531_v12 = vmul.f32 %v1528_v36, %v1446_v29  ;;  %v1520_v38 = vadd.f32 %v3179_v31, %v1445_v25  ;;  %v3180_v39 = vpop.f32.mrb[28].mxu0  ;;  %v1649_v36 = vld [vmem:[#allocation7 + $0x58] sm:$0xff] }
 0x6bf   :  { %v3181_v41 = vpop.f32.mrb[29].mxu0  ;;  %v1653_v31 = vld [vmem:[#allocation7 + $0x78] sm:$0xff] }
 0x6c0   :  { %v1529_v44 = vmax.f32 %v1520_v38, 0.0  ;;  %v3182_v42 = vadd.f32 %v3181_v41, %v3180_v39  ;;  %v1534_v43 = vadd.f32 %v1531_v12, %v1447_v14  ;;  %v3561_v39 = vpack.c.bf16 %v1653_v31, %v1649_v36  ;;  %v1652_v41 = vld [vmem:[#allocation7 + $0x70] sm:$0xff] }
 0x6c1   :  { %v1887_v31 = vld [vmem:[#allocation8 + $0x190] sm:$0xff] }
 0x6c2   :  { %v1532_v47 = vmul.f32 %v1529_v44, %v1446_v29  ;;  %v1525_v48 = vadd.f32 %v3182_v42, %v1445_v25  ;;  %v1540_v49 = vrot.slane %v1534_v43, 1  ;;  %v1893_v25 = vld [vmem:[#allocation8 + $0x1c0] sm:$0xff]  ;;  %v1840_v42 = vld [vmem:[#allocation8 + $0x18] sm:$0xff] }
 0x6c3   :  { %v5053_v33 = vpack.c.bf16 %v1897_v27, %v1893_v25  ;;  %v1879_v25 = vld [vmem:[#allocation8 + $0x150] sm:$0xff]  ;;  %v1888_v27 = vld [vmem:[#allocation8 + $0x198] sm:$0xff] }
 0x6c4   :  { %v1535_v37 = vadd.f32 %v1532_v47, %v1447_v14  ;;  %v1530_v17 = vmax.f32 %v1525_v48, 0.0 }
 0x6c5   :  { %3596 = vmatpush1.bf16.msra.mxu0 %v5053_v33 }
 0x6c6   :  { %v1541_v45 = vrot.slane %v1535_v37, 1  ;;  %v1533_v51 = vmul.f32 %v1530_v17, %v1446_v29  ;;  %3630 = vmatprep.subr.bf16.mxu0 %v5002_v32  ;;  %v1640_v29 = vld [vmem:[#allocation7 + $0x10] sm:$0xff] }
 0x6c7   :  { %v3559_v12 = vpack.c.bf16 %v1644_v35, %v1640_v29  ;;  %v1843_v17 = vld [vmem:[#allocation8 + $0x30] sm:$0xff]  ;;  %v1892_v29 = vld [vmem:[#allocation8 + $0x1b8] sm:$0xff] }
 0x6c8   :  { %v1536_v52 = vadd.f32 %v1533_v51, %v1447_v14  ;;  %v1542_v53 = vsel %vm163_vm1, %v1540_v49, %v1541_v45  ;;  %1966 = vmatmul.mubr.f32.vlgmr.msra.gmra.mrb[30].mxu0 %v4324_v30  ;;  %v1648_v14 = vld [vmem:[#allocation7 + $0x50] sm:$0xff]  ;;  %v1848_v49 = vld [vmem:[#allocation8 + $0x58] sm:$0xff]  ;;  %v5119_v36 = vpack.c.bf16 %v1892_v29, %v1888_v27 }
 0x6c9   :  { %v1548_v2 = vmax.f32 %v1534_v43, %v1542_v53  ;;  %3632 = vmatpush1.bf16.msra.mxu0 %v5004_v23  ;;  %2135 = vmatprep.mubr.f32.mxu0 %v4324_v30  ;;  %v1844_v43 = vld [vmem:[#allocation8 + $0x38] sm:$0xff]  ;;  %v3563_v47 = vpack.c.bf16 %v1652_v41, %v1648_v14  ;;  %v1847_v53 = vld [vmem:[#allocation8 + $0x50] sm:$0xff] }
 0x6ca   :  { %v1543_v56 = vrot.slane %v1536_v52, 1  ;;  %3634 = vmatprep.subr.bf16.mxu0 %v5006_v54  ;;  %v5078_v48 = vpack.c.bf16 %v1844_v43, %v1840_v42  ;;  %v1899_v42 = vld [vmem:[#allocation8 + $0x1f0] sm:$0xff] }
 0x6cc   :  { %v1544_v57 = vsel %vm163_vm1, %v1541_v45, %v1543_v56  ;;  %v1550_v3 = vmax.f32 %v1536_v52, %v1543_v56  ;;  %v1852_v45 = vld [vmem:[#allocation8 + $0x78] sm:$0xff]  ;;  %vm2983_vm1 = vcmask 33792  }
 0x6cd   :  { %v1549_v58 = vmax.f32 %v1535_v37, %v1544_v57  ;;  %3636 = vmatpush1.bf16.msra.mxu0 %v5010_v62  ;;  %v1839_v37 = vld [vmem:[#allocation8 + $0x10] sm:$0xff]  ;;  %v5085_v52 = vpack.c.bf16 %v1852_v45, %v1848_v49  ;;  %v1856_v56 = vld [vmem:[#allocation8 + $0x98] sm:$0xff] }
 0x6ce   :  { %3638 = vmatprep.subr.bf16.mxu0 %v5013_v59  ;;  %v5082_v51 = vpack.c.bf16 %v1843_v17, %v1839_v37  ;;  %v1860_v57 = vld [vmem:[#allocation8 + $0xb8] sm:$0xff]  ;;  %v1657_v17 = vlaneseq }
 0x6cf   :  { %v3545_v61 = vpack.c.bf16 %v1549_v58, %v1548_v2  ;;  %v1851_v2 = vld [vmem:[#allocation8 + $0x70] sm:$0xff] }
 0x6d0   :  { %v5090_v58 = vpack.c.bf16 %v1851_v2, %v1847_v53  ;;  %v1658_v49 = vshrl.u32 %v1657_v17, 7 }
 0x6d1   :  { %3546 = vmatprep.subr.bf16.mxu1 %v3545_v61  ;;  %3640 = vmatpush1.bf16.msra.mxu0 %v5016_v5 }
 0x6d2   :  { %3548 = vmatpush3.bf16.msra.mxu1 %v3545_v61  ;;  %3642 = vmatprep.subr.bf16.mxu0 %v5019_v6  ;;  %v5093_v61 = vpack.c.bf16 %v1860_v57, %v1856_v56  ;;  %v1663_v2 = vsub.s32 1, %v1658_v49  ;;  %v1655_v56 = vld [vmem:[#allocation11 + $0x21] ss:$8 sm:$0xf]  ;;  %v1659_v57 = vsub.s32 0, %v1658_v49  ;;  %v1667_v20 = vsub.s32 2, %v1658_v49 }
 0x6d3   :  { %3360 = vmatprep.subr.msk.mxu1 %vm243_vm0, %v1550_v3  ;;  %v1671_v50 = vsub.s32 3, %v1658_v49 }
 0x6d4   :  { %v5151_v63 = vrot.slane %v1655_v56, %v1663_v2  ;;  %v5163_v27 = vrot.slane %v1655_v56, %v1667_v20 }
 0x6d5   :  { %3644 = vmatpush1.bf16.msra.mxu0 %v5022_v8  ;;  %v5165_v29 = vrot.slane %v1655_v56, %v1671_v50 }
 0x6d6   :  { %3361 = vmatpush3.msk.msra.mxu1 %vm243_vm0, %v1550_v3  ;;  %3646 = vmatprep.subr.bf16.mxu0 %v5025_v1  ;;  %v1864_v3 = vld [vmem:[#allocation8 + $0xd8] sm:$0xff]  ;;  %vm4326_vm0 = vmmov 0  }
 0x6d7   :  { %3363 = vmatmul.mubr.msk.f32.vlgmr.msra.gmra.mrb[12].mxu1 %vm1553_vm15, %v1552_v9  ;;  %3550 = vmatprep.subr.bf16.mxu1 %v3549_v0  ;;  %v5101_v7 = vpack.c.bf16 %v1868_v4, %v1864_v3  ;;  %v1867_v0 = vld [vmem:[#allocation8 + $0xf0] sm:$0xff]  ;;  %v1872_v9 = vld [vmem:[#allocation8 + $0x118] sm:$0xff]  ;;  %v5153_v3 = vrot.slane %v1655_v56, %v1659_v57 }
 0x6d8   :  { %3552 = vmatpush1.bf16.msra.mxu1 %v3551_v10  ;;  %1747 = vmatprep.mubr.f32.mxu1 %v4324_v30  ;;  %v1876_v10 = vld [vmem:[#allocation8 + $0x138] sm:$0xff] }
 0x6d9   :  { %3554 = vmatprep.subr.bf16.mxu1 %v3553_v60  ;;  %3648 = vmatpush1.bf16.msra.mxu0 %v5028_v15  ;;  %v5104_v60 = vpack.c.bf16 %v1867_v0, %v1863_v34  ;;  %v5107_v11 = vpack.c.bf16 %v1876_v10, %v1872_v9 }
 0x6da   :  { %3650 = vmatprep.subr.bf16.mxu0 %v5031_v18 }
 0x6dc   :  { %3556 = vmatpush1.bf16.msra.mxu1 %v3555_v19  ;;  %v1875_v19 = vld [vmem:[#allocation8 + $0x130] sm:$0xff] }
 0x6dd   :  { %3558 = vmatprep.subr.bf16.mxu1 %v3557_v26  ;;  %3652 = vmatpush1.bf16.msra.mxu0 %v5034_v21  ;;  %v5110_v28 = vpack.c.bf16 %v1875_v19, %v1871_v55  ;;  %v1883_v26 = vld [vmem:[#allocation8 + $0x170] sm:$0xff] }
 0x6de   :  { %3654 = vmatprep.subr.bf16.mxu0 %v5037_v22  ;;  %v5116_v35 = vpack.c.bf16 %v1883_v26, %v1879_v25 }
 0x6e1   :  { %3656 = vmatpush1.bf16.msra.mxu0 %v5040_v13 }
 0x6e2   :  { %3658 = vmatprep.subr.bf16.mxu0 %v5049_v24 }
 0x6e5   :  { %3660 = vmatpush1.bf16.msra.mxu0 %v5053_v33 }
 0x6e6   :  { %3694 = vmatprep.subr.bf16.mxu0 %v5002_v32 }
 0x7aa   :  { %v3364_v38 = vpop.f32.mrb[12].mxu1 }
 0x7ab   :  { %v1629_v44 = vpop.f32.mrb[13].mxu1 }
 0x7ac   :  { %3047 = vmatmul.mubr.msk.f32.vlgmr.msra.gmra.mrb[14].mxu1 %vm1049_vm11, %v1629_v44 }
 0x7ad   :  { %3560 = vmatpush1.bf16.msra.mxu1 %v3559_v12  ;;  %1753 = vmatprep.mubr.f32.mxu1 %v4324_v30  ;;  %v1891_v12 = vld [vmem:[#allocation8 + $0x1b0] sm:$0xff] }
 0x7ae   :  { %3562 = vmatprep.subr.bf16.mxu1 %v3561_v39  ;;  %v1900_v39 = vld [vmem:[#allocation8 + $0x1f8] sm:$0xff]  ;;  %v5122_v14 = vpack.c.bf16 %v1891_v12, %v1887_v31 }
 0x7b0   :  { %3048 = vmatmul.mubr.msk.f32.gmra.mrb[16].mxu1 %vm1049_vm11, %v3364_v38 }
 0x7b1   :  { %3564 = vmatpush1.bf16.msra.mxu1 %v3563_v47  ;;  %1824 = vmatprep.mubr.f32.mxu1 %v4324_v30  ;;  %v1967_v47 = vpop.f32.mrb[30].mxu0 }
 0x7b2   :  { %3598 = vmatprep.subr.bf16.mxu1 %v5078_v48  ;;  %v1969_v37 = vpop.f32.mrb[31].mxu0 }
 0x7b4   :  { %3049 = vmatmul.mubr.msk.f32.vlgmr.msra.gmra.mrb[18].mxu1 %vm1049_vm11, %v1629_v44  ;;  %v1895_v44 = vld [vmem:[#allocation8 + $0x1d0] sm:$0xff] }
 0x7b5   :  { %3600 = vmatpush1.bf16.msra.mxu1 %v5082_v51  ;;  %1830 = vmatprep.mubr.f32.mxu1 %v4324_v30  ;;  %v5128_v43 = vpack.c.bf16 %v1899_v42, %v1895_v44 }
 0x7b6   :  { %3602 = vmatprep.subr.bf16.mxu1 %v5085_v52 }
 0x7b8   :  { %3050 = vmatmul.mubr.msk.f32.gmra.mrb[20].mxu1 %vm1049_vm11, %v3364_v38  ;;  %v1896_v38 = vld [vmem:[#allocation8 + $0x1d8] sm:$0xff] }
 0x7b9   :  { %3604 = vmatpush1.bf16.msra.mxu1 %v5090_v58  ;;  %2036 = vmatprep.mubr.f32.mxu1 %v4324_v30  ;;  %v5125_v41 = vpack.c.bf16 %v1900_v39, %v1896_v38 }
 0x7ba   :  { %3606 = vmatprep.subr.bf16.mxu1 %v5093_v61 }
 0x7bd   :  { %3608 = vmatpush1.bf16.msra.mxu1 %v5097_v40 }
 0x7be   :  { %3610 = vmatprep.subr.bf16.mxu1 %v5101_v7 }
 0x7c1   :  { %3612 = vmatpush1.bf16.msra.mxu1 %v5104_v60 }
 0x7c2   :  { %3614 = vmatprep.subr.bf16.mxu1 %v5107_v11 }
 0x7c5   :  { %3616 = vmatpush1.bf16.msra.mxu1 %v5110_v28 }
 0x7c6   :  { %3618 = vmatprep.subr.bf16.mxu1 %v5113_v16 }
 0x7c9   :  { %3620 = vmatpush1.bf16.msra.mxu1 %v5116_v35 }
 0x7ca   :  { %3622 = vmatprep.subr.bf16.mxu1 %v5119_v36 }
 0x7cd   :  { %3624 = vmatpush1.bf16.msra.mxu1 %v5122_v14 }
 0x7ce   :  { %3626 = vmatprep.subr.bf16.mxu1 %v5125_v41 }
 0x7d1   :  { %3628 = vmatpush1.bf16.msra.mxu1 %v5128_v43 }
 0x7d2   :  { %3662 = vmatprep.subr.bf16.mxu1 %v5078_v48 }
 0x7d4   :  { %2037 = vmatmul.mubr.f32.vlgmr.msra.gmra.mrb[22].mxu1 %v4324_v30 }
 0x7d5   :  { %3664 = vmatpush1.bf16.msra.mxu1 %v5082_v51  ;;  %2206 = vmatprep.mubr.f32.mxu1 %v4324_v30 }
 0x7d6   :  { %3666 = vmatprep.subr.bf16.mxu1 %v5085_v52 }
 0x7d9   :  { %3668 = vmatpush1.bf16.msra.mxu1 %v5090_v58 }
 0x7da   :  { %3670 = vmatprep.subr.bf16.mxu1 %v5093_v61 }
 0x7dd   :  { %3672 = vmatpush1.bf16.msra.mxu1 %v5097_v40 }
 0x7de   :  { %3674 = vmatprep.subr.bf16.mxu1 %v5101_v7 }
 0x7e1   :  { %3676 = vmatpush1.bf16.msra.mxu1 %v5104_v60 }
 0x7e2   :  { %3678 = vmatprep.subr.bf16.mxu1 %v5107_v11 }
 0x7e5   :  { %3680 = vmatpush1.bf16.msra.mxu1 %v5110_v28 }
 0x7e6   :  { %3682 = vmatprep.subr.bf16.mxu1 %v5113_v16 }
 0x7e9   :  { %3684 = vmatpush1.bf16.msra.mxu1 %v5116_v35 }
 0x7ea   :  { %3686 = vmatprep.subr.bf16.mxu1 %v5119_v36 }
 0x7ed   :  { %3688 = vmatpush1.bf16.msra.mxu1 %v5122_v14 }
 0x7ee   :  { %3690 = vmatprep.subr.bf16.mxu1 %v5125_v41 }
 0x7f1   :  { %3692 = vmatpush1.bf16.msra.mxu1 %v5128_v43 }
 0x7f2   :  { %3726 = vmatprep.subr.bf16.mxu1 %v5078_v48 }
 0x87f   :  { %v1749_v45 = vpop.f32.mrb[14].mxu1 }
 0x880   :  { %v1751_v53 = vpop.f32.mrb[15].mxu1  ;;  %v5159_v0 = vadd.f32 %v1749_v45, %v5153_v3 }
 0x881   :  { %v5156_v34 = vadd.f32 %v1751_v53, %v5151_v63 }
 0x882   :  { %v2043_v10 = vadd.f32 %v1967_v47, %v5159_v0 }
 0x883   :  { %v2044_v9 = vadd.f32 %v1969_v37, %v5156_v34 }
 0x884   :  { %v3051_v19 = vmul.f32 -1.442695, %v2043_v10 }
 0x885   :  { %v3052_v55 = vmul.f32 -1.442695, %v2044_v9 }
 0x887   :  { %v1826_v46 = vpop.f32.mrb[18].mxu1  ;;  %4037 = vpow2.f32 %v3052_v55 }
 0x888   :  { %v1828_v4 = vpop.f32.mrb[19].mxu1  ;;  %4039 = vpow2.f32 %v3051_v19  ;;  %v5168_v38 = vadd.f32 %v1826_v46, %v5163_v27 }
 0x889   :  { %v5171_v39 = vadd.f32 %v1828_v4, %v5165_v29 }
 0x891   :  { %v4038_v25 = vpop.eup %4037 }
 0x892   :  { %v4040_v26 = vpop.eup %4039  ;;  %v2056_v31 = vadd.f32 1.0, %v4038_v25 }
 0x893   :  { %v2050_v12 = vadd.f32 1.0, %v4040_v26 }
 0x894   :  { %4041 = vrcp.f32 %v2056_v31 }
 0x895   :  { %4043 = vrcp.f32 %v2050_v12 }
 0x89e   :  { %v4042_v49 = vpop.eup %4041 }
 0x89f   :  { %v4044_v45 = vpop.eup %4043  ;;  %v2066_v2 = vmul.f32 0.0, %v4042_v49 }
 0x8a7   :  { %v2038_v44 = vpop.f32.mrb[22].mxu1 }
 0x8a8   :  { %v2045_v42 = vadd.f32 %v2038_v44, %v5168_v38  ;;  %v2040_v47 = vpop.f32.mrb[23].mxu1 }
 0x8a9   :  { %v2046_v37 = vadd.f32 %v2040_v47, %v5171_v39 }
 0x8aa   :  { %4045 = vtanh.f32 %v2045_v42 }
 0x8ab   :  { %v3053_v17 = vmul.f32 -1.442695, %v2046_v37 }
 0x8ad   :  { %4047 = vpow2.f32 %v3053_v17 }
 0x8b4   :  { %v4046_v53 = vpop.eup %4045 }
 0x8b5   :  { %v2067_v56 = vmul.f32 %v4046_v53, %v4044_v45 }
 0x8b7   :  { %v4048_v57 = vpop.eup %4047  ;;  %v5175_v46 = vadd.f32 %v2067_v56, %v2066_v2 }
 0x8b8   :  { %v2063_v4 = vadd.f32 1.0, %v4048_v57 }
 0x8b9   :  { %4049 = vtanh.f32 %v5175_v46 }
 0x8ba   :  { %4051 = vrcp.f32 %v2063_v4 }
 0x8c3   :  { %v4050_v9 = vpop.eup %4049 }
 0x8c4   :  { %v4052_v10 = vpop.eup %4051 }
 0x8c5   :  { %v2070_v55 = vmul.f32 %v4052_v10, %v4050_v9 }
 0x8c7   :  { %2136 = vmatmul.mubr.f32.vlgmr.msra.gmra.mrb[32].mxu0 %v2070_v55  ;;  %2207 = vmatmul.mubr.f32.vlgmr.msra.gmra.mrb[24].mxu1 %v2070_v55 }
 0x8c8   :  { %3696 = vmatpush1.bf16.msra.mxu0 %v5004_v23  ;;  %3728 = vmatpush1.bf16.msra.mxu1 %v5082_v51 }
 0x8c9   :  { %3698 = vmatprep.subr.bf16.mxu0 %v5006_v54  ;;  %3730 = vmatprep.subr.bf16.mxu1 %v5085_v52 }
 0x8ca   :  { %2323 = vmatprep.mubr.f32.mxu0 %v4324_v30  ;;  %2394 = vmatprep.mubr.f32.mxu1 %v4324_v30 }
 0x8cc   :  { %3700 = vmatpush1.bf16.msra.mxu0 %v5010_v62  ;;  %3732 = vmatpush1.bf16.msra.mxu1 %v5090_v58 }
 0x8cd   :  { %3702 = vmatprep.subr.bf16.mxu0 %v5013_v59  ;;  %3734 = vmatprep.subr.bf16.mxu1 %v5093_v61 }
 0x8d0   :  { %3704 = vmatpush1.bf16.msra.mxu0 %v5016_v5  ;;  %3736 = vmatpush1.bf16.msra.mxu1 %v5097_v40 }
 0x8d1   :  { %3706 = vmatprep.subr.bf16.mxu0 %v5019_v6  ;;  %3738 = vmatprep.subr.bf16.mxu1 %v5101_v7 }
 0x8d4   :  { %3708 = vmatpush1.bf16.msra.mxu0 %v5022_v8  ;;  %3740 = vmatpush1.bf16.msra.mxu1 %v5104_v60 }
 0x8d5   :  { %3710 = vmatprep.subr.bf16.mxu0 %v5025_v1  ;;  %3742 = vmatprep.subr.bf16.mxu1 %v5107_v11 }
 0x8d8   :  { %3712 = vmatpush1.bf16.msra.mxu0 %v5028_v15  ;;  %3744 = vmatpush1.bf16.msra.mxu1 %v5110_v28 }
 0x8d9   :  { %3714 = vmatprep.subr.bf16.mxu0 %v5031_v18  ;;  %3746 = vmatprep.subr.bf16.mxu1 %v5113_v16 }
 0x8dc   :  { %3716 = vmatpush1.bf16.msra.mxu0 %v5034_v21  ;;  %3748 = vmatpush1.bf16.msra.mxu1 %v5116_v35 }
 0x8dd   :  { %3718 = vmatprep.subr.bf16.mxu0 %v5037_v22  ;;  %3750 = vmatprep.subr.bf16.mxu1 %v5119_v36 }
 0x8e0   :  { %3720 = vmatpush1.bf16.msra.mxu0 %v5040_v13  ;;  %3752 = vmatpush1.bf16.msra.mxu1 %v5122_v14 }
 0x8e1   :  { %3722 = vmatprep.subr.bf16.mxu0 %v5049_v24  ;;  %3754 = vmatprep.subr.bf16.mxu1 %v5125_v41 }
 0x8e4   :  { %3724 = vmatpush1.bf16.msra.mxu0 %v5053_v33  ;;  %3756 = vmatpush1.bf16.msra.mxu1 %v5128_v43 }
 0x8e5   :  { %3758 = vmatprep.subr.bf16.mxu0 %v5002_v32  ;;  %3790 = vmatprep.subr.bf16.mxu1 %v5078_v48 }
 0x99a   :  { %v2137_v19 = vpop.f32.mrb[32].mxu0  ;;  %v2208_v20 = vpop.f32.mrb[24].mxu1 }
 0x99b   :  { %v2217_v50 = vrot.slane %v2137_v19, 6  ;;  %v2139_v25 = vpop.f32.mrb[33].mxu0  ;;  %v2210_v26 = vpop.f32.mrb[25].mxu1  ;;  %v2219_v49 = vrot.slane %v2208_v20, 6  ;;  %v2249_v19 = vrot.slane %v5175_v46, 6 }
 0x99c   :  { %v2218_v31 = vrot.slane %v2139_v25, 6  ;;  %v2220_v37 = vrot.slane %v2210_v26, 6 }
 0x99d   :  { %v2225_v12 = vadd.f32 %v2217_v50, %v5159_v0  ;;  %v2227_v53 = vadd.f32 %v2219_v49, %v5168_v38 }
 0x99e   :  { %v2226_v44 = vadd.f32 %v2218_v31, %v5156_v34  ;;  %v2228_v17 = vadd.f32 %v2220_v37, %v5171_v39 }
 0x99f   :  { %v3054_v42 = vmul.f32 -1.442695, %v2225_v12 }
 0x9a0   :  { %v3055_v47 = vmul.f32 -1.442695, %v2226_v44  ;;  %v3056_v45 = vmul.f32 -1.442695, %v2228_v17 }
 0x9a1   :  { %4053 = vpow2.f32 %v3054_v42 }
 0x9a2   :  { %4055 = vpow2.f32 %v3055_v47 }
 0x9a3   :  { %4057 = vpow2.f32 %v3056_v45 }
 0x9a4   :  { %4059 = vtanh.f32 %v2227_v53 }
 0x9ab   :  { %v4054_v2 = vpop.eup %4053 }
 0x9ac   :  { %v4056_v56 = vpop.eup %4055  ;;  %v2232_v57 = vadd.f32 1.0, %v4054_v2 }
 0x9ad   :  { %v2238_v4 = vadd.f32 1.0, %v4056_v56  ;;  %v4058_v9 = vpop.eup %4057 }
 0x9ae   :  { %4061 = vrcp.f32 %v2232_v57  ;;  %v4060_v10 = vpop.eup %4059  ;;  %v2245_v26 = vadd.f32 1.0, %v4058_v9 }
 0x9af   :  { %4063 = vrcp.f32 %v2238_v4 }
 0x9b0   :  { %4065 = vrcp.f32 %v2245_v26 }
 0x9b8   :  { %v4062_v55 = vpop.eup %4061 }
 0x9b9   :  { %v4064_v50 = vpop.eup %4063  ;;  %v2252_v25 = vmul.f32 %v4062_v55, %v4060_v10 }
 0x9ba   :  { %v2251_v20 = vmul.f32 %v4064_v50, %v2249_v19  ;;  %v4066_v12 = vpop.eup %4065 }
 0x9bc   :  { %v5217_v31 = vadd.f32 %v2252_v25, %v2251_v20 }
 0x9be   :  { %4067 = vtanh.f32 %v5217_v31 }
 0x9c8   :  { %v4068_v44 = vpop.eup %4067 }
 0x9c9   :  { %v2255_v42 = vmul.f32 %v4068_v44, %v4066_v12 }
 0x9cb   :  { %v2257_v47 = vrot.slane %v2255_v42, 2 }
 0x9cd   :  { %2324 = vmatmul.mubr.f32.vlgmr.msra.gmra.mrb[34].mxu0 %v2257_v47  ;;  %2395 = vmatmul.mubr.f32.vlgmr.msra.gmra.mrb[26].mxu1 %v2257_v47  ;;  %v2437_v47 = vrot.slane %v5217_v31, 6 }
 0x9ce   :  { %3760 = vmatpush1.bf16.msra.mxu0 %v5004_v23  ;;  %3792 = vmatpush1.bf16.msra.mxu1 %v5082_v51 }
 0x9cf   :  { %3762 = vmatprep.subr.bf16.mxu0 %v5006_v54  ;;  %3794 = vmatprep.subr.bf16.mxu1 %v5085_v52 }
 0x9d0   :  { %2511 = vmatprep.mubr.f32.mxu0 %v4324_v30  ;;  %2582 = vmatprep.mubr.f32.mxu1 %v4324_v30 }
 0x9d2   :  { %3764 = vmatpush1.bf16.msra.mxu0 %v5010_v62  ;;  %3796 = vmatpush1.bf16.msra.mxu1 %v5090_v58 }
 0x9d3   :  { %3766 = vmatprep.subr.bf16.mxu0 %v5013_v59  ;;  %3798 = vmatprep.subr.bf16.mxu1 %v5093_v61 }
 0x9d6   :  { %3768 = vmatpush1.bf16.msra.mxu0 %v5016_v5  ;;  %3800 = vmatpush1.bf16.msra.mxu1 %v5097_v40 }
 0x9d7   :  { %3770 = vmatprep.subr.bf16.mxu0 %v5019_v6  ;;  %3802 = vmatprep.subr.bf16.mxu1 %v5101_v7 }
 0x9da   :  { %3772 = vmatpush1.bf16.msra.mxu0 %v5022_v8  ;;  %3804 = vmatpush1.bf16.msra.mxu1 %v5104_v60 }
 0x9db   :  { %3774 = vmatprep.subr.bf16.mxu0 %v5025_v1  ;;  %3806 = vmatprep.subr.bf16.mxu1 %v5107_v11 }
 0x9de   :  { %3776 = vmatpush1.bf16.msra.mxu0 %v5028_v15  ;;  %3808 = vmatpush1.bf16.msra.mxu1 %v5110_v28 }
 0x9df   :  { %3778 = vmatprep.subr.bf16.mxu0 %v5031_v18  ;;  %3810 = vmatprep.subr.bf16.mxu1 %v5113_v16 }
 0x9e2   :  { %3780 = vmatpush1.bf16.msra.mxu0 %v5034_v21  ;;  %3812 = vmatpush1.bf16.msra.mxu1 %v5116_v35 }
 0x9e3   :  { %3782 = vmatprep.subr.bf16.mxu0 %v5037_v22  ;;  %3814 = vmatprep.subr.bf16.mxu1 %v5119_v36 }
 0x9e6   :  { %3784 = vmatpush1.bf16.msra.mxu0 %v5040_v13  ;;  %3816 = vmatpush1.bf16.msra.mxu1 %v5122_v14 }
 0x9e7   :  { %3786 = vmatprep.subr.bf16.mxu0 %v5049_v24  ;;  %3818 = vmatprep.subr.bf16.mxu1 %v5125_v41 }
 0x9ea   :  { %3788 = vmatpush1.bf16.msra.mxu0 %v5053_v33  ;;  %3820 = vmatpush1.bf16.msra.mxu1 %v5128_v43 }
 0x9eb   :  { %3822 = vmatprep.subr.bf16.mxu1 %v5002_v32 }
 0xaa0   :  { %v2325_v46 = vpop.f32.mrb[34].mxu0  ;;  %v2396_v37 = vpop.f32.mrb[26].mxu1 }
 0xaa1   :  { %v2405_v17 = vrot.slane %v2325_v46, 4  ;;  %v2327_v49 = vpop.f32.mrb[35].mxu0  ;;  %v2398_v45 = vpop.f32.mrb[27].mxu1  ;;  %v2407_v55 = vrot.slane %v2396_v37, 4 }
 0xaa2   :  { %v2406_v53 = vrot.slane %v2327_v49, 4  ;;  %v2408_v9 = vrot.slane %v2398_v45, 4 }
 0xaa3   :  { %v2413_v2 = vadd.f32 %v2405_v17, %v5159_v0  ;;  %v2415_v32 = vadd.f32 %v2407_v55, %v5168_v38 }
 0xaa4   :  { %v2414_v56 = vadd.f32 %v2406_v53, %v5156_v34  ;;  %v2416_v10 = vadd.f32 %v2408_v9, %v5171_v39 }
 0xaa5   :  { %v3057_v57 = vmul.f32 -1.442695, %v2413_v2 }
 0xaa6   :  { %v3058_v4 = vmul.f32 -1.442695, %v2414_v56  ;;  %v3059_v19 = vmul.f32 -1.442695, %v2416_v10 }
 0xaa7   :  { %4069 = vpow2.f32 %v3057_v57 }
 0xaa8   :  { %4071 = vpow2.f32 %v3058_v4 }
 0xaa9   :  { %4073 = vpow2.f32 %v3059_v19 }
 0xaaa   :  { %4075 = vtanh.f32 %v2415_v32 }
 0xab1   :  { %v4070_v50 = vpop.eup %4069 }
 0xab2   :  { %v4072_v25 = vpop.eup %4071  ;;  %v2420_v26 = vadd.f32 1.0, %v4070_v50 }
 0xab3   :  { %v2426_v20 = vadd.f32 1.0, %v4072_v25  ;;  %v4074_v12 = vpop.eup %4073 }
 0xab4   :  { %4077 = vrcp.f32 %v2420_v26  ;;  %v4076_v44 = vpop.eup %4075  ;;  %v2433_v49 = vadd.f32 1.0, %v4074_v12 }
 0xab5   :  { %4079 = vrcp.f32 %v2426_v20 }
 0xab6   :  { %4081 = vrcp.f32 %v2433_v49  ;;  %v2821_v49 = vld [vmem:[%s5392_s6 + $0x68] sm:$0xff] }
 0xabe   :  { %v4078_v42 = vpop.eup %4077 }
 0xabf   :  { %v4080_v46 = vpop.eup %4079  ;;  %v2440_v17 = vmul.f32 %v4078_v42, %v4076_v44  ;;  %v2818_v42 = vld [vmem:[%s5392_s6 + $0x50] sm:$0xff] }
 0xac0   :  { %v2439_v37 = vmul.f32 %v4080_v46, %v2437_v47  ;;  %v4082_v53 = vpop.eup %4081  ;;  %v2819_v47 = vld [vmem:[%s5392_s6 + $0x58] sm:$0xff] }
 0xac1   :  { %v3901_v46 = vpack.c.bf16 %v2819_v47, %v2818_v42 }
 0xac2   :  { %v2441_v45 = vadd.f32 %v2440_v17, %v2439_v37  ;;  %v2820_v17 = vld [vmem:[%s5392_s6 + $0x60] sm:$0xff] }
 0xac3   :  { %v3904_v37 = vpack.c.bf16 %v2821_v49, %v2820_v17 }
 0xac4   :  { %4083 = vtanh.f32 %v2441_v45  ;;  %v2625_v55 = vrot.slane %v2441_v45, 6  ;;  %v2822_v45 = vld [vmem:[%s5392_s6 + $0x70] sm:$0xff] }
 0xace   :  { %v4084_v2 = vpop.eup %4083 }
 0xacf   :  { %v2443_v56 = vmul.f32 %v4084_v2, %v4082_v53  ;;  %v2823_v53 = vld [vmem:[%s5392_s6 + $0x78] sm:$0xff] }
 0xad0   :  { %v3907_v2 = vpack.c.bf16 %v2823_v53, %v2822_v45 }
 0xad1   :  { %v2445_v57 = vrot.slane %v2443_v56, 4 }
 0xad3   :  { %2512 = vmatmul.mubr.f32.vlgmr.msra.gmra.mrb[36].mxu0 %v2445_v57  ;;  %2583 = vmatmul.mubr.f32.vlgmr.msra.gmra.mrb[28].mxu1 %v2445_v57 }
 0xad4   :  { %3824 = vmatpush1.bf16.msra.mxu1 %v5004_v23  ;;  %2699 = vmatprep.mubr.f32.mxu1 %v4324_v30 }
 0xad5   :  { %3826 = vmatprep.subr.bf16.mxu1 %v5006_v54  ;;  %3397 = vmatprep.mubr.msk.f32.mxu0 %vm4326_vm0, %v4324_v30 }
 0xad8   :  { %3828 = vmatpush1.bf16.msra.mxu1 %v5010_v62 }
 0xad9   :  { %3830 = vmatprep.subr.bf16.mxu1 %v5013_v59 }
 0xadc   :  { %3832 = vmatpush1.bf16.msra.mxu1 %v5016_v5 }
 0xadd   :  { %3834 = vmatprep.subr.bf16.mxu1 %v5019_v6 }
 0xae0   :  { %3836 = vmatpush1.bf16.msra.mxu1 %v5022_v8 }
 0xae1   :  { %3838 = vmatprep.subr.bf16.mxu1 %v5025_v1 }
 0xae4   :  { %3840 = vmatpush1.bf16.msra.mxu1 %v5028_v15 }
 0xae5   :  { %3842 = vmatprep.subr.bf16.mxu1 %v5031_v18 }
 0xae8   :  { %3844 = vmatpush1.bf16.msra.mxu1 %v5034_v21 }
 0xae9   :  { %3846 = vmatprep.subr.bf16.mxu1 %v5037_v22 }
 0xaec   :  { %3848 = vmatpush1.bf16.msra.mxu1 %v5040_v13 }
 0xaed   :  { %3850 = vmatprep.subr.bf16.mxu1 %v5049_v24 }
 0xaf0   :  { %3852 = vmatpush1.bf16.msra.mxu1 %v5053_v33 }
 0xaf1   :  { %3854 = vmatprep.subr.bf16.mxu1 %v5078_v48 }
 0xba6   :  { %v2513_v23 = vpop.f32.mrb[36].mxu0  ;;  %v2584_v54 = vpop.f32.mrb[28].mxu1 }
 0xba7   :  { %v2593_v62 = vrot.slane %v2513_v23, 2  ;;  %v2515_v59 = vpop.f32.mrb[37].mxu0  ;;  %v2586_v5 = vpop.f32.mrb[29].mxu1  ;;  %v2595_v13 = vrot.slane %v2584_v54, 2 }
 0xba8   :  { %v2594_v6 = vrot.slane %v2515_v59, 2  ;;  %v2596_v21 = vrot.slane %v2586_v5, 2 }
 0xba9   :  { %v2601_v8 = vadd.f32 %v2593_v62, %v5159_v0  ;;  %v2603_v33 = vadd.f32 %v2595_v13, %v5168_v38 }
 0xbaa   :  { %v2602_v1 = vadd.f32 %v2594_v6, %v5156_v34  ;;  %v2604_v22 = vadd.f32 %v2596_v21, %v5171_v39 }
 0xbab   :  { %v3060_v15 = vmul.f32 -1.442695, %v2601_v8 }
 0xbac   :  { %v3061_v18 = vmul.f32 -1.442695, %v2602_v1  ;;  %v3062_v24 = vmul.f32 -1.442695, %v2604_v22 }
 0xbad   :  { %4085 = vpow2.f32 %v3060_v15 }
 0xbae   :  { %4087 = vpow2.f32 %v3061_v18 }
 0xbaf   :  { %4089 = vpow2.f32 %v3062_v24 }
 0xbb0   :  { %4091 = vtanh.f32 %v2603_v33 }
 0xbb7   :  { %v4086_v48 = vpop.eup %4085 }
 0xbb8   :  { %v4088_v31 = vpop.eup %4087  ;;  %v2608_v4 = vadd.f32 1.0, %v4086_v48 }
 0xbb9   :  { %v2614_v9 = vadd.f32 1.0, %v4088_v31  ;;  %v4090_v34 = vpop.eup %4089 }
 0xbba   :  { %4093 = vrcp.f32 %v2608_v4  ;;  %v4092_v0 = vpop.eup %4091  ;;  %v2621_v50 = vadd.f32 1.0, %v4090_v34 }
 0xbbb   :  { %4095 = vrcp.f32 %v2614_v9 }
 0xbbc   :  { %4097 = vrcp.f32 %v2621_v50  ;;  %v2898_v50 = vld [vmem:[#allocation10 + $0x10] sm:$0xff] }
 0xbc4   :  { %v4094_v10 = vpop.eup %4093 }
 0xbc5   :  { %v4096_v19 = vpop.eup %4095  ;;  %v2628_v32 = vmul.f32 %v4094_v10, %v4092_v0  ;;  %v2896_v0 = vld [vmem:[#allocation10] sm:$0xff]  ;;  %v2897_v10 = vld [vmem:[#allocation10 + $0x8] sm:$0xff] }
 0xbc6   :  { %v2627_v39 = vmul.f32 %v4096_v19, %v2625_v55  ;;  %v4098_v38 = vpop.eup %4097 }
 0xbc8   :  { %v5279_v25 = vadd.f32 %v2628_v32, %v2627_v39  ;;  %v2899_v39 = vld [vmem:[#allocation10 + $0x18] sm:$0xff] }
 0xbca   :  { %4099 = vtanh.f32 %v5279_v25  ;;  %v2801_v1 = vrot.slane %v5279_v25, 6  ;;  %v2900_v25 = vld [vmem:[#allocation10 + $0x20] sm:$0xff] }
 0xbd4   :  { %v4100_v26 = vpop.eup %4099 }
 0xbd5   :  { %v2631_v20 = vmul.f32 %v4100_v26, %v4098_v38  ;;  %v2901_v38 = vld [vmem:[#allocation10 + $0x28] sm:$0xff] }
 0xbd6   :  { %v3916_v26 = vpack.c.bf16 %v2901_v38, %v2900_v25 }
 0xbd7   :  { %v2633_v12 = vrot.slane %v2631_v20, 6  ;;  %v2902_v20 = vld [vmem:[#allocation10 + $0x30] sm:$0xff] }
 0xbd9   :  { %2700 = vmatmul.mubr.f32.vlgmr.msra.gmra.mrb[16].mxu1 %v2633_v12 }
 0xbda   :  { %3856 = vmatpush1.bf16.msra.mxu1 %v5082_v51  ;;  %2770 = vmatprep.mubr.f32.mxu1 %v4324_v30  ;;  %v2808_v51 = vld [vmem:[%s5392_s6] sm:$0xff] }
 0xbdb   :  { %3858 = vmatprep.subr.bf16.mxu1 %v5085_v52  ;;  %v2809_v52 = vld [vmem:[%s5392_s6 + $0x8] sm:$0xff] }
 0xbde   :  { %3860 = vmatpush1.bf16.msra.mxu1 %v5090_v58  ;;  %v3886_v58 = vpack.c.bf16 %v2809_v52, %v2808_v51  ;;  %v2904_v52 = vld [vmem:[#allocation10 + $0x40] sm:$0xff] }
 0xbdf   :  { %3862 = vmatprep.subr.bf16.mxu1 %v5093_v61  ;;  %v4325_v61 = vmov 0.0|0.0  }
 0xbe0   :  { %3885 = vmatprep.subr.bf16.mxu0 %v4325_v61 }
 0xbe1   :  { %3887 = vmatpush3.bf16.msra.mxu0 %v3886_v58  ;;  %v2905_v58 = vld [vmem:[#allocation10 + $0x48] sm:$0xff] }
 0xbe2   :  { %3864 = vmatpush1.bf16.msra.mxu1 %v5097_v40  ;;  %3888 = vmatprep.subr.bf16.mxu0 %v4325_v61  ;;  %v2810_v40 = vld [vmem:[%s5392_s6 + $0x10] sm:$0xff] }
 0xbe3   :  { %3866 = vmatprep.subr.bf16.mxu1 %v5101_v7  ;;  %v2811_v7 = vld [vmem:[%s5392_s6 + $0x18] sm:$0xff] }
 0xbe6   :  { %3868 = vmatpush1.bf16.msra.mxu1 %v5104_v60  ;;  %v3889_v60 = vpack.c.bf16 %v2811_v7, %v2810_v40  ;;  %v3922_v40 = vpack.c.bf16 %v2905_v58, %v2904_v52  ;;  %v2907_v7 = vld [vmem:[#allocation10 + $0x58] sm:$0xff] }
 0xbe7   :  { %3870 = vmatprep.subr.bf16.mxu1 %v5107_v11  ;;  %v2812_v11 = vld [vmem:[%s5392_s6 + $0x20] sm:$0xff] }
 0xbe8   :  { %3890 = vmatpush3.bf16.msra.mxu0 %v3889_v60 }
 0xbe9   :  { %3891 = vmatprep.subr.bf16.mxu0 %v4325_v61 }
 0xbea   :  { %3872 = vmatpush1.bf16.msra.mxu1 %v5110_v28  ;;  %v2813_v28 = vld [vmem:[%s5392_s6 + $0x28] sm:$0xff] }
 0xbeb   :  { %3874 = vmatprep.subr.bf16.mxu1 %v5113_v16  ;;  %v3892_v16 = vpack.c.bf16 %v2813_v28, %v2812_v11  ;;  %v2908_v11 = vld [vmem:[#allocation10 + $0x60] sm:$0xff]  ;;  %v2909_v28 = vld [vmem:[#allocation10 + $0x68] sm:$0xff] }
 0xbed   :  { %3893 = vmatpush3.bf16.msra.mxu0 %v3892_v16  ;;  %v3928_v16 = vpack.c.bf16 %v2909_v28, %v2908_v11 }
 0xbee   :  { %3876 = vmatpush1.bf16.msra.mxu1 %v5116_v35  ;;  %3894 = vmatprep.subr.bf16.mxu0 %v4325_v61  ;;  %v2814_v35 = vld [vmem:[%s5392_s6 + $0x30] sm:$0xff] }
 0xbef   :  { %3878 = vmatprep.subr.bf16.mxu1 %v5119_v36  ;;  %v2815_v36 = vld [vmem:[%s5392_s6 + $0x38] sm:$0xff] }
 0xbf2   :  { %3880 = vmatpush1.bf16.msra.mxu1 %v5122_v14  ;;  %v3895_v14 = vpack.c.bf16 %v2815_v36, %v2814_v35  ;;  %v2910_v35 = vld [vmem:[#allocation10 + $0x70] sm:$0xff]  ;;  %v2911_v36 = vld [vmem:[#allocation10 + $0x78] sm:$0xff] }
 0xbf3   :  { %3882 = vmatprep.subr.bf16.mxu1 %v5125_v41  ;;  %v2816_v41 = vld [vmem:[%s5392_s6 + $0x40] sm:$0xff] }
 0xbf4   :  { %3896 = vmatpush3.bf16.msra.mxu0 %v3895_v14  ;;  %v3931_v14 = vpack.c.bf16 %v2911_v36, %v2910_v35 }
 0xbf5   :  { %3897 = vmatprep.subr.bf16.mxu0 %v4325_v61 }
 0xbf6   :  { %3884 = vmatpush1.bf16.msra.mxu1 %v5128_v43  ;;  %v2817_v43 = vld [vmem:[%s5392_s6 + $0x48] sm:$0xff]  ;;  %s4327_s6 = smov [#allocation14]  }
 0xbf7   :  { %v3898_v44 = vpack.c.bf16 %v2817_v43, %v2816_v41  ;;  %v2824_v41 = vld [vmem:[#allocation11 + $0x22] ss:$0 sm:$0xff]  ;;  %s3002_s4 = sshll.u32 %s4327_s6, 4  ;;  %s3003_s4 = int_to_ptr.vmem [resolvable:$true] %s3002_s4 }
 0xbf8   :  { %s4275_s14 = scalar_lea.vmem %s3003_s4, 32  ;;  %p4280_p1 = scmp.lt.s32.totalorder %s3003_s4, %s3003_s4 }
 0xbf9   :  { %2771 = vmatmul.mubr.f32.vlgmr.msra.gmra.mrb[20].mxu1 %v2633_v12  ;;  %3899 = vmatpush3.bf16.msra.mxu0 %v3898_v44  ;;  %v2903_v12 = vld [vmem:[#allocation10 + $0x38] sm:$0xff]  ;;  %p4276_p0 = scmp.ne.s32.totalorder %s3003_s4, %s4275_s14  ;;  %p4281_p2 = scmp.lt.s32.totalorder %s4275_s14, %s4275_s14 }
 0xbfa   :  { %3900 = vmatprep.subr.bf16.mxu0 %v4325_v61  ;;  %v3919_v51 = vpack.c.bf16 %v2903_v12, %v2902_v20 }
 0xbfb   :  { %p4282_p3 = por %p4281_p2, %p4280_p1 }
 0xbfd   :  { %3902 = vmatpush3.bf16.msra.mxu0 %v3901_v46  ;;  %v2912_v46 = vld [vmem:[#allocation11 + $0x23] ss:$0 sm:$0xff]  ;;  %p4283_p4 = pnand %p4282_p3, %p4276_p0 }
 0xbfe   :  { %3903 = vmatprep.subr.bf16.mxu0 %v4325_v61 }
 0xc01   :  { %3905 = vmatpush3.bf16.msra.mxu0 %v3904_v37 }
 0xc02   :  { %3906 = vmatprep.subr.bf16.mxu0 %v4325_v61 }
 0xc05   :  { %3908 = vmatpush3.bf16.msra.mxu0 %v3907_v2 }
 0xc06   :  { %3909 = vmatprep.subr.bf16.mxu0 %v4325_v61 }
 0xcac   :  { %v2701_v56 = vpop.f32.mrb[16].mxu1 }
 0xcad   :  { %v2703_v57 = vpop.f32.mrb[17].mxu1  ;;  %v3933_v62 = vadd.f32 %v2701_v56, %v5153_v3 }
 0xcae   :  { %v3934_v23 = vadd.f32 %v2703_v57, %v5151_v63 }
 0xcaf   :  { %v3063_v59 = vmul.f32 -1.442695, %v3933_v62 }
 0xcb0   :  { %v3064_v54 = vmul.f32 -1.442695, %v3934_v23 }
 0xcb2   :  { %4101 = vpow2.f32 %v3064_v54 }
 0xcb3   :  { %4103 = vpow2.f32 %v3063_v59 }
 0xcbc   :  { %v4102_v5 = vpop.eup %4101 }
 0xcbd   :  { %v2790_v6 = vadd.f32 1.0, %v4102_v5  ;;  %v4104_v8 = vpop.eup %4103 }
 0xcbe   :  { %v2784_v18 = vadd.f32 1.0, %v4104_v8 }
 0xcbf   :  { %4105 = vrcp.f32 %v2790_v6 }
 0xcc0   :  { %4107 = vrcp.f32 %v2784_v18 }
 0xcc9   :  { %v4106_v15 = vpop.eup %4105 }
 0xcca   :  { %v2803_v21 = vmul.f32 %v4106_v15, %v2801_v1  ;;  %v4108_v33 = vpop.eup %4107 }
 0xccc   :  { %v2772_v22 = vpop.f32.mrb[20].mxu1 }
 0xccd   :  { %v3935_v13 = vadd.f32 %v2772_v22, %v5163_v27  ;;  %v2774_v24 = vpop.f32.mrb[21].mxu1  ;;  %v3910_v27 = vpack.c.bf16 %v2897_v10, %v2896_v0 }
 0xcce   :  { %v3936_v63 = vadd.f32 %v2774_v24, %v5165_v29  ;;  %v3913_v29 = vpack.c.bf16 %v2899_v39, %v2898_v50 }
 0xccf   :  { %4109 = vtanh.f32 %v3935_v13 }
 0xcd0   :  { %v3065_v3 = vmul.f32 -1.442695, %v3936_v63 }
 0xcd2   :  { %4111 = vpow2.f32 %v3065_v3 }
 0xcd9   :  { %v4110_v48 = vpop.eup %4109 }
 0xcda   :  { %v2804_v31 = vmul.f32 %v4110_v48, %v4108_v33 }
 0xcdc   :  { %v4112_v4 = vpop.eup %4111  ;;  %v2805_v9 = vadd.f32 %v2804_v31, %v2803_v21 }
 0xcdd   :  { %v2797_v34 = vadd.f32 1.0, %v4112_v4 }
 0xcde   :  { %4113 = vtanh.f32 %v2805_v9 }
 0xcdf   :  { %4115 = vrcp.f32 %v2797_v34 }
 0xce8   :  { %v4114_v55 = vpop.eup %4113 }
 0xce9   :  { %v4116_v19 = vpop.eup %4115 }
 0xcea   :  { %v2807_v32 = vmul.f32 %v4116_v19, %v4114_v55 }
 0xcec   :  { %3398 = vmatmul.mubr.f32.vlgmr.msra.gmra.mrb[38].mxu0 %v2807_v32 }
 0xced   :  { %3911 = vmatpush3.bf16.msra.mxu0 %v3910_v27  ;;  %3432 = vmatprep.mubr.msk.f32.mxu0 %vm4326_vm0, %v4324_v30  ;;  %v2906_v30 = vld [vmem:[#allocation10 + $0x50] sm:$0xff] }
 0xcee   :  { %3912 = vmatprep.subr.bf16.mxu0 %v4325_v61  ;;  %v3925_v60 = vpack.c.bf16 %v2907_v7, %v2906_v30 }
 0xcf1   :  { %3914 = vmatpush3.bf16.msra.mxu0 %v3913_v29 }
 0xcf2   :  { %3915 = vmatprep.subr.bf16.mxu0 %v4325_v61 }
 0xcf5   :  { %3917 = vmatpush3.bf16.msra.mxu0 %v3916_v26 }
 0xcf6   :  { %3918 = vmatprep.subr.bf16.mxu0 %v4325_v61 }
 0xcf9   :  { %3920 = vmatpush3.bf16.msra.mxu0 %v3919_v51 }
 0xcfa   :  { %3921 = vmatprep.subr.bf16.mxu0 %v4325_v61 }
 0xcfd   :  { %3923 = vmatpush3.bf16.msra.mxu0 %v3922_v40 }
 0xcfe   :  { %3924 = vmatprep.subr.bf16.mxu0 %v4325_v61 }
 0xd01   :  { %3926 = vmatpush3.bf16.msra.mxu0 %v3925_v60 }
 0xd02   :  { %3927 = vmatprep.subr.bf16.mxu0 %v4325_v61 }
 0xd05   :  { %3929 = vmatpush3.bf16.msra.mxu0 %v3928_v16 }
 0xd06   :  { %3930 = vmatprep.subr.bf16.mxu0 %v4325_v61 }
 0xd09   :  { %3932 = vmatpush3.bf16.msra.mxu0 %v3931_v14 }
 0xdbf   :  { %v2891_v43 = vpop.f32.mrb[38].mxu0 }
 0xdc0   :  { %v2892_v44 = vadd.f32 %v2891_v43, %v2824_v41  ;;  %v3399_v42 = vpop.f32.mrb[39].mxu0 }
 0xdc2   :  { %v2895_v47 = vmax.f32 %v2892_v44, 0.0 }
 0xdc4   :  { %3433 = vmatmul.mubr.f32.vlgmr.msra.gmra.mrb[40].mxu0 %v2895_v47 }
 0xe97   :  { %v2979_v17 = vpop.f32.mrb[40].mxu0 }
 0xe98   :  { %v2980_v49 = vadd.f32 %v2979_v17, %v2912_v46  ;;  %v3434_v37 = vpop.f32.mrb[41].mxu0 }
 0xe9a   :  { %v2984_v45 = vsel %vm2983_vm1, %v2980_v49, -inf }
 0xe9b   :  { %2985 = vmax.xlane.f32.xlu1 %v2984_v45 }
 0xf28   :  { %v2986_v53 = vpop.xlane.xlu1 %2985 }
 0xf29   :  { %v2987_v61 = vsub.f32 %v2980_v49, %v2986_v53 }
 0xf2b   :  { %v2988_v2 = vmul.f32 1.442695, %v2987_v61 }
 0xf2d   :  { %4117 = vpow2.f32 %v2988_v2 }
 0xf37   :  { %v4118_v56 = vpop.eup %4117 }
 0xf38   :  { %v2990_v57 = vsel %vm2983_vm1, %v4118_v56, 0.0 }
 0xf39   :  { %2991 = vadd.xlane.f32.xlu0 %v2990_v57 }
 0xfc6   :  { %v2992_v23 = vpop.xlane.xlu0 %2991 }
 0xfc7   :  { %4119 = vrcp.f32 %v2992_v23 }
 0xfd1   :  { %v4120_v54 = vpop.eup %4119 }
 0xfd2   :  { %v2994_v62 = vmul.f32 %v4120_v54, %v4118_v56 }
 0xfd4   :  { %2995 = vst.msk [vmem:[#allocation14] sm:$0x3] %vm2983_vm1, %v2994_v62 }
 0xfd5   :  { %4286 = shalt.err (!%p4283_p4)
}
 0xfd6   :  { %s4287_s13 = scalar_lea.hbm %s5396_s10, 32 }
 0xfd7   :  { %p4288_p5 = scmp.ne.s32.totalorder %s5396_s10, %s4287_s13  ;;  %p4291_p6 = scmp.lt.u32.totalorder %s4287_s13, %s5396_s10 }
 0xfd9   :  { %p4293_p7 = pnand %p4291_p6, %p4288_p5 }
 0xfdb   :  { %4296 = shalt.err (!%p4293_p7)
}
 0xfdc   :  { %3005 = dma.vmem_to_hbm [thread:$0]  %s3003_s4, 32, %s5396_s10, [#allocation4]  }
 0xfdd   :  { %4305 = dma.done.wait [#allocation4], 32  }
 0xfde   :  { %4306 = vsyncadd [#allocation4], 4294967264 }
 0xfdf   :  { %3009 = vsyncpa [#allocation3], 1 }
 0xfe0   :  { %3010 = vsyncpa [#allocation6], 1 }
 0xfe1   :  { %3011 = vsyncpa [#allocation9], 1 }
 0xfe2   :  { %3012 = vsyncpa [#allocation12], 1 }
 0xfe3   :  { %3013 = vsyncpa [#allocation4], 1 }

</bundles_post_ra>
